<compile_context>
chip_gen: v6e
topology: v6e:2x2x1
jax: 0.10.0
libtpu: 0.0.40
codegen_flags: <defaults>
</compile_context>

<pallas_src>
import numpy as np
import jax
import jax.numpy as jnp
from jax import lax
from jax.experimental import pallas as pl
from jax.experimental.pallas import tpu as pltpu

COS_EPS = 1e-6
_NEG = -3.0e38          # "minus infinity" sentinel (finite, < any real sim)
_BIG_IDX = float(2 ** 30)  # index sentinel (exactly representable in f32)


def _best_match_kernel(fr_ref, fc_ref, rinv_ref, cinv_ref, ns_ref, ne_ref,
                       o_ref, bv_ref, bi_ref):
    """One (TM, TN) tile of the masked cosine-similarity argmax.

    fr_ref  : (TM, D)  bf16 row features (block-row i)
    fc_ref  : (TN, D)  bf16 col features (block-col j)
    rinv_ref: (TM, 1)  f32 1/max(||row||, tiny)
    cinv_ref: (1, TN)  f32 1/max(||col||, tiny) (lane-oriented)
    ns_ref  : (TM, 1)  int32 candidate-bucket start (global col index)
    ne_ref  : (TM, 1)  int32 candidate-bucket end   (exclusive)
    o_ref   : (TM, 1)  int32 best global col index (or -1) — written at last j
    bv_ref  : (TM, 1)  f32 running best value   (VMEM scratch)
    bi_ref  : (TM, 1)  f32 running best index   (VMEM scratch)
    """
    j = pl.program_id(1)
    nj = pl.num_programs(1)
    tn = fc_ref.shape[0]

    @pl.when(j == 0)
    def _init():
        bv_ref[...] = jnp.full(bv_ref.shape, _NEG, jnp.float32)
        bi_ref[...] = jnp.full(bi_ref.shape, -1.0, jnp.float32)

    # MXU: contract over D directly (no transpose); bf16 operands, f32 acc.
    dots = lax.dot_general(
        fr_ref[...], fc_ref[...],
        dimension_numbers=(((1,), (1,)), ((), ())),
        preferred_element_type=jnp.float32)                      # (TM, TN) f32

    # torch CosineSimilarity: sim = dot / max(||a||*||b||, eps).
    # inv_den > 1/eps  <=>  ||a||*||b|| < eps  (inverse norms are finite and
    # positive by construction; zero-norm rows give dot = 0 in both branches).
    inv_den = rinv_ref[...] * cinv_ref[...]                      # (TM, TN)
    sim = jnp.where(inv_den > (1.0 / COS_EPS),
                    dots * (1.0 / COS_EPS),
                    dots * inv_den)

    # Restrict each row to its next-time candidate bucket [ns, ne).
    col = j * tn + lax.broadcasted_iota(jnp.int32, sim.shape, 1)  # (TM, TN)
    mask = (col >= ns_ref[...]) & (col < ne_ref[...])
    sim_m = jnp.where(mask, sim, _NEG)

    # Per-tile max + first-index-of-max (matches np.argmax tie-breaking) using
    # only cross-lane max/min reduces (no argmax lowering needed).
    tile_max = jnp.max(sim_m, axis=-1, keepdims=True)             # (TM, 1)
    colf = col.astype(jnp.float32)
    idx_f = jnp.where(mask & (sim_m >= tile_max), colf, _BIG_IDX)
    tile_arg = jnp.min(idx_f, axis=-1, keepdims=True)             # (TM, 1)

    # Fold into the running accumulators (strict > keeps earliest tile => first
    # occurrence across tiles).
    better = tile_max > bv_ref[...]
    bv_ref[...] = jnp.where(better, tile_max, bv_ref[...])
    bi_ref[...] = jnp.where(better, tile_arg, bi_ref[...])

    @pl.when(j == nj - 1)
    def _store():
        o_ref[...] = bi_ref[...].astype(jnp.int32)


def _round_up(x, m):
    return ((x + m - 1) // m) * m


def best_next_match(feats_sorted, ns, ne, *, tile=512):
    """For each row r (rows pre-sorted by time), return the global index of the
    most cosine-similar row among columns [ns[r], ne[r]) — its next-timestep
    candidate bucket — or -1 if the bucket is empty.  Pallas TPU kernel.

    tile=512 is lane-dense and fits all generations' default scoped VMEM with
    double buffering (~0.6 MiB of feature tiles); on v7x, tile=1024 also fits.
    """
    feats = np.asarray(feats_sorted, np.float32)
    n, d = feats.shape
    n_pad = _round_up(max(n, tile), tile)
    nb = n_pad // tile

    # Pad rows with zeros (zero norm, never in a bucket -> never selectable).
    f = np.zeros((n_pad, d), np.float32)
    f[:n] = feats
    norms = np.sqrt(np.sum(f * f, axis=-1, keepdims=True))          # (n_pad, 1)
    inv = (1.0 / np.maximum(norms, 1e-30)).astype(np.float32)       # finite > 0

    ns_p = np.full((n_pad, 1), n, np.int32)
    ne_p = np.full((n_pad, 1), n, np.int32)
    ns_p[:n, 0] = np.asarray(ns, np.int32)
    ne_p[:n, 0] = np.asarray(ne, np.int32)

    f_bf = jnp.asarray(f, jnp.bfloat16)          # bf16 features: half the DMA
    r_inv = jnp.asarray(inv)                     # (n_pad, 1)
    c_inv = jnp.asarray(inv.T)                   # (1, n_pad) lane-oriented
    ns_j = jnp.asarray(ns_p)
    ne_j = jnp.asarray(ne_p)

    out = pl.pallas_call(
        _best_match_kernel,
        out_shape=jax.ShapeDtypeStruct((n_pad, 1), jnp.int32),
        grid_spec=pltpu.PrefetchScalarGridSpec(
            num_scalar_prefetch=0,
            grid=(nb, nb),                                   # (row tiles, col tiles)
            in_specs=[
                pl.BlockSpec((tile, d), lambda i, j: (i, 0)),   # row features
                pl.BlockSpec((tile, d), lambda i, j: (j, 0)),   # col features
                pl.BlockSpec((tile, 1), lambda i, j: (i, 0)),   # row inv norms
                pl.BlockSpec((1, tile), lambda i, j: (0, j)),   # col inv norms
                pl.BlockSpec((tile, 1), lambda i, j: (i, 0)),   # bucket start
                pl.BlockSpec((tile, 1), lambda i, j: (i, 0)),   # bucket end
            ],
            out_specs=pl.BlockSpec((tile, 1), lambda i, j: (i, 0)),
            scratch_shapes=[pltpu.VMEM((tile, 1), jnp.float32),   # best value
                            pltpu.VMEM((tile, 1), jnp.float32)],  # best index
        ),
        compiler_params=pltpu.CompilerParams(
            dimension_semantics=("parallel", "arbitrary")),
        cost_estimate=pl.CostEstimate(
            flops=2 * n_pad * n_pad * d,
            transcendentals=0,
            bytes_accessed=2 * nb * n_pad * d * 2      # bf16 feature tiles
                           + 2 * nb * n_pad * 4        # norm / bucket vectors
                           + n_pad * 4),               # int32 output
    )(f_bf, f_bf, r_inv, c_inv, ns_j, ne_j)

    best = np.asarray(jax.block_until_ready(out))[:n, 0]
    return best


def _next_time_buckets(times_sorted):
    """For each row r of a time-sorted array, the contiguous index range
    [ns[r], ne[r]) of rows at the next strictly-later timestamp."""
    t = np.asarray(times_sorted)
    n = t.shape[0]
    ns = np.searchsorted(t, t, side="right").astype(np.int64)   # first time > t[r]
    nt = t[np.minimum(ns, max(n - 1, 0))] if n > 0 else t
    ne = np.searchsorted(t, nt, side="right").astype(np.int64)
    ne = np.where(ns >= n, n, ne)
    return ns.astype(np.int32), ne.astype(np.int32)


def _build_list(coor_s, feats_s, best):
    """Greedy visited-set trajectory linking (host glue) driven by the
    device-computed best-next-match vector."""
    n = coor_s.shape[0]
    trajectories, features_list = [], []
    visited = set()
    for start_idx in range(n):
        if start_idx in visited:
            continue
        traj = [coor_s[start_idx]]
        ftraj = [feats_s[start_idx]]
        visited.add(start_idx)
        cur = start_idx
        while True:
            nxt = int(best[cur])
            if nxt < 0:           # no later timestamp
                break
            if nxt in visited:    # best candidate already taken
                break
            visited.add(nxt)
            cur = nxt
            traj.append(coor_s[cur])
            ftraj.append(feats_s[cur])
        trajectories.append(np.stack(traj, axis=0))
        features_list.append(np.stack(ftraj, axis=0))
    return trajectories, features_list


def tracks_forward(coor, features, min_length):
    """Equivalent of Tracks.forward(coor, features, min_length)."""
    coor_np = np.asarray(coor, dtype=np.float32)
    feats_np = np.asarray(features, dtype=np.float32)

    # TODO(synk): torch.argsort tie order is unspecified; we use a stable sort.
    order = np.argsort(coor_np[:, 0], kind="stable")
    coor_s = coor_np[order]
    feats_s = feats_np[order]

    # Hot path on TPU: per-row best next-timestep match (masked cosine argmax).
    ns, ne = _next_time_buckets(coor_s[:, 0])
    best = best_next_match(feats_s, ns, ne)

    # TODO(synk): greedy visited-set linking is sequential / data-dependent with
    # variable-length outputs; it stays on the host.
    trajs, flist = _build_list(coor_s, feats_s, best)

    event_voxels = [np.concatenate([t, f], axis=1) for t, f in zip(trajs, flist)]
    new_list = [v for v in event_voxels if v.shape[0] >= min_length]
    if len(new_list) != 0:
        event_features = np.concatenate(new_list, axis=0)
    else:
        event_features = np.zeros((4096, 131), dtype=np.float32)
    return jnp.asarray(event_features, dtype=jnp.float32)


if __name__ == "__main__":
    key = jax.random.PRNGKey(0)
    k_feat, k_xy, k_chk, k_t = jax.random.split(key, 4)

    # --- kernel self-check: multi-tile grid, padding, bucket masks ----------
    # n=600 with tile=256 pads to 768 -> 3x3 grid: exercises the cross-tile
    # argmax accumulation, buckets that straddle tile boundaries and padding.
    n_chk, d_chk, t_chk, tile_chk = 600, 128, 12, 256
    times_chk = jnp.sort(
        jax.random.randint(k_t, (n_chk,), 0, t_chk).astype(jnp.float32))
    f_chk = jax.random.normal(k_chk, (n_chk, d_chk), dtype=jnp.float32)
    times_np = np.asarray(times_chk)
    f_np = np.asarray(f_chk)

    ns_chk, ne_chk = _next_time_buckets(times_np)
    best_chk = best_next_match(f_np, ns_chk, ne_chk, tile=tile_chk)

    # Exact-reference (torch.nn.CosineSimilarity semantics, f32).
    nrm = np.sqrt((f_np * f_np).sum(-1, keepdims=True))
    sim_ref = (f_np @ f_np.T) / np.maximum(nrm * nrm.T, COS_EPS)
    for r in range(n_chk):
        if ns_chk[r] >= ne_chk[r]:
            assert best_chk[r] == -1, (r, best_chk[r])
        else:
            b = int(best_chk[r])
            assert ns_chk[r] <= b < ne_chk[r], (r, b, int(ns_chk[r]), int(ne_chk[r]))
            ref_best = float(sim_ref[r, ns_chk[r]:ne_chk[r]].max())
            assert float(sim_ref[r, b]) >= ref_best - 5e-2, (r, b, ref_best)

    # --- small end-to-end example: 8 time steps, 4 events each -> N=32 ------
    # coor = (t, x, y) so concat(coor, features) has 3 + 128 = 131 columns,
    # matching the module's zeros(4096, 131) fallback width.
    T, per_t, D = 8, 4, 128
    N = T * per_t
    tcol = jnp.repeat(jnp.arange(T, dtype=jnp.float32), per_t)[:, None]   # (N, 1)
    xy = jax.random.uniform(k_xy, (N, 2), dtype=jnp.float32)              # (N, 2)
    coor = jnp.concatenate([tcol, xy], axis=1)                            # (N, 3)
    features = jax.random.normal(k_feat, (N, D), dtype=jnp.float32)       # (N, 128)

    out = tracks_forward(coor, features, min_length=3)
    jax.block_until_ready(out)
    assert out.ndim == 2 and out.shape[1] == 131 and out.dtype == jnp.float32
    print("KERNEL_OK")
</pallas_src>

<mosaic_0001>
module attributes {stable_mosaic.version = 11 : i64} {
  func.func @_best_match_kernel(%arg0: i32, %arg1: i32, %arg2: memref<256x128xbf16, #tpu.memory_space<vmem>>, %arg3: memref<256x128xbf16, #tpu.memory_space<vmem>>, %arg4: memref<256x1xf32, #tpu.memory_space<vmem>>, %arg5: memref<1x256xf32, #tpu.memory_space<vmem>>, %arg6: memref<256x1xi32, #tpu.memory_space<vmem>>, %arg7: memref<256x1xi32, #tpu.memory_space<vmem>>, %arg8: memref<256x1xi32, #tpu.memory_space<vmem>>, %arg9: memref<256x1xf32, #tpu.memory_space<vmem>>, %arg10: memref<256x1xf32, #tpu.memory_space<vmem>>) attributes {dimension_semantics = [#tpu.dimension_semantics<parallel>, #tpu.dimension_semantics<arbitrary>], iteration_bounds = array<i64: 3, 3>, scalar_prefetch = 0 : i64, scratch_operands = 2 : i64, tpu.core_type = #tpu.core_type<tc>, window_params = [{transform_indices = @transform_0, window_bounds = array<i64: 256, 128>}, {transform_indices = @transform_1, window_bounds = array<i64: 256, 128>}, {transform_indices = @transform_2, window_bounds = array<i64: 256, 1>}, {transform_indices = @transform_3, window_bounds = array<i64: 1, 256>}, {transform_indices = @transform_4, window_bounds = array<i64: 256, 1>}, {transform_indices = @transform_5, window_bounds = array<i64: 256, 1>}, {transform_indices = @transform_6, window_bounds = array<i64: 256, 1>}]} {
    %c0_i32 = arith.constant 0 : i32
    %0 = arith.cmpi eq, %arg1, %c0_i32 : i32
    %1 = arith.extui %0 : i1 to i32
    %c0_i32_0 = arith.constant 0 : i32
    %2 = arith.cmpi ne, %1, %c0_i32_0 : i32
    scf.if %2 {
      %cst_29 = arith.constant -3.000000e+38 : f32
      %51 = vector.broadcast %cst_29 : f32 to vector<256x1xf32>
      %c0_30 = arith.constant 0 : index
      %c0_31 = arith.constant 0 : index
      %52 = vector.load %arg9[%c0_30, %c0_31] : memref<256x1xf32, #tpu.memory_space<vmem>>, vector<256x1xf32>
      tpu.vector_store %arg9[%c0_30, %c0_31], %51 {strides = array<i32>} : memref<256x1xf32, #tpu.memory_space<vmem>>, vector<256x1xf32>,
      %cst_32 = arith.constant -1.000000e+00 : f32
      %53 = vector.broadcast %cst_32 : f32 to vector<256x1xf32>
      %c0_33 = arith.constant 0 : index
      %c0_34 = arith.constant 0 : index
      %54 = vector.load %arg10[%c0_33, %c0_34] : memref<256x1xf32, #tpu.memory_space<vmem>>, vector<256x1xf32>
      tpu.vector_store %arg10[%c0_33, %c0_34], %53 {strides = array<i32>} : memref<256x1xf32, #tpu.memory_space<vmem>>, vector<256x1xf32>,
    } else {
    }
    %c0 = arith.constant 0 : index
    %c0_1 = arith.constant 0 : index
    %3 = vector.load %arg2[%c0, %c0_1] : memref<256x128xbf16, #tpu.memory_space<vmem>>, vector<256x128xbf16>
    %c0_2 = arith.constant 0 : index
    %c0_3 = arith.constant 0 : index
    %4 = vector.load %arg3[%c0_2, %c0_3] : memref<256x128xbf16, #tpu.memory_space<vmem>>, vector<256x128xbf16>
    %cst = arith.constant dense<0.000000e+00> : vector<256x256xf32>
    %5 = tpu.matmul %3, %4, %cst {dimension_numbers = #tpu.dot_dimension_numbers<[1], [1], [0], [0], [0, 0, 1, 0], [], []>} : vector<256x128xbf16>, vector<256x128xbf16>, vector<256x256xf32> -> vector<256x256xf32>
    %c0_4 = arith.constant 0 : index
    %c0_5 = arith.constant 0 : index
    %6 = vector.load %arg4[%c0_4, %c0_5] : memref<256x1xf32, #tpu.memory_space<vmem>>, vector<256x1xf32>
    %c0_6 = arith.constant 0 : index
    %c0_7 = arith.constant 0 : index
    %7 = vector.load %arg5[%c0_6, %c0_7] : memref<1x256xf32, #tpu.memory_space<vmem>>, vector<1x256xf32>
    %8 = vector.broadcast %6 : vector<256x1xf32> to vector<256x256xf32>
    %9 = vector.broadcast %7 : vector<1x256xf32> to vector<256x256xf32>
    %10 = arith.mulf %8, %9 : vector<256x256xf32>
    %cst_8 = arith.constant 1.000000e+06 : f32
    %11 = vector.broadcast %cst_8 : f32 to vector<256x256xf32>
    %12 = arith.cmpf ogt, %10, %11 : vector<256x256xf32>
    %cst_9 = arith.constant 1.000000e+06 : f32
    %13 = vector.broadcast %cst_9 : f32 to vector<256x256xf32>
    %14 = arith.mulf %5, %13 : vector<256x256xf32>
    %15 = arith.mulf %5, %10 : vector<256x256xf32>
    %16 = arith.select %12, %14, %15 : vector<256x256xi1>, vector<256x256xf32>
    %c256_i32 = arith.constant 256 : i32
    %17 = arith.muli %arg1, %c256_i32 : i32
    %18 = tpu.iota {dimensions = array<i32: 1>} : vector<256x256xi32>
    %19 = vector.broadcast %17 : i32 to vector<256x256xi32>
    %20 = arith.addi %19, %18 : vector<256x256xi32>
    %c0_10 = arith.constant 0 : index
    %c0_11 = arith.constant 0 : index
    %21 = vector.load %arg6[%c0_10, %c0_11] : memref<256x1xi32, #tpu.memory_space<vmem>>, vector<256x1xi32>
    %22 = vector.broadcast %21 : vector<256x1xi32> to vector<256x256xi32>
    %23 = arith.cmpi sge, %20, %22 : vector<256x256xi32>
    %c0_12 = arith.constant 0 : index
    %c0_13 = arith.constant 0 : index
    %24 = vector.load %arg7[%c0_12, %c0_13] : memref<256x1xi32, #tpu.memory_space<vmem>>, vector<256x1xi32>
    %25 = vector.broadcast %24 : vector<256x1xi32> to vector<256x256xi32>
    %26 = arith.cmpi slt, %20, %25 : vector<256x256xi32>
    %27 = arith.andi %23, %26 : vector<256x256xi1>
    %cst_14 = arith.constant -3.000000e+38 : f32
    %28 = vector.broadcast %cst_14 : f32 to vector<256x256xf32>
    %29 = arith.select %27, %16, %28 : vector<256x256xi1>, vector<256x256xf32>
    %cst_15 = arith.constant dense<0xFF800000> : vector<256xf32>
    %30 = vector.multi_reduction <maximumf>, %29, %cst_15 [1] : vector<256x256xf32> to vector<256xf32>
    %31 = vector.shape_cast %30 : vector<256xf32> to vector<256x1xf32>
    %32 = arith.sitofp %20 : vector<256x256xi32> to vector<256x256xf32>
    %33 = vector.broadcast %31 : vector<256x1xf32> to vector<256x256xf32>
    %34 = arith.cmpf oge, %29, %33 : vector<256x256xf32>
    %35 = arith.andi %27, %34 : vector<256x256xi1>
    %cst_16 = arith.constant 1.07374182E+9 : f32
    %36 = vector.broadcast %cst_16 : f32 to vector<256x256xf32>
    %37 = arith.select %35, %32, %36 : vector<256x256xi1>, vector<256x256xf32>
    %cst_17 = arith.constant dense<0x7F800000> : vector<256xf32>
    %38 = vector.multi_reduction <minimumf>, %37, %cst_17 [1] : vector<256x256xf32> to vector<256xf32>
    %39 = vector.shape_cast %38 : vector<256xf32> to vector<256x1xf32>
    %c0_18 = arith.constant 0 : index
    %c0_19 = arith.constant 0 : index
    %40 = vector.load %arg9[%c0_18, %c0_19] : memref<256x1xf32, #tpu.memory_space<vmem>>, vector<256x1xf32>
    %41 = arith.cmpf ogt, %31, %40 : vector<256x1xf32>
    %c0_20 = arith.constant 0 : index
    %c0_21 = arith.constant 0 : index
    %42 = vector.load %arg9[%c0_20, %c0_21] : memref<256x1xf32, #tpu.memory_space<vmem>>, vector<256x1xf32>
    %43 = arith.select %41, %31, %42 : vector<256x1xi1>, vector<256x1xf32>
    %c0_22 = arith.constant 0 : index
    %c0_23 = arith.constant 0 : index
    %44 = vector.load %arg9[%c0_22, %c0_23] : memref<256x1xf32, #tpu.memory_space<vmem>>, vector<256x1xf32>
    tpu.vector_store %arg9[%c0_22, %c0_23], %43 {strides = array<i32>} : memref<256x1xf32, #tpu.memory_space<vmem>>, vector<256x1xf32>,
    %c0_24 = arith.constant 0 : index
    %c0_25 = arith.constant 0 : index
    %45 = vector.load %arg10[%c0_24, %c0_25] : memref<256x1xf32, #tpu.memory_space<vmem>>, vector<256x1xf32>
    %46 = arith.select %41, %39, %45 : vector<256x1xi1>, vector<256x1xf32>
    %c0_26 = arith.constant 0 : index
    %c0_27 = arith.constant 0 : index
    %47 = vector.load %arg10[%c0_26, %c0_27] : memref<256x1xf32, #tpu.memory_space<vmem>>, vector<256x1xf32>
    tpu.vector_store %arg10[%c0_26, %c0_27], %46 {strides = array<i32>} : memref<256x1xf32, #tpu.memory_space<vmem>>, vector<256x1xf32>,
    %c2_i32 = arith.constant 2 : i32
    %48 = arith.cmpi eq, %arg1, %c2_i32 : i32
    %49 = arith.extui %48 : i1 to i32
    %c0_i32_28 = arith.constant 0 : i32
    %50 = arith.cmpi ne, %49, %c0_i32_28 : i32
    scf.if %50 {
      %c0_29 = arith.constant 0 : index
      %c0_30 = arith.constant 0 : index
      %51 = vector.load %arg10[%c0_29, %c0_30] : memref<256x1xf32, #tpu.memory_space<vmem>>, vector<256x1xf32>
      %52 = arith.fptosi %51 : vector<256x1xf32> to vector<256x1xi32>
      %c0_31 = arith.constant 0 : index
      %c0_32 = arith.constant 0 : index
      %53 = vector.load %arg8[%c0_31, %c0_32] : memref<256x1xi32, #tpu.memory_space<vmem>>, vector<256x1xi32>
      tpu.vector_store %arg8[%c0_31, %c0_32], %52 {strides = array<i32>} : memref<256x1xi32, #tpu.memory_space<vmem>>, vector<256x1xi32>,
    } else {
    }
    return
  }
  func.func @transform_0(%arg0: i32, %arg1: i32) -> (i32, i32) {
    %c0_i32 = arith.constant 0 : i32
    %c0_i32_0 = arith.constant 0 : i32
    return %arg0, %c0_i32 : i32, i32
  }
  func.func @transform_1(%arg0: i32, %arg1: i32) -> (i32, i32) {
    %c0_i32 = arith.constant 0 : i32
    %c0_i32_0 = arith.constant 0 : i32
    return %arg1, %c0_i32 : i32, i32
  }
  func.func @transform_2(%arg0: i32, %arg1: i32) -> (i32, i32) {
    %c0_i32 = arith.constant 0 : i32
    %c0_i32_0 = arith.constant 0 : i32
    return %arg0, %c0_i32 : i32, i32
  }
  func.func @transform_3(%arg0: i32, %arg1: i32) -> (i32, i32) {
    %c0_i32 = arith.constant 0 : i32
    %c0_i32_0 = arith.constant 0 : i32
    return %c0_i32, %arg1 : i32, i32
  }
  func.func @transform_4(%arg0: i32, %arg1: i32) -> (i32, i32) {
    %c0_i32 = arith.constant 0 : i32
    %c0_i32_0 = arith.constant 0 : i32
    return %arg0, %c0_i32 : i32, i32
  }
  func.func @transform_5(%arg0: i32, %arg1: i32) -> (i32, i32) {
    %c0_i32 = arith.constant 0 : i32
    %c0_i32_0 = arith.constant 0 : i32
    return %arg0, %c0_i32 : i32, i32
  }
  func.func @transform_6(%arg0: i32, %arg1: i32) -> (i32, i32) {
    %c0_i32 = arith.constant 0 : i32
    %c0_i32_0 = arith.constant 0 : i32
    return %arg0, %c0_i32 : i32, i32
  }
}

</mosaic_0001>

<bundles_post_ra>
// kernel: tpu_custom_call.1
= control target key start
LH: loop header
LB: loop body
LE: loop exit
PB: predicated region body
PF: predicated region fallthrough
CT: control target
= control target key end

     0   :  { %s3110_s21 = smov 0   ;;  %s3112_s22 = smov 0   ;;  %s6719_s0 = inlined_call_operand.vmem [shape: bf16[768,128], index: 0, kind: input, shape index: {}]   ;;  %s6720_s1 = inlined_call_operand.vmem [shape: bf16[768,128], index: 1, kind: input, shape index: {}]   ;;  %s6721_s2 = inlined_call_operand.vmem [shape: f32[768,1], index: 2, kind: input, shape index: {}]   ;;  %s6722_s3 = inlined_call_operand.vmem [shape: f32[1,768], index: 3, kind: input, shape index: {}]   ;;  %s6723_s4 = inlined_call_operand.vmem [shape: s32[768,1], index: 4, kind: input, shape index: {}]   ;;  %s6724_s5 = inlined_call_operand.vmem [shape: s32[768,1], index: 5, kind: input, shape index: {}]   ;;  %s6725_s6 = inlined_call_operand.vmem [shape: s32[768,1], index: 6, kind: output, shape index: {}]  }
   0x1   :  { %s3114_s23 = smov 0   ;;  %s3116_s24 = smov 0  }
   0x2   :  { %s3118_s25 = smov 0  }
   0x3 LB: > { %s25_s26 = sadd.s32 1, %s3062_s23  ;;  %s28_s27 = sadd.s32 1, %s3066_s24  ;;  %s3070_s25 = sphi %s3118_s25, %s16_s25   ;;  %s3066_s24 = sphi %s3116_s24, %s7989_s24   ;;  %s3062_s23 = sphi %s3114_s23, %s7988_s23   ;;  %s3058_s22 = sphi %s3112_s22, %s7987_s22   ;;  %s3054_s21 = sphi %s3110_s21, %s7986_s21  }
   0x4   : > { %p26_p0 = scmp.ge.s32.totalorder %s25_s26, 3  ;;  %p2776_p1 = scmp.ge.s32.totalorder %s3070_s25, 1 }
   0x5   : > { %p279_p2 = scmp.lt.s32.totalorder %s3070_s25, 10 }
   0x6   : > { %s7991_s26 = smov (%p26_p0, %s25_s26), 0  ;;  %s7993_s27 = smov (!%p26_p0, %s28_s27), %s3066_s24 }
   0x7   : > { %p280_p3 = pnand %p2776_p1, %p279_p2  ;;  %p30_p4 = scmp.ge.s32.totalorder %s7993_s27, 3 }
   0x9   : > { %s7995_s27 = smov (%p30_p4, %s7993_s27), 0  ;;  %283 = sbr.rel (%p280_p3) target bundleno = 820 (0x334), region = 44 }
   0xe   : > { %s2777_s28 = sshll.u32 %s3058_s22, 5  ;;  %s2779_s29 = sshll.u32 %s3054_s21, 5 }
   0xf   : > { %p334_p5 = scmp.lt.s32.totalorder %s2777_s28, 95  ;;  %p340_p6 = scmp.lt.s32.totalorder %s2779_s29, 95 }
  0x10   : > { %s2783_s30 = sshll.u32 %s3054_s21, 1  ;;  %p2790_p8 = scmp.ne.s32.totalorder %s3054_s21, 0 }
  0x11   : > { %s7997_s28 = smov (!%p334_p5, %s2777_s28), 95  ;;  %s7999_s29 = smov (!%p340_p6, %s2779_s29), 95 }
  0x12   : > { %s2778_s7 = sshll.u32 %s7997_s28, 2  ;;  %s2782_s8 = sshll.u32 %s7997_s28, 3 }
  0x13   : > { %s3147_s11 = scalar_lea.vmem %s6719_s0, %s2778_s7  ;;  %s2780_s12 = sshll.u32 %s7999_s29, 2 }
  0x14   : > { %s3152_s15 = scalar_lea.vmem %s6720_s1, %s2780_s12  ;;  %s3157_s18 = scalar_lea.vmem %s6721_s2, %s2782_s8 }
  0x15   : > { %p352_p7 = scmp.lt.s32.totalorder %s2783_s30, 5  ;;  %s3162_s22 = scalar_lea.vmem %s6723_s4, %s2782_s8 }
  0x16   : > { %s3167_s29 = scalar_lea.vmem %s6724_s5, %s2782_s8  ;;  %s3172_s12 = scalar_lea.vmem %s6725_s6, %s2782_s8 }
  0x17   : > { %s8001_s30 = smov (!%p352_p7, %s2783_s30), 5  ;;  %378 = sbr.rel (%p2790_p8) target bundleno = 61 (0x3d), region = 48 }
  0x18   : > { %s354_s16 = scalar_lea.vmem %s6722_s3, %s8001_s30 }
  0x1c   : > { %vm379_vm0 = vcmask 7168   ;;  %v3072_v0 = vmov -3e+38   ;;  %v3073_v1 = vmov -1.0  }
  0x1d   : > { %380 = vst.msk [vmem:[#allocation2] sm:$0xff] %vm379_vm0, %v3072_v0  ;;  %381 = vst.msk [vmem:[#allocation2 + $0x8] sm:$0xff] %vm379_vm0, %v3072_v0 }
  0x1e   : > { %382 = vst.msk [vmem:[#allocation2 + $0x10] sm:$0xff] %vm379_vm0, %v3072_v0  ;;  %383 = vst.msk [vmem:[#allocation2 + $0x18] sm:$0xff] %vm379_vm0, %v3072_v0 }
  0x1f   : > { %384 = vst.msk [vmem:[#allocation2 + $0x20] sm:$0xff] %vm379_vm0, %v3072_v0  ;;  %385 = vst.msk [vmem:[#allocation2 + $0x28] sm:$0xff] %vm379_vm0, %v3072_v0 }
  0x20   : > { %386 = vst.msk [vmem:[#allocation2 + $0x30] sm:$0xff] %vm379_vm0, %v3072_v0  ;;  %387 = vst.msk [vmem:[#allocation2 + $0x38] sm:$0xff] %vm379_vm0, %v3072_v0 }
  0x21   : > { %388 = vst.msk [vmem:[#allocation2 + $0x40] sm:$0xff] %vm379_vm0, %v3072_v0  ;;  %389 = vst.msk [vmem:[#allocation2 + $0x48] sm:$0xff] %vm379_vm0, %v3072_v0 }
  0x22   : > { %390 = vst.msk [vmem:[#allocation2 + $0x50] sm:$0xff] %vm379_vm0, %v3072_v0  ;;  %391 = vst.msk [vmem:[#allocation2 + $0x58] sm:$0xff] %vm379_vm0, %v3072_v0 }
  0x23   : > { %392 = vst.msk [vmem:[#allocation2 + $0x60] sm:$0xff] %vm379_vm0, %v3072_v0  ;;  %393 = vst.msk [vmem:[#allocation2 + $0x68] sm:$0xff] %vm379_vm0, %v3072_v0 }
  0x24   : > { %394 = vst.msk [vmem:[#allocation2 + $0x70] sm:$0xff] %vm379_vm0, %v3072_v0  ;;  %395 = vst.msk [vmem:[#allocation2 + $0x78] sm:$0xff] %vm379_vm0, %v3072_v0 }
  0x25   : > { %396 = vst.msk [vmem:[#allocation2 + $0x80] sm:$0xff] %vm379_vm0, %v3072_v0  ;;  %397 = vst.msk [vmem:[#allocation2 + $0x88] sm:$0xff] %vm379_vm0, %v3072_v0 }
  0x26   : > { %398 = vst.msk [vmem:[#allocation2 + $0x90] sm:$0xff] %vm379_vm0, %v3072_v0  ;;  %399 = vst.msk [vmem:[#allocation2 + $0x98] sm:$0xff] %vm379_vm0, %v3072_v0 }
  0x27   : > { %400 = vst.msk [vmem:[#allocation2 + $0xa0] sm:$0xff] %vm379_vm0, %v3072_v0  ;;  %401 = vst.msk [vmem:[#allocation2 + $0xa8] sm:$0xff] %vm379_vm0, %v3072_v0 }
  0x28   : > { %402 = vst.msk [vmem:[#allocation2 + $0xb0] sm:$0xff] %vm379_vm0, %v3072_v0  ;;  %403 = vst.msk [vmem:[#allocation2 + $0xb8] sm:$0xff] %vm379_vm0, %v3072_v0 }
  0x29   : > { %404 = vst.msk [vmem:[#allocation2 + $0xc0] sm:$0xff] %vm379_vm0, %v3072_v0  ;;  %405 = vst.msk [vmem:[#allocation2 + $0xc8] sm:$0xff] %vm379_vm0, %v3072_v0 }
  0x2a   : > { %406 = vst.msk [vmem:[#allocation2 + $0xd0] sm:$0xff] %vm379_vm0, %v3072_v0  ;;  %407 = vst.msk [vmem:[#allocation2 + $0xd8] sm:$0xff] %vm379_vm0, %v3072_v0 }
  0x2b   : > { %408 = vst.msk [vmem:[#allocation2 + $0xe0] sm:$0xff] %vm379_vm0, %v3072_v0  ;;  %409 = vst.msk [vmem:[#allocation2 + $0xe8] sm:$0xff] %vm379_vm0, %v3072_v0 }
  0x2c   : > { %410 = vst.msk [vmem:[#allocation2 + $0xf0] sm:$0xff] %vm379_vm0, %v3072_v0  ;;  %411 = vst.msk [vmem:[#allocation2 + $0xf8] sm:$0xff] %vm379_vm0, %v3072_v0 }
  0x2d   : > { %412 = vst.msk [vmem:[#allocation3] sm:$0xff] %vm379_vm0, %v3073_v1  ;;  %413 = vst.msk [vmem:[#allocation3 + $0x8] sm:$0xff] %vm379_vm0, %v3073_v1 }
  0x2e   : > { %414 = vst.msk [vmem:[#allocation3 + $0x10] sm:$0xff] %vm379_vm0, %v3073_v1  ;;  %415 = vst.msk [vmem:[#allocation3 + $0x18] sm:$0xff] %vm379_vm0, %v3073_v1 }
  0x2f   : > { %416 = vst.msk [vmem:[#allocation3 + $0x20] sm:$0xff] %vm379_vm0, %v3073_v1  ;;  %417 = vst.msk [vmem:[#allocation3 + $0x28] sm:$0xff] %vm379_vm0, %v3073_v1 }
  0x30   : > { %418 = vst.msk [vmem:[#allocation3 + $0x30] sm:$0xff] %vm379_vm0, %v3073_v1  ;;  %419 = vst.msk [vmem:[#allocation3 + $0x38] sm:$0xff] %vm379_vm0, %v3073_v1 }
  0x31   : > { %420 = vst.msk [vmem:[#allocation3 + $0x40] sm:$0xff] %vm379_vm0, %v3073_v1  ;;  %421 = vst.msk [vmem:[#allocation3 + $0x48] sm:$0xff] %vm379_vm0, %v3073_v1 }
  0x32   : > { %422 = vst.msk [vmem:[#allocation3 + $0x50] sm:$0xff] %vm379_vm0, %v3073_v1  ;;  %423 = vst.msk [vmem:[#allocation3 + $0x58] sm:$0xff] %vm379_vm0, %v3073_v1 }
  0x33   : > { %424 = vst.msk [vmem:[#allocation3 + $0x60] sm:$0xff] %vm379_vm0, %v3073_v1  ;;  %425 = vst.msk [vmem:[#allocation3 + $0x68] sm:$0xff] %vm379_vm0, %v3073_v1 }
  0x34   : > { %426 = vst.msk [vmem:[#allocation3 + $0x70] sm:$0xff] %vm379_vm0, %v3073_v1  ;;  %427 = vst.msk [vmem:[#allocation3 + $0x78] sm:$0xff] %vm379_vm0, %v3073_v1 }
  0x35   : > { %428 = vst.msk [vmem:[#allocation3 + $0x80] sm:$0xff] %vm379_vm0, %v3073_v1  ;;  %429 = vst.msk [vmem:[#allocation3 + $0x88] sm:$0xff] %vm379_vm0, %v3073_v1 }
  0x36   : > { %430 = vst.msk [vmem:[#allocation3 + $0x90] sm:$0xff] %vm379_vm0, %v3073_v1  ;;  %431 = vst.msk [vmem:[#allocation3 + $0x98] sm:$0xff] %vm379_vm0, %v3073_v1 }
  0x37   : > { %432 = vst.msk [vmem:[#allocation3 + $0xa0] sm:$0xff] %vm379_vm0, %v3073_v1  ;;  %433 = vst.msk [vmem:[#allocation3 + $0xa8] sm:$0xff] %vm379_vm0, %v3073_v1 }
  0x38   : > { %434 = vst.msk [vmem:[#allocation3 + $0xb0] sm:$0xff] %vm379_vm0, %v3073_v1  ;;  %435 = vst.msk [vmem:[#allocation3 + $0xb8] sm:$0xff] %vm379_vm0, %v3073_v1 }
  0x39   : > { %436 = vst.msk [vmem:[#allocation3 + $0xc0] sm:$0xff] %vm379_vm0, %v3073_v1  ;;  %437 = vst.msk [vmem:[#allocation3 + $0xc8] sm:$0xff] %vm379_vm0, %v3073_v1 }
  0x3a   : > { %438 = vst.msk [vmem:[#allocation3 + $0xd0] sm:$0xff] %vm379_vm0, %v3073_v1  ;;  %439 = vst.msk [vmem:[#allocation3 + $0xd8] sm:$0xff] %vm379_vm0, %v3073_v1 }
  0x3b   : > { %440 = vst.msk [vmem:[#allocation3 + $0xe0] sm:$0xff] %vm379_vm0, %v3073_v1  ;;  %441 = vst.msk [vmem:[#allocation3 + $0xe8] sm:$0xff] %vm379_vm0, %v3073_v1 }
  0x3c   : > { %442 = vst.msk [vmem:[#allocation3 + $0xf0] sm:$0xff] %vm379_vm0, %v3073_v1  ;;  %443 = vst.msk [vmem:[#allocation3 + $0xf8] sm:$0xff] %vm379_vm0, %v3073_v1 }
  0x3d PF: > { %v895_v2 = vld [vmem:[%s3157_s18 + $0x10] sm:$0xff]  ;;  %v893_v3 = vld [vmem:[%s3157_s18] sm:$0xff]  ;;  %v3074_v4 = vmov 0   ;;  %v3000_v5 = vld [vmem:[%s3152_s15 + $0x78] sm:$0xff]   ;;  %p2824_p9 = scmp.ne.s32.totalorder %s3054_s21, 2 }
  0x3e   : > { %2999 = vset.pattern.permute.xlu1 %v3074_v4  ;;  %2998 = vset.pattern.permute.xlu0 %v3074_v4  ;;  %v3001_v6 = vld [vmem:[%s3152_s15 + $0x38] sm:$0xff]   ;;  %v894_v8 = vld [vmem:[%s3157_s18 + $0x8] sm:$0xff]  ;;  %v3002_v9 = vld [vmem:[%s3152_s15 + $0x70] sm:$0xff]  }
  0x3f   : > { %938 = vperm.xlu1 %2999, %v895_v2   ;;  %928 = vperm.xlu0 %2998, %v893_v3   ;;  %v896_v7 = vld [vmem:[%s3157_s18 + $0x18] sm:$0xff]  ;;  %v898_v10 = vld [vmem:[%s3157_s18 + $0x28] sm:$0xff]  ;;  %v897_v11 = vld [vmem:[%s3157_s18 + $0x20] sm:$0xff] }
  0x40   : > { %2827 = vmatprep.subr.bf16.mxu0 %v3000_v5  ;;  %2875 = vmatprep.subr.bf16.mxu1 %v3000_v5  ;;  %v3003_v12 = vld [vmem:[%s3152_s15 + $0x30] sm:$0xff]   ;;  %v3004_v13 = vld [vmem:[%s3152_s15 + $0x68] sm:$0xff]   ;;  %v900_v14 = vld [vmem:[%s3157_s18 + $0x38] sm:$0xff] }
  0x41   : > { %2828 = vmatpush3.bf16.xpose.msra.mxu0 %v3001_v6  ;;  %2883 = vmatpush3.bf16.xpose.msra.mxu1 %v3001_v6  ;;  %v899_v15 = vld [vmem:[%s3157_s18 + $0x30] sm:$0xff]  ;;  %v902_v16 = vld [vmem:[%s3157_s18 + $0x48] sm:$0xff]  ;;  %v901_v17 = vld [vmem:[%s3157_s18 + $0x40] sm:$0xff] }
  0x42   : > { %2829 = vmatprep.subr.bf16.mxu0 %v3002_v9  ;;  %2876 = vmatprep.subr.bf16.mxu1 %v3002_v9  ;;  %v3005_v18 = vld [vmem:[%s3152_s15 + $0x28] sm:$0xff]   ;;  %v3006_v19 = vld [vmem:[%s3152_s15 + $0x60] sm:$0xff]   ;;  %v904_v20 = vld [vmem:[%s3157_s18 + $0x58] sm:$0xff] }
  0x43   : > { %943 = vperm.xlu1 %2999, %v896_v7   ;;  %933 = vperm.xlu0 %2998, %v894_v8   ;;  %v903_v21 = vld [vmem:[%s3157_s18 + $0x50] sm:$0xff]  ;;  %v906_v22 = vld [vmem:[%s3157_s18 + $0x68] sm:$0xff]  ;;  %v905_v23 = vld [vmem:[%s3157_s18 + $0x60] sm:$0xff] }
  0x44   : > { %v3007_v24 = vld [vmem:[%s3152_s15 + $0x20] sm:$0xff]   ;;  %v3008_v25 = vld [vmem:[%s3152_s15 + $0x58] sm:$0xff]   ;;  %v907_v27 = vld [vmem:[%s3157_s18 + $0x70] sm:$0xff] }
  0x45   : > { %v908_v26 = vld [vmem:[%s3157_s18 + $0x78] sm:$0xff]  ;;  %v3271_v28 = vld [vmem:[%s3147_s11] sm:$0xff]   ;;  %v910_v30 = vld [vmem:[%s3157_s18 + $0x88] sm:$0xff] }
  0x46   : > { %v3274_v29 = vld [vmem:[%s3147_s11 + $0x40] sm:$0xff]   ;;  %2843 = vmatprep.mubr.bf16.mxu0 %v3271_v28  ;;  %v3009_v32 = vld [vmem:[%s3152_s15 + $0x18] sm:$0xff]   ;;  %v3010_v33 = vld [vmem:[%s3152_s15 + $0x50] sm:$0xff]  }
  0x47   : > { %953 = vperm.xlu1 %2999, %v898_v10   ;;  %948 = vperm.xlu0 %2998, %v897_v11   ;;  %v909_v31 = vld [vmem:[%s3157_s18 + $0x80] sm:$0xff]  ;;  %v912_v34 = vld [vmem:[%s3157_s18 + $0x98] sm:$0xff]  ;;  %v911_v35 = vld [vmem:[%s3157_s18 + $0x90] sm:$0xff] }
  0x48   : > { %2859 = vmatprep.mubr.bf16.mxu1 %v3274_v29  ;;  %v914_v36 = vld [vmem:[%s3157_s18 + $0xa8] sm:$0xff]  ;;  %v913_v37 = vld [vmem:[%s3157_s18 + $0xa0] sm:$0xff]  ;;  %v3011_v38 = vld [vmem:[%s3152_s15 + $0x10] sm:$0xff]  }
  0x49   : > { %2830 = vmatpush3.bf16.xpose.msra.mxu0 %v3003_v12  ;;  %2884 = vmatpush3.bf16.xpose.msra.mxu1 %v3003_v12  ;;  %v3012_v39 = vld [vmem:[%s3152_s15 + $0x48] sm:$0xff]   ;;  %v916_v40 = vld [vmem:[%s3157_s18 + $0xb8] sm:$0xff]  ;;  %v915_v41 = vld [vmem:[%s3157_s18 + $0xb0] sm:$0xff] }
  0x4a   : > { %2831 = vmatprep.subr.bf16.mxu0 %v3004_v13  ;;  %2877 = vmatprep.subr.bf16.mxu1 %v3004_v13  ;;  %v918_v42 = vld [vmem:[%s3157_s18 + $0xc8] sm:$0xff]  ;;  %v917_v43 = vld [vmem:[%s3157_s18 + $0xc0] sm:$0xff]  ;;  %v920_v46 = vld [vmem:[%s3157_s18 + $0xd8] sm:$0xff] }
  0x4b   : > { %963 = vperm.xlu1 %2999, %v900_v14   ;;  %958 = vperm.xlu0 %2998, %v899_v15   ;;  %v3013_v44 = vld [vmem:[%s3152_s15 + $0x8] sm:$0xff]   ;;  %v3014_v45 = vld [vmem:[%s3152_s15 + $0x40] sm:$0xff]   ;;  %v919_v47 = vld [vmem:[%s3157_s18 + $0xd0] sm:$0xff] }
  0x4c   : > { %v922_v48 = vld [vmem:[%s3157_s18 + $0xe8] sm:$0xff]  ;;  %v921_v49 = vld [vmem:[%s3157_s18 + $0xe0] sm:$0xff]  ;;  %v924_v51 = vld [vmem:[%s3157_s18 + $0xf8] sm:$0xff] }
  0x4d   : > { %v3015_v50 = vld [vmem:[%s3152_s15] sm:$0xff]   ;;  %v923_v52 = vld [vmem:[%s3157_s18 + $0xf0] sm:$0xff]  ;;  %v1425_v53 = vld [vmem:[%s3162_s22 + $0x8] sm:$0xff]  ;;  %s2823_s15 = sshll.u32 %s3054_s21, 8 }
  0x4e   : > { %v1424_v54 = vld [vmem:[%s3162_s22] sm:$0xff]  ;;  %v3018_v55 = vld [vmem:[%s3147_s11 + $0x8] sm:$0xff]   ;;  %v1427_v57 = vld [vmem:[%s3162_s22 + $0x18] sm:$0xff] }
  0x4f   : > { %973 = vperm.xlu1 %2999, %v902_v16   ;;  %968 = vperm.xlu0 %2998, %v901_v17   ;;  %v3019_v56 = vld [vmem:[%s3147_s11 + $0x48] sm:$0xff]   ;;  %v1426_v58 = vld [vmem:[%s3162_s22 + $0x10] sm:$0xff]  ;;  %v1428_v60 = vld [vmem:[%s3162_s22 + $0x20] sm:$0xff] }
  0x50   : > { %v1429_v59 = vld [vmem:[%s3162_s22 + $0x28] sm:$0xff]  ;;  %v3020_v61 = vld [vmem:[%s3147_s11 + $0x10] sm:$0xff]   ;;  %v1431_v63 = vld [vmem:[%s3162_s22 + $0x38] sm:$0xff] }
  0x51   : > { %2832 = vmatpush3.bf16.xpose.msra.mxu0 %v3005_v18  ;;  %2885 = vmatpush3.bf16.xpose.msra.mxu1 %v3005_v18  ;;  %v3021_v62 = vld [vmem:[%s3147_s11 + $0x50] sm:$0xff]   ;;  %v1433_v1 = vld [vmem:[%s3162_s22 + $0x48] sm:$0xff]  ;;  %v1432_v2 = vld [vmem:[%s3162_s22 + $0x40] sm:$0xff] }
  0x52   : > { %2833 = vmatprep.subr.bf16.mxu0 %v3006_v19  ;;  %2878 = vmatprep.subr.bf16.mxu1 %v3006_v19  ;;  %v1430_v0 = vld [vmem:[%s3162_s22 + $0x30] sm:$0xff]  ;;  %v3022_v3 = vld [vmem:[%s3147_s11 + $0x18] sm:$0xff]   ;;  %v1437_v7 = vld [vmem:[%s3162_s22 + $0x68] sm:$0xff] }
  0x53   : > { %983 = vperm.xlu1 %2999, %v904_v20   ;;  %978 = vperm.xlu0 %2998, %v903_v21   ;;  %v3023_v4 = vld [vmem:[%s3147_s11 + $0x58] sm:$0xff]   ;;  %v1434_v6 = vld [vmem:[%s3162_s22 + $0x50] sm:$0xff]  ;;  %v1436_v8 = vld [vmem:[%s3162_s22 + $0x60] sm:$0xff] }
  0x54   : > { %v1435_v5 = vld [vmem:[%s3162_s22 + $0x58] sm:$0xff]  ;;  %v3024_v9 = vld [vmem:[%s3147_s11 + $0x20] sm:$0xff]   ;;  %v1438_v12 = vld [vmem:[%s3162_s22 + $0x70] sm:$0xff] }
  0x55   : > { %v3025_v10 = vld [vmem:[%s3147_s11 + $0x60] sm:$0xff]   ;;  %v1439_v11 = vld [vmem:[%s3162_s22 + $0x78] sm:$0xff]  ;;  %v1441_v13 = vld [vmem:[%s3162_s22 + $0x88] sm:$0xff] }
  0x56   : > { %v1440_v14 = vld [vmem:[%s3162_s22 + $0x80] sm:$0xff]  ;;  %v3026_v15 = vld [vmem:[%s3147_s11 + $0x28] sm:$0xff]   ;;  %v1443_v17 = vld [vmem:[%s3162_s22 + $0x98] sm:$0xff] }
  0x57   : > { %993 = vperm.xlu1 %2999, %v906_v22   ;;  %988 = vperm.xlu0 %2998, %v905_v23   ;;  %v3027_v16 = vld [vmem:[%s3147_s11 + $0x68] sm:$0xff]   ;;  %v1442_v18 = vld [vmem:[%s3162_s22 + $0x90] sm:$0xff]  ;;  %v1444_v20 = vld [vmem:[%s3162_s22 + $0xa0] sm:$0xff] }
  0x58   : > { %v1445_v19 = vld [vmem:[%s3162_s22 + $0xa8] sm:$0xff]  ;;  %v3028_v21 = vld [vmem:[%s3147_s11 + $0x30] sm:$0xff]   ;;  %v1447_v23 = vld [vmem:[%s3162_s22 + $0xb8] sm:$0xff] }
  0x59   : > { %2834 = vmatpush3.bf16.xpose.msra.mxu0 %v3007_v24  ;;  %2886 = vmatpush3.bf16.xpose.msra.mxu1 %v3007_v24  ;;  %v3029_v22 = vld [vmem:[%s3147_s11 + $0x70] sm:$0xff]  }
  0x5a   : > { %2835 = vmatprep.subr.bf16.mxu0 %v3008_v25  ;;  %2879 = vmatprep.subr.bf16.mxu1 %v3008_v25  ;;  %v1446_v24 = vld [vmem:[%s3162_s22 + $0xb0] sm:$0xff]  ;;  %v1449_v25 = vld [vmem:[%s3162_s22 + $0xc8] sm:$0xff] }
  0x5b   : > { %1003 = vperm.xlu1 %2999, %v908_v26   ;;  %998 = vperm.xlu0 %2998, %v907_v27   ;;  %v1448_v26 = vld [vmem:[%s3162_s22 + $0xc0] sm:$0xff]  ;;  %v3030_v27 = vld [vmem:[%s3147_s11 + $0x38] sm:$0xff]  }
  0x5f   : > { %1013 = vperm.xlu1 %2999, %v910_v30   ;;  %1008 = vperm.xlu0 %2998, %v909_v31   ;;  %v1450_v30 = vld [vmem:[%s3162_s22 + $0xd0] sm:$0xff]  ;;  %v1453_v31 = vld [vmem:[%s3162_s22 + $0xe8] sm:$0xff] }
  0x61   : > { %2836 = vmatpush3.bf16.xpose.msra.mxu0 %v3009_v32  ;;  %2887 = vmatpush3.bf16.xpose.msra.mxu1 %v3009_v32  ;;  %v1452_v32 = vld [vmem:[%s3162_s22 + $0xe0] sm:$0xff] }
  0x62   : > { %2837 = vmatprep.subr.bf16.mxu0 %v3010_v33  ;;  %2880 = vmatprep.subr.bf16.mxu1 %v3010_v33  ;;  %v1455_v33 = vld [vmem:[%s3162_s22 + $0xf8] sm:$0xff] }
  0x63   : > { %1023 = vperm.xlu1 %2999, %v912_v34   ;;  %1018 = vperm.xlu0 %2998, %v911_v35   ;;  %v1454_v34 = vld [vmem:[%s3162_s22 + $0xf0] sm:$0xff] }
  0x67   : > { %1033 = vperm.xlu1 %2999, %v914_v36   ;;  %1028 = vperm.xlu0 %2998, %v913_v37   ;;  %v1617_v37 = vld [vmem:[%s3167_s29 + $0x8] sm:$0xff] }
  0x69   : > { %2838 = vmatpush3.bf16.xpose.msra.mxu0 %v3011_v38  ;;  %2888 = vmatpush3.bf16.xpose.msra.mxu1 %v3011_v38  ;;  %v1616_v38 = vld [vmem:[%s3167_s29] sm:$0xff] }
  0x6a   : > { %2839 = vmatprep.subr.bf16.mxu0 %v3012_v39  ;;  %2881 = vmatprep.subr.bf16.mxu1 %v3012_v39 }
  0x6b   : > { %1043 = vperm.xlu1 %2999, %v916_v40   ;;  %1038 = vperm.xlu0 %2998, %v915_v41   ;;  %v1619_v41 = vld [vmem:[%s3167_s29 + $0x18] sm:$0xff] }
  0x6f   : > { %1053 = vperm.xlu1 %2999, %v918_v42   ;;  %1048 = vperm.xlu0 %2998, %v917_v43   ;;  %v1618_v42 = vld [vmem:[%s3167_s29 + $0x10] sm:$0xff] }
  0x71   : > { %2840 = vmatpush3.bf16.xpose.msra.mxu0 %v3013_v44  ;;  %2889 = vmatpush3.bf16.xpose.msra.mxu1 %v3013_v44 }
  0x72   : > { %2841 = vmatprep.subr.bf16.mxu0 %v3014_v45  ;;  %2882 = vmatprep.subr.bf16.mxu1 %v3014_v45  ;;  %v1621_v45 = vld [vmem:[%s3167_s29 + $0x28] sm:$0xff] }
  0x73   : > { %1063 = vperm.xlu1 %2999, %v920_v46   ;;  %1058 = vperm.xlu0 %2998, %v919_v47   ;;  %v1620_v46 = vld [vmem:[%s3167_s29 + $0x20] sm:$0xff] }
  0x77   : > { %1073 = vperm.xlu1 %2999, %v922_v48   ;;  %1068 = vperm.xlu0 %2998, %v921_v49   ;;  %v1623_v49 = vld [vmem:[%s3167_s29 + $0x38] sm:$0xff] }
  0x79   : > { %2842 = vmatpush3.bf16.xpose.msra.mxu0 %v3015_v50  ;;  %2890 = vmatpush3.bf16.xpose.msra.mxu1 %v3015_v50  ;;  %v1622_v50 = vld [vmem:[%s3167_s29 + $0x30] sm:$0xff] }
  0x7b   : > { %1083 = vperm.xlu1 %2999, %v924_v51   ;;  %1078 = vperm.xlu0 %2998, %v923_v52  }
  0x7f   : > { %1460 = vperm.xlu1 %2999, %v1425_v53   ;;  %1457 = vperm.xlu0 %2998, %v1424_v54   ;;  %v1625_v53 = vld [vmem:[%s3167_s29 + $0x48] sm:$0xff]  ;;  %v1624_v54 = vld [vmem:[%s3167_s29 + $0x40] sm:$0xff] }
  0x80   : > { %2844 = vmatmul.mubr.bf16.vlgmr.msra.gmra.mxu0 %v3271_v28  ;;  %2860 = vmatmul.mubr.bf16.vlgmr.msra.gmra.mxu1 %v3274_v29  ;;  %v3031_v28 = vld [vmem:[%s3147_s11 + $0x78] sm:$0xff]  }
  0x81   : > { %2845 = vmatprep.mubr.bf16.mxu0 %v3018_v55  ;;  %2861 = vmatprep.mubr.bf16.mxu1 %v3019_v56  ;;  %v1451_v29 = vld [vmem:[%s3162_s22 + $0xd8] sm:$0xff] }
  0x83   : > { %1466 = vperm.xlu1 %2999, %v1427_v57   ;;  %1463 = vperm.xlu0 %2998, %v1426_v58   ;;  %v1627_v57 = vld [vmem:[%s3167_s29 + $0x58] sm:$0xff]  ;;  %v1626_v58 = vld [vmem:[%s3167_s29 + $0x50] sm:$0xff] }
  0x87   : > { %1472 = vperm.xlu1 %2999, %v1429_v59   ;;  %1469 = vperm.xlu0 %2998, %v1428_v60  }
  0x88   : > { %2846 = vmatmul.mubr.bf16.gmra.mxu0 %v3018_v55  ;;  %2862 = vmatmul.mubr.bf16.gmra.mxu1 %v3019_v56 }
  0x89   : > { %2847 = vmatprep.mubr.bf16.mxu0 %v3020_v61  ;;  %2863 = vmatprep.mubr.bf16.mxu1 %v3021_v62 }
  0x8b   : > { %1478 = vperm.xlu1 %2999, %v1431_v63   ;;  %1475 = vperm.xlu0 %2998, %v1430_v0  }
  0x8f   : > { %1484 = vperm.xlu1 %2999, %v1433_v1   ;;  %1481 = vperm.xlu0 %2998, %v1432_v2   ;;  %v1631_v1 = vld [vmem:[%s3167_s29 + $0x78] sm:$0xff]  ;;  %v1630_v2 = vld [vmem:[%s3167_s29 + $0x70] sm:$0xff] }
  0x90   : > { %2848 = vmatmul.mubr.bf16.gmra.mxu0 %v3020_v61  ;;  %2864 = vmatmul.mubr.bf16.gmra.mxu1 %v3021_v62  ;;  %v1629_v61 = vld [vmem:[%s3167_s29 + $0x68] sm:$0xff]  ;;  %v1628_v62 = vld [vmem:[%s3167_s29 + $0x60] sm:$0xff] }
  0x91   : > { %2849 = vmatprep.mubr.bf16.mxu0 %v3022_v3  ;;  %2865 = vmatprep.mubr.bf16.mxu1 %v3023_v4 }
  0x93   : > { %1490 = vperm.xlu1 %2999, %v1435_v5   ;;  %1487 = vperm.xlu0 %2998, %v1434_v6   ;;  %v1633_v5 = vld [vmem:[%s3167_s29 + $0x88] sm:$0xff]  ;;  %v1632_v6 = vld [vmem:[%s3167_s29 + $0x80] sm:$0xff] }
  0x97   : > { %1496 = vperm.xlu1 %2999, %v1437_v7   ;;  %1493 = vperm.xlu0 %2998, %v1436_v8  }
  0x98   : > { %2850 = vmatmul.mubr.bf16.gmra.mxu0 %v3022_v3  ;;  %2866 = vmatmul.mubr.bf16.gmra.mxu1 %v3023_v4 }
  0x99   : > { %2851 = vmatprep.mubr.bf16.mxu0 %v3024_v9  ;;  %2867 = vmatprep.mubr.bf16.mxu1 %v3025_v10 }
  0x9b   : > { %1502 = vperm.xlu1 %2999, %v1439_v11   ;;  %1499 = vperm.xlu0 %2998, %v1438_v12  }
  0x9f   : > { %1508 = vperm.xlu1 %2999, %v1441_v13   ;;  %1505 = vperm.xlu0 %2998, %v1440_v14   ;;  %v1637_v13 = vld [vmem:[%s3167_s29 + $0xa8] sm:$0xff]  ;;  %v1636_v14 = vld [vmem:[%s3167_s29 + $0xa0] sm:$0xff] }
  0xa0   : > { %2852 = vmatmul.mubr.bf16.gmra.mxu0 %v3024_v9  ;;  %2868 = vmatmul.mubr.bf16.gmra.mxu1 %v3025_v10  ;;  %v1635_v9 = vld [vmem:[%s3167_s29 + $0x98] sm:$0xff]  ;;  %v1634_v10 = vld [vmem:[%s3167_s29 + $0x90] sm:$0xff] }
  0xa1   : > { %2853 = vmatprep.mubr.bf16.mxu0 %v3026_v15  ;;  %2869 = vmatprep.mubr.bf16.mxu1 %v3027_v16 }
  0xa3   : > { %1514 = vperm.xlu1 %2999, %v1443_v17   ;;  %1511 = vperm.xlu0 %2998, %v1442_v18   ;;  %v1639_v17 = vld [vmem:[%s3167_s29 + $0xb8] sm:$0xff]  ;;  %v1638_v18 = vld [vmem:[%s3167_s29 + $0xb0] sm:$0xff] }
  0xa7   : > { %1520 = vperm.xlu1 %2999, %v1445_v19   ;;  %1517 = vperm.xlu0 %2998, %v1444_v20  }
  0xa8   : > { %2854 = vmatmul.mubr.bf16.gmra.mxu0 %v3026_v15  ;;  %2870 = vmatmul.mubr.bf16.gmra.mxu1 %v3027_v16 }
  0xa9   : > { %2855 = vmatprep.mubr.bf16.mxu0 %v3028_v21  ;;  %2871 = vmatprep.mubr.bf16.mxu1 %v3029_v22 }
  0xab   : > { %1526 = vperm.xlu1 %2999, %v1447_v23   ;;  %1523 = vperm.xlu0 %2998, %v1446_v24  }
  0xaf   : > { %1532 = vperm.xlu1 %2999, %v1449_v25   ;;  %1529 = vperm.xlu0 %2998, %v1448_v26   ;;  %v1643_v25 = vld [vmem:[%s3167_s29 + $0xd8] sm:$0xff]  ;;  %v1642_v26 = vld [vmem:[%s3167_s29 + $0xd0] sm:$0xff] }
  0xb0   : > { %2856 = vmatmul.mubr.bf16.gmra.mxu0 %v3028_v21  ;;  %2872 = vmatmul.mubr.bf16.gmra.mxu1 %v3029_v22  ;;  %v1641_v21 = vld [vmem:[%s3167_s29 + $0xc8] sm:$0xff]  ;;  %v1640_v22 = vld [vmem:[%s3167_s29 + $0xc0] sm:$0xff] }
  0xb1   : > { %2857 = vmatprep.mubr.bf16.mxu0 %v3030_v27  ;;  %2873 = vmatprep.mubr.bf16.mxu1 %v3031_v28 }
  0xb3   : > { %1538 = vperm.xlu1 %2999, %v1451_v29   ;;  %1535 = vperm.xlu0 %2998, %v1450_v30   ;;  %v1645_v29 = vld [vmem:[%s3167_s29 + $0xe8] sm:$0xff]  ;;  %v1644_v30 = vld [vmem:[%s3167_s29 + $0xe0] sm:$0xff] }
  0xb7   : > { %1544 = vperm.xlu1 %2999, %v1453_v31   ;;  %1541 = vperm.xlu0 %2998, %v1452_v32  }
  0xb8   : > { %2858 = vmatmul.mubr.bf16.gmra.mxu0 %v3030_v27  ;;  %2874 = vmatmul.mubr.bf16.gmra.mxu1 %v3031_v28 }
  0xba   : > { %v3349_v35 = vpop.permute.xlu1 %938  ;;  %v3351_v36 = vpop.permute.xlu0 %928 }
  0xbb   : > { %1550 = vperm.xlu1 %2999, %v1455_v33   ;;  %1547 = vperm.xlu0 %2998, %v1454_v34   ;;  %v1647_v33 = vld [vmem:[%s3167_s29 + $0xf8] sm:$0xff]  ;;  %v1646_v34 = vld [vmem:[%s3167_s29 + $0xf0] sm:$0xff] }
  0xbe   : > { %v3355_v39 = vpop.permute.xlu1 %943  ;;  %v3357_v40 = vpop.permute.xlu0 %933 }
  0xbf   : > { %1652 = vperm.xlu1 %2999, %v1617_v37   ;;  %1649 = vperm.xlu0 %2998, %v1616_v38  }
  0xc2   : > { %v3361_v43 = vpop.permute.xlu1 %953  ;;  %v3363_v44 = vpop.permute.xlu0 %948 }
  0xc3   : > { %1658 = vperm.xlu1 %2999, %v1619_v41   ;;  %1655 = vperm.xlu0 %2998, %v1618_v42  }
  0xc6   : > { %v3367_v47 = vpop.permute.xlu1 %963  ;;  %v3369_v48 = vpop.permute.xlu0 %958 }
  0xc7   : > { %1664 = vperm.xlu1 %2999, %v1621_v45   ;;  %1661 = vperm.xlu0 %2998, %v1620_v46  }
  0xca   : > { %v3373_v51 = vpop.permute.xlu1 %973  ;;  %v3375_v52 = vpop.permute.xlu0 %968 }
  0xcb   : > { %1670 = vperm.xlu1 %2999, %v1623_v49   ;;  %1667 = vperm.xlu0 %2998, %v1622_v50  }
  0xce   : > { %v3379_v55 = vpop.permute.xlu1 %983  ;;  %v3381_v56 = vpop.permute.xlu0 %978 }
  0xcf   : > { %1676 = vperm.xlu1 %2999, %v1625_v53   ;;  %1673 = vperm.xlu0 %2998, %v1624_v54  }
  0xd2   : > { %v3385_v59 = vpop.permute.xlu1 %993  ;;  %v3387_v60 = vpop.permute.xlu0 %988 }
  0xd3   : > { %1682 = vperm.xlu1 %2999, %v1627_v57   ;;  %1679 = vperm.xlu0 %2998, %v1626_v58  }
  0xd6   : > { %v3391_v63 = vpop.permute.xlu1 %1003  ;;  %v3393_v0 = vpop.permute.xlu0 %998 }
  0xd7   : > { %1688 = vperm.xlu1 %2999, %v1629_v61   ;;  %1685 = vperm.xlu0 %2998, %v1628_v62  }
  0xda   : > { %v3397_v3 = vpop.permute.xlu1 %1013  ;;  %v3399_v4 = vpop.permute.xlu0 %1008 }
  0xdb   : > { %1694 = vperm.xlu1 %2999, %v1631_v1   ;;  %1691 = vperm.xlu0 %2998, %v1630_v2  }
  0xde   : > { %v3403_v7 = vpop.permute.xlu1 %1023  ;;  %v3405_v8 = vpop.permute.xlu0 %1018 }
  0xdf   : > { %1700 = vperm.xlu1 %2999, %v1633_v5   ;;  %1697 = vperm.xlu0 %2998, %v1632_v6  }
  0xe2   : > { %v3409_v11 = vpop.permute.xlu1 %1033  ;;  %v3411_v12 = vpop.permute.xlu0 %1028 }
  0xe3   : > { %1706 = vperm.xlu1 %2999, %v1635_v9   ;;  %1703 = vperm.xlu0 %2998, %v1634_v10  }
  0xe6   : > { %v3415_v15 = vpop.permute.xlu1 %1043  ;;  %v3417_v16 = vpop.permute.xlu0 %1038 }
  0xe7   : > { %1712 = vperm.xlu1 %2999, %v1637_v13   ;;  %1709 = vperm.xlu0 %2998, %v1636_v14  }
  0xea   : > { %v3421_v19 = vpop.permute.xlu1 %1053  ;;  %v3423_v20 = vpop.permute.xlu0 %1048 }
  0xeb   : > { %1718 = vperm.xlu1 %2999, %v1639_v17   ;;  %1715 = vperm.xlu0 %2998, %v1638_v18  }
  0xee   : > { %v3427_v23 = vpop.permute.xlu1 %1063  ;;  %v3429_v24 = vpop.permute.xlu0 %1058 }
  0xef   : > { %1724 = vperm.xlu1 %2999, %v1641_v21   ;;  %1721 = vperm.xlu0 %2998, %v1640_v22  }
  0xf2   : > { %v3433_v27 = vpop.permute.xlu1 %1073  ;;  %v3435_v28 = vpop.permute.xlu0 %1068 }
  0xf3   : > { %1730 = vperm.xlu1 %2999, %v1643_v25   ;;  %1727 = vperm.xlu0 %2998, %v1642_v26  }
  0xf6   : > { %v3439_v31 = vpop.permute.xlu1 %1083  ;;  %v3441_v32 = vpop.permute.xlu0 %1078 }
  0xf7   : > { %1736 = vperm.xlu1 %2999, %v1645_v29   ;;  %1733 = vperm.xlu0 %2998, %v1644_v30   ;;  %v1087_v29 = vlaneseq }
  0xfa   : > { %v3445_v37 = vpop.permute.xlu1 %1460  ;;  %v3447_v38 = vpop.permute.xlu0 %1457 }
  0xfb   : > { %1742 = vperm.xlu1 %2999, %v1647_v33   ;;  %1739 = vperm.xlu0 %2998, %v1646_v34   ;;  %v1088_v34 = vshrl.u32 %v1087_v29, 7 }
  0xfe   : > { %v3449_v41 = vpop.permute.xlu1 %1466  ;;  %v3451_v42 = vpop.permute.xlu0 %1463 }
 0x102   : > { %v3453_v45 = vpop.permute.xlu1 %1472  ;;  %v3455_v46 = vpop.permute.xlu0 %1469 }
 0x103   : > { %7026 = vst [vmem:[#allocation4_spill] sm:$0xff] %v3453_v45  ;;  %7027 = vst [vmem:[#allocation5_spill] sm:$0xff] %v3455_v46 }
 0x106   : > { %v3457_v49 = vpop.permute.xlu1 %1478  ;;  %v3459_v50 = vpop.permute.xlu0 %1475 }
 0x107   : > { %7028 = vst [vmem:[#allocation6_spill] sm:$0xff] %v3457_v49  ;;  %7029 = vst [vmem:[#allocation7_spill] sm:$0xff] %v3459_v50 }
 0x10a   : > { %v3461_v53 = vpop.permute.xlu1 %1484  ;;  %v3463_v54 = vpop.permute.xlu0 %1481 }
 0x10b   : > { %7030 = vst [vmem:[#allocation8_spill] sm:$0xff] %v3461_v53  ;;  %7031 = vst [vmem:[#allocation9_spill] sm:$0xff] %v3463_v54 }
 0x10e   : > { %v3465_v57 = vpop.permute.xlu1 %1490  ;;  %v3467_v58 = vpop.permute.xlu0 %1487 }
 0x10f   : > { %7032 = vst [vmem:[#allocation10_spill] sm:$0xff] %v3465_v57  ;;  %7033 = vst [vmem:[#allocation11_spill] sm:$0xff] %v3467_v58  ;;  %v1093_v57 = vsub.s32 1, %v1088_v34  ;;  %v1419_v58 = vand.u32 127, %v1087_v29 }
 0x111   : > { %v1420_v53 = vadd.s32 128, %v1419_v58 }
 0x112   : > { %v3469_v61 = vpop.permute.xlu1 %1496  ;;  %v3471_v62 = vpop.permute.xlu0 %1493 }
 0x113   : > { %7034 = vst [vmem:[#allocation12_spill] sm:$0xff] %v3469_v61  ;;  %7035 = vst [vmem:[#allocation13_spill] sm:$0xff] %v3471_v62  ;;  %v925_v62 = vld [vmem:[%s354_s16] sm:$0x3] }
 0x116   : > { %v3473_v1 = vpop.permute.xlu1 %1502  ;;  %v3475_v2 = vpop.permute.xlu0 %1499 }
 0x117   : > { %7036 = vst [vmem:[#allocation14_spill] sm:$0xff] %v3473_v1  ;;  %7037 = vst [vmem:[#allocation15_spill] sm:$0xff] %v3475_v2  ;;  %v1089_v2 = vsub.s32 0, %v1088_v34 }
 0x11a   : > { %v3477_v5 = vpop.permute.xlu1 %1508  ;;  %v3479_v6 = vpop.permute.xlu0 %1505 }
 0x11e   : > { %v3481_v9 = vpop.permute.xlu1 %1514  ;;  %v3483_v10 = vpop.permute.xlu0 %1511 }
 0x11f   : > { %7038 = vst [vmem:[#allocation16_spill] sm:$0xff] %v3483_v10 }
 0x122   : > { %v3485_v13 = vpop.permute.xlu1 %1520  ;;  %v3487_v14 = vpop.permute.xlu0 %1517 }
 0x123   : > { %7039 = vst [vmem:[#allocation17_spill] sm:$0xff] %v3485_v13  ;;  %7040 = vst [vmem:[#allocation18_spill] sm:$0xff] %v3487_v14 }
 0x126   : > { %v3489_v17 = vpop.permute.xlu1 %1526  ;;  %v3491_v18 = vpop.permute.xlu0 %1523 }
 0x127   : > { %7041 = vst [vmem:[#allocation19_spill] sm:$0xff] %v3489_v17  ;;  %7042 = vst [vmem:[#allocation20_spill] sm:$0xff] %v3491_v18 }
 0x12a   : > { %v3493_v21 = vpop.permute.xlu1 %1532  ;;  %v3495_v22 = vpop.permute.xlu0 %1529 }
 0x12b   : > { %7043 = vst [vmem:[#allocation21_spill] sm:$0xff] %v3493_v21  ;;  %7044 = vst [vmem:[#allocation22_spill] sm:$0xff] %v3495_v22 }
 0x12e   : > { %v3497_v25 = vpop.permute.xlu1 %1538  ;;  %v3499_v26 = vpop.permute.xlu0 %1535 }
 0x12f   : > { %7045 = vst [vmem:[#allocation23_spill] sm:$0xff] %v3497_v25  ;;  %7046 = vst [vmem:[#allocation24_spill] sm:$0xff] %v3499_v26  ;;  %v3517_v25 = vrot.slane %v925_v62, %v1089_v2 }
 0x132   : > { %v3501_v30 = vpop.permute.xlu1 %1544  ;;  %v3503_v33 = vpop.permute.xlu0 %1541 }
 0x133   : > { %7047 = vst [vmem:[#allocation25_spill] sm:$0xff] %v3501_v30  ;;  %7048 = vst [vmem:[#allocation26_spill] sm:$0xff] %v3503_v33  ;;  %v3519_v33 = vrot.slane %v925_v62, %v1093_v57 }
 0x135   : > { %v1098_v29 = vmul.f32 %v3519_v33, %v3351_v36 }
 0x136   : > { %v3505_v1 = vpop.permute.xlu1 %1550  ;;  %v3507_v61 = vpop.permute.xlu0 %1547 }
 0x137   : > { %7049 = vst [vmem:[#allocation27_spill] sm:$0xff] %v3505_v1  ;;  %7050 = vst [vmem:[#allocation28_spill] sm:$0xff] %v3507_v61  ;;  %v1421_v1 = vstv %s2823_s15  ;;  %v1097_v61 = vmul.f32 %v3517_v25, %v3351_v36  ;;  %vm1162_vm3 = vcmp.gt.f32.partialorder %v1098_v29, 1000000.0 }
 0x138   : > { %v3529_v34 = vadd.s32 %v1421_v1, %v1420_v53  ;;  %v3533_v62 = vadd.s32 %v1421_v1, %v1419_v58  ;;  %v3553_v53 = vmul.f32 %v3519_v33, %v3349_v35  ;;  %v7053_v58 = vmov 0 }
 0x139   : > { %vm1161_vm2 = vcmp.gt.f32.partialorder %v1097_v61, 1000000.0 }
 0x13a   : > { %v3515_v26 = vpop.permute.xlu1 %1652  ;;  %v1650_v30 = vpop.permute.xlu0 %1649  ;;  %vm1553_vm4 = vcmp.ge.s32.totalorder %v3529_v34, %v3447_v38  ;;  %vm1552_vm7 = vcmp.ge.s32.totalorder %v3533_v62, %v3447_v38  ;;  %v3593_v38 = vmul.f32 %v3519_v33, %v3361_v43  ;;  %vm1586_vm14 = vcmp.ge.s32.totalorder %v3533_v62, %v3477_v5 }
 0x13b   : > { %vm1745_vm1 = vcmp.lt.s32.totalorder %v3529_v34, %v1650_v30  ;;  %vm1744_vm5 = vcmp.lt.s32.totalorder %v3533_v62, %v1650_v30  ;;  %vm1587_vm15 = vcmp.ge.s32.totalorder %v3529_v34, %v3477_v5  ;;  %vm1584_vm0 = vcmp.ge.s32.totalorder %v3533_v62, %v3479_v6 }
 0x13c   : > { %vm3555_vm6 = vmand %vm1553_vm4, %vm1745_vm1  ;;  %7059 = vst [vmem:[#allocation35_spill] sm:$0xff] %v3593_v38  ;;  %v3629_v38 = vmul.f32 %v3517_v25, %v3369_v48  ;;  %vm1585_vm1 = vcmp.ge.s32.totalorder %v3529_v34, %v3479_v6  ;;  %v7133_v5 = vmov 0 }
 0x13d   : > { %v7054_v58 = vsel %vm3555_vm6, 4294967295, %v7053_v58  ;;  %vm3597_vm8 = vmand %vm1552_vm7, %vm1744_vm5 }
 0x13e   : > { %v3521_v54 = vpop.permute.xlu1 %1658  ;;  %v3525_v22 = vpop.permute.xlu0 %1655  ;;  %7055 = vst [vmem:[#allocation31_spill] sm:$0xff] %v7054_v58  ;;  %v3611_v58 = vmul.f32 %v3519_v33, %v3363_v44  ;;  %7068 = vst [vmem:[#allocation42_spill] sm:$0xff] %v3629_v38  ;;  %v3787_v38 = vmul.f32 %v3519_v33, %v3417_v16 }
 0x140   : > { %v734_v49 = vpop.f32.mrf.mxu0  ;;  %v3531_v2 = vpop.f32.mrf.mxu1  ;;  %7064 = vst [vmem:[#allocation38_spill] sm:$0xff] %v3611_v58  ;;  %7093 = vst [vmem:[#allocation67_spill] sm:$0xff] %v3787_v38  ;;  %v3793_v58 = vmul.f32 %v3517_v25, %v3421_v19 }
 0x141   : > { %v1225_v21 = vmul.f32 1000000.0, %v734_v49  ;;  %v1289_v57 = vmul.f32 %v1097_v61, %v734_v49  ;;  %v3549_v49 = vmul.f32 %v3517_v25, %v3349_v35 }
 0x142   : > { %v3536_v50 = vpop.permute.xlu1 %1664  ;;  %v736_v18 = vpop.f32.mrf.mxu0  ;;  %7094 = vst [vmem:[#allocation68_spill] sm:$0xff] %v3793_v58 }
 0x143   : > { %7051 = vst [vmem:[#allocation29_spill] sm:$0xff] %v3536_v50  ;;  %v3538_v17 = vpop.permute.xlu0 %1661  ;;  %v1226_v45 = vmul.f32 1000000.0, %v736_v18  ;;  %v1290_v14 = vmul.f32 %v1098_v29, %v736_v18  ;;  %v3540_v13 = vpop.f32.mrf.mxu1  ;;  %v1353_v1 = vsel %vm1161_vm2, %v1225_v21, %v1289_v57  ;;  %v3563_v29 = vmul.f32 %v3517_v25, %v3355_v39 }
 0x144   : > { %7052 = vst [vmem:[#allocation30_spill] sm:$0xff] %v3538_v17  ;;  %v3545_v36 = vpop.f32.mrf.mxu0  ;;  %v3567_v50 = vmul.f32 %v3519_v33, %v3355_v39  ;;  %v3589_v39 = vmul.f32 %v3517_v25, %v3361_v43  ;;  %v7060_v21 = vmov 0  ;;  %v3615_v43 = vmul.f32 %v3517_v25, %v3367_v47 }
 0x145   : > { %v3559_v61 = vpop.f32.mrf.mxu1  ;;  %v1354_v18 = vsel %vm1162_vm3, %v1226_v45, %v1290_v14  ;;  %v3581_v45 = vmul.f32 %v3517_v25, %v3357_v40  ;;  %v3585_v14 = vmul.f32 %v3519_v33, %v3357_v40  ;;  %v7061_v21 = vsel %vm3597_vm8, 4294967295, %v7060_v21 }
 0x146   : > { %v3571_v35 = vpop.permute.xlu1 %1670  ;;  %v3573_v46 = vpop.f32.mrf.mxu0  ;;  %v3577_v17 = vsel %vm3555_vm6, %v1354_v18, -3e+38  ;;  %7058 = vst [vmem:[#allocation34_spill] sm:$0xff] %v3589_v39  ;;  %7062 = vst [vmem:[#allocation36_spill] sm:$0xff] %v7061_v21  ;;  %v3607_v40 = vmul.f32 %v3517_v25, %v3363_v44  ;;  %v3633_v44 = vmul.f32 %v3519_v33, %v3369_v48  ;;  %v3649_v21 = vmul.f32 %v3517_v25, %v3375_v52 }
 0x147   : > { %7056 = vst [vmem:[#allocation32_spill] sm:$0xff] %v3571_v35  ;;  %7057 = vst [vmem:[#allocation33_spill] sm:$0xff] %v3577_v17  ;;  %v3601_v57 = vpop.permute.xlu0 %1667  ;;  %v3603_v18 = vpop.f32.mrf.mxu1  ;;  %v3621_v35 = vsel %vm3597_vm8, %v1353_v1, -3e+38  ;;  %v3641_v1 = vmul.f32 %v3517_v25, %v3373_v51  ;;  %v3653_v48 = vmul.f32 %v3519_v33, %v3375_v52  ;;  %v3673_v52 = vmul.f32 %v3519_v33, %v3381_v56 }
 0x148   : > { %7063 = vst [vmem:[#allocation37_spill] sm:$0xff] %v3601_v57  ;;  %7065 = vst [vmem:[#allocation39_spill] sm:$0xff] %v3615_v43  ;;  %v3617_v30 = vpop.f32.mrf.mxu0  ;;  %v3625_v57 = vmul.f32 %v3519_v33, %v3367_v47  ;;  %v1936_v43 = vmax.f32 %v3621_v35, %v3577_v17  ;;  %v3645_v47 = vmul.f32 %v3519_v33, %v3373_v51 }
 0x149   : > { %7066 = vst [vmem:[#allocation40_spill] sm:$0xff] %v3621_v35  ;;  %7069 = vst [vmem:[#allocation43_spill] sm:$0xff] %v3633_v44  ;;  %v3635_v39 = vpop.f32.mrf.mxu1  ;;  %v3661_v17 = vmul.f32 %v3517_v25, %v3379_v55  ;;  %v3665_v51 = vmul.f32 %v3519_v33, %v3379_v55  ;;  %v3669_v35 = vmul.f32 %v3517_v25, %v3381_v56 }
 0x14a   : > { %7067 = vst [vmem:[#allocation41_spill] sm:$0xff] %v3625_v57  ;;  %7070 = vst [vmem:[#allocation44_spill] sm:$0xff] %v3641_v1  ;;  %v3655_v57 = vpop.permute.xlu1 %1676  ;;  %v3657_v44 = vpop.f32.mrf.mxu0  ;;  %1937 = vmax.xlane.f32.xlu0 %v1936_v43  ;;  %v3685_v55 = vmul.f32 %v3519_v33, %v3385_v59  ;;  %v3693_v56 = vmul.f32 %v3519_v33, %v3387_v60  ;;  %v3765_v1 = vmul.f32 %v3517_v25, %v3411_v12 }
 0x14b   : > { %7071 = vst [vmem:[#allocation45_spill] sm:$0xff] %v3645_v47  ;;  %7072 = vst [vmem:[#allocation46_spill] sm:$0xff] %v3649_v21  ;;  %v3677_v47 = vpop.f32.mrf.mxu1  ;;  %v3779_v21 = vmul.f32 %v3519_v33, %v3415_v15 }
 0x14c   : > { %7073 = vst [vmem:[#allocation47_spill] sm:$0xff] %v3653_v48  ;;  %7074 = vst [vmem:[#allocation48_spill] sm:$0xff] %v3655_v57  ;;  %v3675_v57 = vpop.permute.xlu0 %1673  ;;  %v3695_v43 = vpop.f32.mrf.mxu0 }
 0x14d   : > { %7075 = vst [vmem:[#allocation49_spill] sm:$0xff] %v3661_v17  ;;  %7076 = vst [vmem:[#allocation50_spill] sm:$0xff] %v3665_v51  ;;  %v3681_v17 = vmul.f32 %v3517_v25, %v3385_v59  ;;  %v3689_v51 = vmul.f32 %v3517_v25, %v3387_v60  ;;  %v3707_v59 = vmul.f32 %v3519_v33, %v3393_v0 }
 0x14e   : > { %7077 = vst [vmem:[#allocation51_spill] sm:$0xff] %v3669_v35  ;;  %7078 = vst [vmem:[#allocation52_spill] sm:$0xff] %v3673_v52  ;;  %v3699_v52 = vmul.f32 %v3517_v25, %v3391_v63  ;;  %v3713_v60 = vmul.f32 %v3519_v33, %v3391_v63  ;;  %v3733_v63 = vpop.f32.mrf.mxu0 }
 0x14f   : > { %7079 = vst [vmem:[#allocation53_spill] sm:$0xff] %v3675_v57  ;;  %7080 = vst [vmem:[#allocation54_spill] sm:$0xff] %v3681_v17  ;;  %v3703_v17 = vmul.f32 %v3517_v25, %v3393_v0  ;;  %v3729_v0 = vmul.f32 %v3519_v33, %v3399_v4  ;;  %v3757_v57 = vmul.f32 %v3517_v25, %v3409_v11 }
 0x150   : > { %7081 = vst [vmem:[#allocation55_spill] sm:$0xff] %v3685_v55  ;;  %7082 = vst [vmem:[#allocation56_spill] sm:$0xff] %v3689_v51  ;;  %v3709_v55 = vpop.f32.mrf.mxu1  ;;  %v3717_v51 = vmul.f32 %v3517_v25, %v3397_v3  ;;  %v3751_v35 = vpop.permute.xlu0 %1679 }
 0x151   : > { %7083 = vst [vmem:[#allocation57_spill] sm:$0xff] %v3693_v56  ;;  %7084 = vst [vmem:[#allocation58_spill] sm:$0xff] %v3699_v52  ;;  %v3721_v52 = vmul.f32 %v3519_v33, %v3397_v3  ;;  %v3741_v3 = vmul.f32 %v3519_v33, %v3403_v7  ;;  %v3745_v56 = vmul.f32 %v3517_v25, %v3405_v8  ;;  %v3771_v48 = vpop.f32.mrf.mxu0 }
 0x152   : > { %7085 = vst [vmem:[#allocation59_spill] sm:$0xff] %v3703_v17  ;;  %7086 = vst [vmem:[#allocation60_spill] sm:$0xff] %v3707_v59  ;;  %v3725_v17 = vmul.f32 %v3517_v25, %v3399_v4  ;;  %v3731_v59 = vpop.permute.xlu1 %1682  ;;  %v3749_v4 = vmul.f32 %v3519_v33, %v3405_v8  ;;  %v3769_v8 = vmul.f32 %v3519_v33, %v3411_v12  ;;  %vm1195_vm9 = vcmp.gt.f32.partialorder %v3717_v51, 1000000.0 }
 0x153   : > { %7087 = vst [vmem:[#allocation61_spill] sm:$0xff] %v3713_v60  ;;  %7088 = vst [vmem:[#allocation62_spill] sm:$0xff] %v3731_v59  ;;  %v3737_v60 = vmul.f32 %v3517_v25, %v3403_v7  ;;  %v3753_v59 = vpop.f32.mrf.mxu1  ;;  %v3761_v7 = vmul.f32 %v3519_v33, %v3409_v11  ;;  %v3783_v11 = vmul.f32 %v3517_v25, %v3417_v16  ;;  %v3809_v38 = vpop.f32.mrf.mxu0  ;;  %vm1196_vm10 = vcmp.gt.f32.partialorder %v3721_v52, 1000000.0 }
 0x154   : > { %7089 = vst [vmem:[#allocation63_spill] sm:$0xff] %v3751_v35  ;;  %v3775_v35 = vmul.f32 %v3517_v25, %v3415_v15  ;;  %7091 = vst [vmem:[#allocation65_spill] sm:$0xff] %v3779_v21  ;;  %v3801_v15 = vmul.f32 %v3517_v25, %v3423_v20  ;;  %v3805_v21 = vmul.f32 %v3519_v33, %v3423_v20  ;;  %v3827_v58 = vpop.permute.xlu0 %1685  ;;  %vm1193_vm11 = vcmp.gt.f32.partialorder %v3725_v17, 1000000.0 }
 0x155   : > { %7092 = vst [vmem:[#allocation66_spill] sm:$0xff] %v3783_v11  ;;  %v3789_v12 = vpop.f32.mrf.mxu1  ;;  %7099 = vst [vmem:[#allocation73_spill] sm:$0xff] %v3809_v38  ;;  %v3813_v11 = vmul.f32 %v3517_v25, %v3427_v23  ;;  %v3825_v20 = vmul.f32 %v3519_v33, %v3429_v24  ;;  %v1327_v6 = vmul.f32 %v3737_v60, %v3709_v55 }
 0x156   : > { %7090 = vst [vmem:[#allocation64_spill] sm:$0xff] %v3775_v35  ;;  %v3797_v35 = vmul.f32 %v3519_v33, %v3421_v19  ;;  %7096 = vst [vmem:[#allocation70_spill] sm:$0xff] %v3801_v15  ;;  %v3807_v16 = vpop.permute.xlu1 %1688  ;;  %v3817_v19 = vmul.f32 %v3519_v33, %v3427_v23  ;;  %v3835_v23 = vmul.f32 %v3517_v25, %v3433_v27 }
 0x157   : > { %7097 = vst [vmem:[#allocation71_spill] sm:$0xff] %v3805_v21  ;;  %7098 = vst [vmem:[#allocation72_spill] sm:$0xff] %v3807_v16  ;;  %v3829_v16 = vpop.f32.mrf.mxu1  ;;  %v1292_v15 = vmul.f32 %v3585_v14, %v3573_v46 }
 0x158   : > { %7095 = vst [vmem:[#allocation69_spill] sm:$0xff] %v3797_v35  ;;  %7100 = vst [vmem:[#allocation74_spill] sm:$0xff] %v3813_v11  ;;  %v3821_v35 = vmul.f32 %v3517_v25, %v3429_v24  ;;  %v3843_v24 = vmul.f32 %v3517_v25, %v3435_v28  ;;  %v3854_v11 = vmul.f32 %v3517_v25, %v3439_v31 }
 0x159   : > { %7101 = vst [vmem:[#allocation75_spill] sm:$0xff] %v3817_v19  ;;  %7103 = vst [vmem:[#allocation77_spill] sm:$0xff] %v3825_v20  ;;  %v3839_v19 = vmul.f32 %v3519_v33, %v3433_v27  ;;  %v3849_v20 = vpop.f32.mrf.mxu0  ;;  %v3858_v27 = vmul.f32 %v3517_v25, %v3441_v32  ;;  %v1257_v25 = vmul.f32 1000000.0, %v3531_v2 }
 0x15a   : > { %7102 = vst [vmem:[#allocation76_spill] sm:$0xff] %v3821_v35  ;;  %7104 = vst [vmem:[#allocation78_spill] sm:$0xff] %v3827_v58  ;;  %v3847_v58 = vmul.f32 %v3519_v33, %v3435_v28  ;;  %v3868_v28 = vmul.f32 %v3519_v33, %v3439_v31  ;;  %v1324_v35 = vmul.f32 %v3721_v52, %v3603_v18 }
 0x15b   : > { %7105 = vst [vmem:[#allocation79_spill] sm:$0xff] %v3829_v16  ;;  %7106 = vst [vmem:[#allocation80_spill] sm:$0xff] %v3835_v23  ;;  %v3862_v23 = vmul.f32 %v3519_v33, %v3441_v32  ;;  %v3880_v32 = vpop.permute.xlu1 %1694  ;;  %v3882_v31 = vpop.f32.mrf.mxu0  ;;  %v1321_v33 = vmul.f32 %v3725_v17, %v3531_v2  ;;  %v1291_v2 = vmul.f32 %v3581_v45, %v3545_v36 }
 0x15c   : > { %7107 = vst [vmem:[#allocation81_spill] sm:$0xff] %v3839_v19  ;;  %7108 = vst [vmem:[#allocation82_spill] sm:$0xff] %v3843_v24  ;;  %v3864_v19 = vpop.f32.mrf.mxu1  ;;  %v1323_v24 = vmul.f32 %v3717_v51, %v3559_v61 }
 0x15d   : > { %7109 = vst [vmem:[#allocation83_spill] sm:$0xff] %v3847_v58  ;;  %7110 = vst [vmem:[#allocation84_spill] sm:$0xff] %v3849_v20  ;;  %v1259_v58 = vmul.f32 1000000.0, %v3559_v61  ;;  %v3934_v61 = vmul.f32 %v3549_v49, %v3617_v30  ;;  %v1230_v20 = vmul.f32 1000000.0, %v3657_v44  ;;  %v1385_v52 = vsel %vm1193_vm11, %v1257_v25, %v1321_v33 }
 0x15e   : > { %7111 = vst [vmem:[#allocation85_spill] sm:$0xff] %v3854_v11  ;;  %7112 = vst [vmem:[#allocation86_spill] sm:$0xff] %v3858_v27  ;;  %v3894_v11 = vpop.permute.xlu0 %1691  ;;  %v1322_v27 = vmul.f32 %v3729_v0, %v3540_v13  ;;  %vm7139_vm11 = vcmp.gt.f32.partialorder %v3745_v56, 1000000.0 }
 0x15f   : > { %7113 = vst [vmem:[#allocation87_spill] sm:$0xff] %v3862_v23  ;;  %7114 = vst [vmem:[#allocation88_spill] sm:$0xff] %v3864_v19  ;;  %v1227_v23 = vmul.f32 1000000.0, %v3545_v36  ;;  %v1228_v36 = vmul.f32 1000000.0, %v3573_v46  ;;  %v1387_v38 = vsel %vm1195_vm9, %v1259_v58, %v1323_v24 }
 0x160   : > { %7115 = vst [vmem:[#allocation89_spill] sm:$0xff] %v3868_v28  ;;  %7116 = vst [vmem:[#allocation90_spill] sm:$0xff] %v3880_v32  ;;  %v3896_v28 = vpop.f32.mrf.mxu1  ;;  %v1258_v32 = vmul.f32 1000000.0, %v3540_v13  ;;  %v1260_v13 = vmul.f32 1000000.0, %v3603_v18  ;;  %v1701_v18 = vpop.permute.xlu1 %1700 }
 0x161   : > { %7117 = vst [vmem:[#allocation91_spill] sm:$0xff] %v3882_v31  ;;  %7118 = vst [vmem:[#allocation92_spill] sm:$0xff] %v3894_v11  ;;  %v3909_v11 = vpop.f32.mrf.mxu0  ;;  %vm1778_vm5 = vcmp.lt.s32.totalorder %v3533_v62, %v1701_v18  ;;  %vm1779_vm7 = vcmp.lt.s32.totalorder %v3529_v34, %v1701_v18  ;;  %v7136_v24 = vmov 0 }
 0x162   : > { %7119 = vst [vmem:[#allocation93_spill] sm:$0xff] %v3896_v28  ;;  %7120 = vst [vmem:[#allocation94_spill] sm:$0xff] %v3909_v11  ;;  %v3921_v21 = vpop.f32.mrf.mxu1  ;;  %v3930_v11 = vmul.f32 1000000.0, %v3617_v30  ;;  %v1325_v28 = vmul.f32 %v3745_v56, %v3635_v39  ;;  %v1698_v46 = vpop.permute.xlu0 %1697  ;;  %v1262_v30 = vmul.f32 1000000.0, %v3677_v47  ;;  %v1388_v16 = vsel %vm1196_vm10, %v1260_v13, %v1324_v35 }
 0x163   : > { %7121 = vst [vmem:[#allocation95_spill] sm:$0xff] %v3921_v21  ;;  %v3936_v31 = vpop.f32.mrf.mxu0  ;;  %v1261_v21 = vmul.f32 1000000.0, %v3635_v39  ;;  %vm3956_vm2 = vmand %vm1586_vm14, %vm1778_vm5  ;;  %v7124_v39 = vmov 0  ;;  %vm1776_vm12 = vcmp.lt.s32.totalorder %v3533_v62, %v1698_v46  ;;  %vm1777_vm13 = vcmp.lt.s32.totalorder %v3529_v34, %v1698_v46 }
 0x164   : > { %7122 = vst [vmem:[#allocation96_spill] sm:$0xff] %v3936_v31  ;;  %v3945_v19 = vpop.f32.mrf.mxu1  ;;  %v1326_v31 = vmul.f32 %v3749_v4, %v3677_v47  ;;  %v7125_v39 = vsel %vm3956_vm2, 4294967295, %v7124_v39  ;;  %v1294_v47 = vmul.f32 %v3553_v53, %v3657_v44  ;;  %vm3978_vm14 = vmand %vm1587_vm15, %vm1779_vm7  ;;  %v3986_v44 = vmul.f32 1000000.0, %v3695_v43 }
 0x165   : > { %7123 = vst [vmem:[#allocation97_spill] sm:$0xff] %v3945_v19  ;;  %7126 = vst [vmem:[#allocation98_spill] sm:$0xff] %v7125_v39  ;;  %v3962_v19 = vpop.f32.mrf.mxu0  ;;  %v3990_v58 = vsel %vm3956_vm2, %v1387_v38, -3e+38  ;;  %v3994_v35 = vsel %vm3978_vm14, %v1388_v16, -3e+38  ;;  %v4011_v38 = vmul.f32 %v3563_v29, %v3695_v43  ;;  %v4025_v25 = vsel %vm7139_vm11, %v1261_v21, %v1325_v28 }
 0x166   : > { %7127 = vst [vmem:[#allocation99_spill] sm:$0xff] %v3962_v19  ;;  %v7128_v19 = vmov 0  ;;  %v3982_v10 = vpop.f32.mrf.mxu1  ;;  %7131 = vst [vmem:[#allocation101_spill] sm:$0xff] %v3990_v58  ;;  %v1263_v16 = vmul.f32 1000000.0, %v3709_v55  ;;  %v1704_v17 = vpop.permute.xlu0 %1703  ;;  %vm7144_vm10 = vcmp.lt.s32.totalorder %v3533_v62, %v3515_v26  ;;  %v7146_v55 = vmov 0 }
 0x167   : > { %v7129_v19 = vsel %vm3978_vm14, 4294967295, %v7128_v19  ;;  %7132 = vst [vmem:[#allocation102_spill] sm:$0xff] %v3994_v35  ;;  %vm3999_vm9 = vmand %vm1584_vm0, %vm1776_vm12  ;;  %v4003_v51 = vpop.f32.mrf.mxu0  ;;  %vm7140_vm15 = vcmp.gt.f32.partialorder %v3729_v0, 1000000.0  ;;  %vm7143_vm7 = vcmp.gt.f32.partialorder %v3585_v14, 1000000.0  ;;  %vm7158_vm0 = vcmp.ge.s32.totalorder %v3529_v34, %v3451_v42 }
 0x168   : > { %7130 = vst [vmem:[#allocation100_spill] sm:$0xff] %v7129_v19  ;;  %v7134_v5 = vsel %vm3999_vm9, 4294967295, %v7133_v5  ;;  %vm4019_vm12 = vmand %vm1585_vm1, %vm1777_vm13  ;;  %v4027_v33 = vpop.f32.mrf.mxu1  ;;  %v1386_v43 = vsel %vm7140_vm15, %v1258_v32, %v1322_v27  ;;  %vm7141_vm13 = vcmp.gt.f32.partialorder %v3749_v4, 1000000.0  ;;  %vm7142_vm1 = vcmp.gt.f32.partialorder %v3581_v45, 1000000.0 }
 0x169   : > { %7135 = vst [vmem:[#allocation103_spill] sm:$0xff] %v7134_v5  ;;  %v7137_v24 = vsel %vm4019_vm12, 4294967295, %v7136_v24  ;;  %v4037_v13 = vsel %vm7141_vm13, %v1262_v30, %v1326_v31  ;;  %v4039_v18 = vpop.f32.mrf.mxu0  ;;  %v1355_v21 = vsel %vm7142_vm1, %v1227_v23, %v1291_v2  ;;  %v1356_v56 = vsel %vm7143_vm7, %v1228_v36, %v1292_v15  ;;  %v7169_v2 = vld [vmem:[#allocation30_spill] sm:$0xff]  ;;  %v1707_v30 = vpop.permute.xlu1 %1706 }
 0x16a   : > { %7138 = vst [vmem:[#allocation104_spill] sm:$0xff] %v7137_v24  ;;  %vm7145_vm13 = vcmp.ge.s32.totalorder %v3533_v62, %v3445_v37  ;;  %v4061_v45 = vsel %vm3999_vm9, %v1385_v52, -3e+38  ;;  %v4065_v14 = vsel %vm4019_vm12, %v1386_v43, -3e+38  ;;  %v4067_v0 = vpop.f32.mrf.mxu1  ;;  %v1987_v4 = vmax.f32 %v3990_v58, %v3994_v35  ;;  %v7217_v24 = vld [vmem:[#allocation95_spill] sm:$0xff] }
 0x16b   : > { %vm4055_vm5 = vmand %vm7145_vm13, %vm7144_vm10  ;;  %7149 = vst [vmem:[#allocation106_spill] sm:$0xff] %v4061_v45  ;;  %vm7151_vm1 = vcmp.gt.f32.partialorder %v3553_v53, 1000000.0  ;;  %vm7152_vm7 = vcmp.lt.s32.totalorder %v3529_v34, %v3515_v26  ;;  %vm7153_vm13 = vcmp.ge.s32.totalorder %v3529_v34, %v3445_v37  ;;  %v7154_v23 = vmov 0 }
 0x16c   : > { %v7147_v55 = vsel %vm4055_vm5, 4294967295, %v7146_v55  ;;  %7150 = vst [vmem:[#allocation107_spill] sm:$0xff] %v4065_v14  ;;  %v1358_v15 = vsel %vm7151_vm1, %v1230_v20, %v1294_v47  ;;  %vm4081_vm15 = vmand %vm7153_vm13, %vm7152_vm7  ;;  %v4086_v27 = vmul.f32 1000000.0, %v3733_v63  ;;  %v1264_v28 = vmul.f32 1000000.0, %v3753_v59  ;;  %v4092_v20 = vpop.f32.mrf.mxu0  ;;  %1988 = vmax.xlane.f32.xlu0 %v1987_v4 }
 0x16d   : > { %7148 = vst [vmem:[#allocation105_spill] sm:$0xff] %v7147_v55  ;;  %v7155_v23 = vsel %vm4081_vm15, 4294967295, %v7154_v23  ;;  %v1984_v53 = vmax.f32 %v4061_v45, %v4065_v14  ;;  %vm7157_vm13 = vcmp.lt.s32.totalorder %v3529_v34, %v3525_v22  ;;  %v7159_v37 = vmov 0  ;;  %v7173_v47 = vld [vmem:[#allocation16_spill] sm:$0xff] }
 0x16e   : > { %7156 = vst [vmem:[#allocation108_spill] sm:$0xff] %v7155_v23  ;;  %vm4104_vm4 = vmand %vm7158_vm0, %vm7157_vm13  ;;  %v1328_v26 = vmul.f32 %v3741_v3, %v3753_v59  ;;  %v4113_v32 = vsel %vm4081_vm15, %v1356_v56, -3e+38  ;;  %vm7163_vm11 = vcmp.gt.f32.partialorder %v3549_v49, 1000000.0  ;;  %vm7164_vm10 = vcmp.lt.s32.totalorder %v3533_v62, %v3525_v22  ;;  %v7179_v56 = vld [vmem:[#allocation5_spill] sm:$0xff] }
 0x16f   : > { %v7160_v37 = vsel %vm4104_vm4, 4294967295, %v7159_v37  ;;  %7162 = vst [vmem:[#allocation110_spill] sm:$0xff] %v4113_v32  ;;  %v1357_v31 = vsel %vm7163_vm11, %v3930_v11, %v3934_v61  ;;  %vm7165_vm1 = vcmp.ge.s32.totalorder %v3533_v62, %v3451_v42  ;;  %v7166_v59 = vmov 0  ;;  %1985 = vmax.xlane.f32.xlu1 %v1984_v53  ;;  %v4146_v42 = vpop.f32.mrf.mxu1  ;;  %v4152_v61 = vpop.f32.mrf.mxu0  ;;  %v7192_v55 = vld [vmem:[#allocation88_spill] sm:$0xff] }
 0x170   : > { %7161 = vst [vmem:[#allocation109_spill] sm:$0xff] %v7160_v37  ;;  %vm4129_vm3 = vmand %vm7165_vm1, %vm7164_vm10  ;;  %v4137_v49 = vmul.f32 %v3567_v50, %v3733_v63  ;;  %v4140_v11 = vmul.f32 1000000.0, %v3771_v48  ;;  %v4144_v22 = vmul.f32 %v3607_v40, %v3771_v48  ;;  %v4150_v36 = vsel %vm4104_vm4, %v1358_v15, -3e+38  ;;  %v7187_v15 = vld [vmem:[#allocation73_spill] sm:$0xff] }
 0x171   : > { %v7167_v59 = vsel %vm4129_vm3, 4294967295, %v7166_v59  ;;  %7170 = vst [vmem:[#allocation30_spill] sm:$0xff] %v4150_v36  ;;  %v1265_v63 = vmul.f32 1000000.0, %v3789_v12  ;;  %v1329_v46 = vmul.f32 %v3765_v1, %v3789_v12  ;;  %vm7171_vm1 = vcmp.gt.f32.partialorder %v3737_v60, 1000000.0  ;;  %v4220_v39 = vpop.f32.mrf.mxu1 }
 0x172   : > { %7168 = vst [vmem:[#allocation111_spill] sm:$0xff] %v7167_v59  ;;  %v4161_v48 = vsel %vm7171_vm1, %v1263_v16, %v1327_v6  ;;  %vm7172_vm11 = vcmp.lt.s32.totalorder %v3533_v62, %v1704_v17  ;;  %vm7174_vm0 = vcmp.ge.s32.totalorder %v3533_v62, %v7173_v47  ;;  %v7175_v52 = vmov 0  ;;  %v7180_v12 = vld [vmem:[#allocation79_spill] sm:$0xff]  ;;  %v7190_v37 = vld [vmem:[#allocation17_spill] sm:$0xff] }
 0x173   : > { %vm4168_vm13 = vmand %vm7174_vm0, %vm7172_vm11  ;;  %v4174_v43 = vsel %vm4055_vm5, %v1355_v21, -3e+38  ;;  %v1266_v60 = vmul.f32 1000000.0, %v7180_v12  ;;  %v1330_v16 = vmul.f32 %v3769_v8, %v7180_v12  ;;  %vm7181_vm1 = vcmp.lt.s32.totalorder %v3529_v34, %v1704_v17  ;;  %v7188_v17 = vld [vmem:[#allocation38_spill] sm:$0xff]  ;;  %v4312_v35 = vpop.f32.mrf.mxu1 }
 0x174   : > { %v7176_v52 = vsel %vm4168_vm13, 4294967295, %v7175_v52  ;;  %7178 = vst [vmem:[#allocation112_spill] sm:$0xff] %v4174_v43  ;;  %vm7182_vm0 = vcmp.ge.s32.totalorder %v3529_v34, %v7173_v47  ;;  %v7183_v6 = vmov 0  ;;  %v1939_v21 = vmax.f32 %v4174_v43, %v4113_v32 }
 0x175   : > { %7177 = vst [vmem:[#allocation16_spill] sm:$0xff] %v7176_v52  ;;  %vm4186_vm11 = vmand %vm7182_vm0, %vm7181_vm1  ;;  %v4194_v4 = vsel %vm4129_vm3, %v1357_v31, -3e+38  ;;  %v4199_v53 = vmul.f32 1000000.0, %v7187_v15  ;;  %v4203_v47 = vmul.f32 %v7188_v17, %v7187_v15  ;;  %v7191_v31 = vld [vmem:[#allocation84_spill] sm:$0xff]  ;;  %v1331_v19 = vmul.f32 %v3757_v57, %v7192_v55  ;;  %v4292_v52 = vpop.permute.xlu1 %1712 }
 0x176   : > { %v7184_v6 = vsel %vm4186_vm11, 4294967295, %v7183_v6  ;;  %7186 = vst [vmem:[#allocation79_spill] sm:$0xff] %v4194_v4  ;;  %vm7189_vm1 = vcmp.gt.f32.partialorder %v3741_v3, 1000000.0  ;;  %v1942_v23 = vmax.f32 %v4194_v4, %v4150_v36  ;;  %v4214_v59 = vmul.f32 1000000.0, %v7191_v31  ;;  %1940 = vmax.xlane.f32.xlu1 %v1939_v21  ;;  %v4222_v3 = vpop.f32.mrf.mxu0 }
 0x177   : > { %7185 = vst [vmem:[#allocation5_spill] sm:$0xff] %v7184_v6  ;;  %v4207_v12 = vsel %vm7189_vm1, %v1264_v28, %v1328_v26  ;;  %v1267_v32 = vmul.f32 1000000.0, %v7192_v55  ;;  %v7193_v15 = vld [vmem:[#allocation93_spill] sm:$0xff]  ;;  %v7194_v28 = vld [vmem:[#allocation18_spill] sm:$0xff]  ;;  %vm7197_vm0 = vcmp.lt.s32.totalorder %v3533_v62, %v3521_v54  ;;  %vm1783_vm10 = vcmp.lt.s32.totalorder %v3529_v34, %v1707_v30 }
 0x178   : > { %v1268_v43 = vmul.f32 1000000.0, %v7193_v15  ;;  %v1332_v26 = vmul.f32 %v3761_v7, %v7193_v15  ;;  %v4232_v36 = vsel %vm4168_vm13, %v4025_v25, -3e+38  ;;  %v4237_v55 = vsel %vm4186_vm11, %v4037_v13, -3e+38  ;;  %1943 = vmax.xlane.f32.xlu0 %v1942_v23  ;;  %v4320_v58 = vpop.f32.mrf.mxu0 }
 0x179   : > { %7195 = vst [vmem:[#allocation73_spill] sm:$0xff] %v4232_v36  ;;  %7196 = vst [vmem:[#allocation38_spill] sm:$0xff] %v4237_v55  ;;  %vm7198_vm13 = vcmp.ge.s32.totalorder %v3533_v62, %v3449_v41  ;;  %v7199_v25 = vmov 0  ;;  %v7202_v13 = vld [vmem:[#allocation34_spill] sm:$0xff]  ;;  %vm7203_vm1 = vcmp.gt.f32.partialorder %v3765_v1, 1000000.0  ;;  %vm7206_vm11 = vcmp.ge.s32.totalorder %v3529_v34, %v3449_v41  ;;  %v1710_v41 = vpop.permute.xlu0 %1709 }
 0x17a   : > { %vm4249_vm15 = vmand %vm7198_vm13, %vm7197_vm0  ;;  %v4255_v23 = vmul.f32 %v7202_v13, %v7191_v31  ;;  %v4260_v21 = vsel %vm7203_vm1, %v1265_v63, %v1329_v46  ;;  %vm7204_vm7 = vcmp.gt.f32.partialorder %v3769_v8, 1000000.0  ;;  %vm7205_vm0 = vcmp.lt.s32.totalorder %v3529_v34, %v3521_v54  ;;  %v7210_v1 = vld [vmem:[#allocation91_spill] sm:$0xff]  ;;  %v7214_v6 = vld [vmem:[#allocation42_spill] sm:$0xff]  ;;  %7225 = vst [vmem:[#allocation34_spill] sm:$0xff] %v4320_v58 }
 0x17b   : > { %v7200_v25 = vsel %vm4249_vm15, 4294967295, %v7199_v25  ;;  %v4264_v15 = vsel %vm7204_vm7, %v1266_v60, %v1330_v16  ;;  %vm4274_vm4 = vmand %vm7206_vm11, %vm7205_vm0  ;;  %v7207_v31 = vmov 0  ;;  %v4279_v63 = vmul.f32 1000000.0, %v7210_v1  ;;  %v7211_v8 = vld [vmem:[#allocation35_spill] sm:$0xff]  ;;  %v7212_v60 = vld [vmem:[#allocation94_spill] sm:$0xff] }
 0x17c   : > { %7201 = vst [vmem:[#allocation17_spill] sm:$0xff] %v7200_v25  ;;  %v7208_v31 = vsel %vm4274_vm4, 4294967295, %v7207_v31  ;;  %v4283_v46 = vmul.f32 %v7211_v8, %v7210_v1  ;;  %v4286_v16 = vmul.f32 1000000.0, %v7212_v60  ;;  %v4290_v54 = vmul.f32 %v7214_v6, %v7212_v60  ;;  %v7216_v4 = vld [vmem:[#allocation29_spill] sm:$0xff] }
 0x17d   : > { %7209 = vst [vmem:[#allocation84_spill] sm:$0xff] %v7208_v31  ;;  %v4297_v5 = vmul.f32 1000000.0, %v7217_v24  ;;  %vm7218_vm11 = vcmp.lt.s32.totalorder %v3533_v62, %v1707_v30  ;;  %vm7219_vm1 = vcmp.ge.s32.totalorder %v3533_v62, %v3481_v9  ;;  %v7220_v1 = vmov 0  ;;  %v7236_v30 = vld [vmem:[#allocation43_spill] sm:$0xff] }
 0x17e   : > { %7213 = vst [vmem:[#allocation88_spill] sm:$0xff] %v4286_v16  ;;  %7215 = vst [vmem:[#allocation93_spill] sm:$0xff] %v4290_v54  ;;  %vm7223_vm13 = vcmp.gt.f32.partialorder %v3757_v57, 1000000.0  ;;  %v1990_v14 = vmax.f32 %v4232_v36, %v4237_v55  ;;  %vm7224_vm7 = vcmp.gt.f32.partialorder %v3563_v29, 1000000.0 }
 0x17f   : > { %vm4304_vm0 = vmand %vm7219_vm1, %vm7218_vm11  ;;  %v4310_v60 = vsel %vm7223_vm13, %v1267_v32, %v1331_v19  ;;  %v1359_v45 = vsel %vm7224_vm7, %v3986_v44, %v4011_v38  ;;  %v7226_v16 = vld [vmem:[#allocation66_spill] sm:$0xff]  ;;  %v7227_v19 = vld [vmem:[#allocation96_spill] sm:$0xff]  ;;  %vm7229_vm13 = vcmp.ge.s32.totalorder %v3529_v34, %v3481_v9  ;;  %v7230_v29 = vmov 0 }
 0x180   : > { %v7221_v1 = vsel %vm4304_vm0, 4294967295, %v7220_v1  ;;  %v4326_v57 = vmul.f32 %v7226_v16, %v7217_v24  ;;  %v4329_v32 = vmul.f32 1000000.0, %v7227_v19  ;;  %vm4336_vm1 = vmand %vm7229_vm13, %vm1783_vm10  ;;  %vm7233_vm7 = vcmp.gt.f32.partialorder %v3761_v7, 1000000.0  ;;  %v7235_v24 = vld [vmem:[#allocation4_spill] sm:$0xff]  ;;  %1991 = vmax.xlane.f32.xlu1 %v1990_v14 }
 0x181   : > { %7222 = vst [vmem:[#allocation18_spill] sm:$0xff] %v7221_v1  ;;  %v7231_v29 = vsel %vm4336_vm1, 4294967295, %v7230_v29  ;;  %v4342_v44 = vsel %vm7233_vm7, %v1268_v43, %v1332_v26  ;;  %vm7234_vm11 = vcmp.gt.f32.partialorder %v3567_v50, 1000000.0  ;;  %v4352_v55 = vmul.f32 %v7236_v30, %v7227_v19  ;;  %v7245_v14 = vld [vmem:[#allocation97_spill] sm:$0xff]  ;;  %v7247_v26 = vld [vmem:[#allocation19_spill] sm:$0xff] }
 0x182   : > { %7228 = vst [vmem:[#allocation91_spill] sm:$0xff] %v4329_v32  ;;  %7232 = vst [vmem:[#allocation35_spill] sm:$0xff] %v7231_v29  ;;  %v1360_v38 = vsel %vm7234_vm11, %v4086_v27, %v4137_v49  ;;  %v4358_v9 = vsel %vm4249_vm15, %v1359_v45, -3e+38  ;;  %vm7240_vm13 = vcmp.lt.s32.totalorder %v3533_v62, %v7169_v2  ;;  %vm7241_vm7 = vcmp.ge.s32.totalorder %v3533_v62, %v7179_v56  ;;  %v7246_v27 = vld [vmem:[#allocation67_spill] sm:$0xff] }
 0x183   : > { %7237 = vst [vmem:[#allocation94_spill] sm:$0xff] %v4352_v55  ;;  %7238 = vst [vmem:[#allocation42_spill] sm:$0xff] %v4358_v9  ;;  %v4362_v7 = vsel %vm4274_vm4, %v1360_v38, -3e+38  ;;  %v7242_v50 = vmov 0  ;;  %v4381_v49 = vmul.f32 %v7246_v27, %v7245_v14  ;;  %vm7249_vm15 = vcmp.ge.s32.totalorder %v3529_v34, %v7179_v56  ;;  %v7253_v38 = vld [vmem:[#allocation99_spill] sm:$0xff]  ;;  %v4416_v56 = vpop.f32.mrf.mxu0 }
 0x184   : > { %7239 = vst [vmem:[#allocation29_spill] sm:$0xff] %v4362_v7  ;;  %vm4372_vm3 = vmand %vm7241_vm7, %vm7240_vm13  ;;  %v4377_v45 = vmul.f32 1000000.0, %v7245_v14  ;;  %v1945_v43 = vmax.f32 %v4358_v9, %v4362_v7  ;;  %vm7248_vm7 = vcmp.lt.s32.totalorder %v3529_v34, %v7169_v2  ;;  %v7250_v19 = vmov 0  ;;  %v4414_v2 = vpop.f32.mrf.mxu1  ;;  %v7259_v7 = vld [vmem:[#allocation64_spill] sm:$0xff]  ;;  %v7260_v9 = vld [vmem:[#allocation37_spill] sm:$0xff] }
 0x185   : > { %v7243_v50 = vsel %vm4372_vm3, 4294967295, %v7242_v50  ;;  %vm4396_vm5 = vmand %vm7249_vm15, %vm7248_vm7  ;;  %v4401_v14 = vmul.f32 1000000.0, %v7253_v38  ;;  %v4406_v31 = vsel %vm4304_vm0, %v4161_v48, -3e+38  ;;  %7257 = vst [vmem:[#allocation97_spill] sm:$0xff] %v4414_v2  ;;  %v4432_v29 = vmul.f32 %v7259_v7, %v3982_v10 }
 0x186   : > { %7244 = vst [vmem:[#allocation95_spill] sm:$0xff] %v7243_v50  ;;  %v7251_v19 = vsel %vm4396_vm5, 4294967295, %v7250_v19  ;;  %7255 = vst [vmem:[#allocation4_spill] sm:$0xff] %v4406_v31  ;;  %v4411_v25 = vsel %vm4336_vm1, %v4207_v12, -3e+38  ;;  %v7261_v48 = vld [vmem:[#allocation39_spill] sm:$0xff]  ;;  %vm7263_vm7 = vcmp.lt.s32.totalorder %v3533_v62, %v4292_v52  ;;  %vm7264_vm11 = vcmp.ge.s32.totalorder %v3533_v62, %v7190_v37  ;;  %1946 = vmax.xlane.f32.xlu0 %v1945_v43 }
 0x187   : > { %7252 = vst [vmem:[#allocation66_spill] sm:$0xff] %v7251_v19  ;;  %7254 = vst [vmem:[#allocation96_spill] sm:$0xff] %v4401_v14  ;;  %v4425_v1 = vmul.f32 %v7261_v48, %v7253_v38  ;;  %v4428_v12 = vmul.f32 1000000.0, %v3982_v10  ;;  %v7265_v36 = vmov 0  ;;  %v7268_v38 = vld [vmem:[#allocation65_spill] sm:$0xff]  ;;  %vm7280_vm4 = vcmp.lt.s32.totalorder %v3529_v34, %v1710_v41 }
 0x188   : > { %7256 = vst [vmem:[#allocation43_spill] sm:$0xff] %v4411_v25  ;;  %7258 = vst [vmem:[#allocation67_spill] sm:$0xff] %v4416_v56  ;;  %v7269_v10 = vld [vmem:[#allocation20_spill] sm:$0xff]  ;;  %v4452_v14 = vmul.f32 1000000.0, %v4003_v51  ;;  %v4463_v43 = vmul.f32 %v7268_v38, %v4027_v33  ;;  %v7275_v32 = vmov 0  ;;  %vm7281_vm0 = vcmp.ge.s32.totalorder %v3529_v34, %v7194_v28 }
 0x189   : > { %7262 = vst [vmem:[#allocation19_spill] sm:$0xff] %v4425_v1  ;;  %vm4442_vm13 = vmand %vm7264_vm11, %vm7263_vm7  ;;  %v7271_v1 = vld [vmem:[#allocation41_spill] sm:$0xff]  ;;  %v4459_v58 = vmul.f32 1000000.0, %v4027_v33  ;;  %vm7273_vm11 = vcmp.lt.s32.totalorder %v3533_v62, %v1710_v41  ;;  %vm7274_vm7 = vcmp.ge.s32.totalorder %v3533_v62, %v7194_v28  ;;  %v7282_v33 = vmov 0  ;;  %v7287_v28 = vld [vmem:[#allocation70_spill] sm:$0xff] }
 0x18a   : > { %v7266_v36 = vsel %vm4442_vm13, 4294967295, %v7265_v36  ;;  %7270 = vst [vmem:[#allocation64_spill] sm:$0xff] %v4452_v14  ;;  %v4456_v56 = vmul.f32 %v7271_v1, %v4003_v51  ;;  %vm4470_vm15 = vmand %vm7274_vm7, %vm7273_vm11  ;;  %v7278_v14 = vld [vmem:[#allocation7_spill] sm:$0xff]  ;;  %v4479_v51 = vmul.f32 1000000.0, %v4067_v0  ;;  %v1993_v55 = vmax.f32 %v4406_v31, %v4411_v25  ;;  %v7300_v50 = vld [vmem:[#allocation21_spill] sm:$0xff] }
 0x18b   : > { %7267 = vst [vmem:[#allocation99_spill] sm:$0xff] %v7266_v36  ;;  %v7276_v32 = vsel %vm4470_vm15, 4294967295, %v7275_v32  ;;  %vm4486_vm14 = vmand %vm7281_vm0, %vm7280_vm4  ;;  %vm7285_vm11 = vcmp.gt.f32.partialorder %v3607_v40, 1000000.0  ;;  %vm7286_vm7 = vcmp.gt.f32.partialorder %v7188_v17, 1000000.0  ;;  %vm7289_vm0 = vcmp.lt.s32.totalorder %v3529_v34, %v4292_v52 }
 0x18c   : > { %7272 = vst [vmem:[#allocation37_spill] sm:$0xff] %v4456_v56  ;;  %7277 = vst [vmem:[#allocation39_spill] sm:$0xff] %v7276_v32  ;;  %v7283_v33 = vsel %vm4486_vm14, 4294967295, %v7282_v33  ;;  %v1719_v56 = vpop.permute.xlu1 %1718  ;;  %v1361_v54 = vsel %vm7285_vm11, %v4140_v11, %v4144_v22  ;;  %v1362_v41 = vsel %vm7286_vm7, %v4199_v53, %v4203_v47  ;;  %v4507_v2 = vmul.f32 1000000.0, %v4039_v18  ;;  %v4519_v11 = vpop.f32.mrf.mxu1  ;;  %v7297_v52 = vld [vmem:[#allocation46_spill] sm:$0xff]  ;;  %1994 = vmax.xlane.f32.xlu0 %v1993_v55 }
 0x18d   : > { %7279 = vst [vmem:[#allocation65_spill] sm:$0xff] %v4479_v51  ;;  %7284 = vst [vmem:[#allocation20_spill] sm:$0xff] %v7283_v33  ;;  %v4504_v51 = vmul.f32 %v7287_v28, %v4067_v0  ;;  %vm7290_vm11 = vcmp.ge.s32.totalorder %v3529_v34, %v7190_v37  ;;  %v7291_v40 = vmov 0  ;;  %v4523_v22 = vsel %vm4372_vm3, %v1361_v54, -3e+38  ;;  %v4529_v53 = vpop.f32.mrf.mxu0  ;;  %v7296_v37 = vld [vmem:[#allocation32_spill] sm:$0xff] }
 0x18e   : > { %7288 = vst [vmem:[#allocation41_spill] sm:$0xff] %v4507_v2  ;;  %vm4515_vm10 = vmand %vm7290_vm11, %vm7289_vm0  ;;  %v4527_v0 = vsel %vm4396_vm5, %v1362_v41, -3e+38  ;;  %v4539_v17 = vmul.f32 %v7297_v52, %v4039_v18  ;;  %v4544_v47 = vsel %vm4442_vm13, %v4310_v60, -3e+38  ;;  %v4549_v41 = vpop.permute.xlu0 %1715  ;;  %v7301_v55 = vld [vmem:[#allocation47_spill] sm:$0xff]  ;;  %vm7304_vm4 = vcmp.lt.s32.totalorder %v3533_v62, %v7216_v4 }
 0x18f   : > { %v7292_v40 = vsel %vm4515_vm10, 4294967295, %v7291_v40  ;;  %7294 = vst [vmem:[#allocation70_spill] sm:$0xff] %v4523_v22  ;;  %7295 = vst [vmem:[#allocation113_spill] sm:$0xff] %v4527_v0  ;;  %v4547_v54 = vmul.f32 1000000.0, %v4092_v20  ;;  %v1948_v19 = vmax.f32 %v4523_v22, %v4527_v0  ;;  %v4569_v36 = vmul.f32 %v7301_v55, %v4092_v20  ;;  %v7303_v0 = vld [vmem:[#allocation6_spill] sm:$0xff] }
 0x190   : > { %7293 = vst [vmem:[#allocation7_spill] sm:$0xff] %v7292_v40  ;;  %7298 = vst [vmem:[#allocation32_spill] sm:$0xff] %v4544_v47  ;;  %v4560_v18 = vsel %vm4470_vm15, %v4260_v21, -3e+38  ;;  %v4565_v60 = vsel %vm4486_vm14, %v4264_v15, -3e+38  ;;  %vm7305_vm0 = vcmp.ge.s32.totalorder %v3533_v62, %v7235_v24  ;;  %vm7314_vm13 = vcmp.ge.s32.totalorder %v3529_v34, %v7235_v24  ;;  %v4625_v24 = vpop.f32.mrf.mxu0 }
 0x191   : > { %7299 = vst [vmem:[#allocation46_spill] sm:$0xff] %v4547_v54  ;;  %7302 = vst [vmem:[#allocation21_spill] sm:$0xff] %v4569_v36  ;;  %v7306_v21 = vmov 0  ;;  %v4587_v20 = vsel %vm4515_vm10, %v4342_v44, -3e+38  ;;  %v7310_v33 = vld [vmem:[#allocation71_spill] sm:$0xff]  ;;  %1949 = vmax.xlane.f32.xlu1 %v1948_v19  ;;  %vm7313_vm10 = vcmp.lt.s32.totalorder %v3529_v34, %v7216_v4  ;;  %v4623_v4 = vpop.f32.mrf.mxu1  ;;  %vm7322_vm7 = vcmp.lt.s32.totalorder %v3533_v62, %v1719_v56 }
 0x192   : > { %vm4580_vm1 = vmand %vm7305_vm0, %vm7304_vm4  ;;  %7309 = vst [vmem:[#allocation6_spill] sm:$0xff] %v4587_v20  ;;  %v4590_v15 = vmul.f32 1000000.0, %v4146_v42  ;;  %v4594_v32 = vmul.f32 %v7310_v33, %v4146_v42  ;;  %v7311_v22 = vld [vmem:[#allocation68_spill] sm:$0xff]  ;;  %v7312_v25 = vld [vmem:[#allocation69_spill] sm:$0xff]  ;;  %v7315_v44 = vmov 0  ;;  %vm7323_vm0 = vcmp.ge.s32.totalorder %v3533_v62, %v7247_v26 }
 0x193   : > { %v7307_v21 = vsel %vm4580_vm1, 4294967295, %v7306_v21  ;;  %vm4607_vm14 = vmand %vm7314_vm13, %vm7313_vm10  ;;  %v4612_v42 = vmul.f32 1000000.0, %v4220_v39  ;;  %v4616_v19 = vmul.f32 %v7311_v22, %v4220_v39  ;;  %v4619_v40 = vmul.f32 1000000.0, %v4152_v61  ;;  %7319 = vst [vmem:[#allocation69_spill] sm:$0xff] %v4625_v24  ;;  %v4644_v24 = vpop.permute.xlu1 %1724 }
 0x194   : > { %7308 = vst [vmem:[#allocation47_spill] sm:$0xff] %v7307_v21  ;;  %v7316_v44 = vsel %vm4607_vm14, 4294967295, %v7315_v44  ;;  %v7320_v39 = vld [vmem:[#allocation44_spill] sm:$0xff]  ;;  %vm4640_vm11 = vmand %vm7323_vm0, %vm7322_vm7  ;;  %v1996_v54 = vmax.f32 %v4560_v18, %v4565_v60  ;;  %vm7327_vm13 = vcmp.gt.f32.partialorder %v7202_v13, 1000000.0  ;;  %v7329_v36 = vld [vmem:[#allocation22_spill] sm:$0xff] }
 0x195   : > { %7317 = vst [vmem:[#allocation71_spill] sm:$0xff] %v7316_v44  ;;  %7318 = vst [vmem:[#allocation68_spill] sm:$0xff] %v4619_v40  ;;  %v4633_v31 = vmul.f32 %v7320_v39, %v4152_v61  ;;  %v7324_v40 = vmov 0  ;;  %v1363_v61 = vsel %vm7327_vm13, %v4214_v59, %v4255_v23  ;;  %vm7328_vm10 = vcmp.gt.f32.partialorder %v7211_v8, 1000000.0  ;;  %v7330_v2 = vld [vmem:[#allocation53_spill] sm:$0xff] }
 0x196   : > { %v7325_v40 = vsel %vm4640_vm11, 4294967295, %v7324_v40  ;;  %vm7331_vm5 = vcmp.gt.f32.partialorder %v7259_v7, 1000000.0  ;;  %vm7332_vm13 = vcmp.lt.s32.totalorder %v3529_v34, %v1719_v56  ;;  %v7334_v13 = vmov 0  ;;  %1997 = vmax.xlane.f32.xlu1 %v1996_v54  ;;  %v7354_v56 = vld [vmem:[#allocation48_spill] sm:$0xff]  ;;  %v7360_v54 = vld [vmem:[#allocation97_spill] sm:$0xff] }
 0x197   : > { %7321 = vst [vmem:[#allocation44_spill] sm:$0xff] %v4633_v31  ;;  %7326 = vst [vmem:[#allocation114_spill] sm:$0xff] %v7325_v40  ;;  %v1364_v31 = vsel %vm7328_vm10, %v4279_v63, %v4283_v46  ;;  %v1399_v59 = vsel %vm7331_vm5, %v4428_v12, %v4432_v29  ;;  %vm7333_vm10 = vcmp.ge.s32.totalorder %v3529_v34, %v7247_v26  ;;  %v4679_v23 = vsel %vm4580_vm1, %v1363_v61, -3e+38  ;;  %v4740_v26 = vpop.f32.mrf.mxu0  ;;  %v7372_v40 = vld [vmem:[#allocation91_spill] sm:$0xff]  ;;  %v7374_v21 = vld [vmem:[#allocation74_spill] sm:$0xff] }
 0x198   : > { %vm4671_vm3 = vmand %vm7333_vm10, %vm7332_vm13  ;;  %7337 = vst [vmem:[#allocation53_spill] sm:$0xff] %v4679_v23  ;;  %v4683_v63 = vsel %vm4607_vm14, %v1364_v31, -3e+38  ;;  %vm7339_vm10 = vcmp.gt.f32.partialorder %v7268_v38, 1000000.0  ;;  %vm7342_vm5 = vcmp.lt.s32.totalorder %v3533_v62, %v4549_v41  ;;  %vm7343_vm13 = vcmp.ge.s32.totalorder %v3533_v62, %v7269_v10 }
 0x199   : > { %v7335_v13 = vsel %vm4671_vm3, 4294967295, %v7334_v13  ;;  %7338 = vst [vmem:[#allocation115_spill] sm:$0xff] %v4683_v63  ;;  %v1400_v8 = vsel %vm7339_vm10, %v4459_v58, %v4463_v43  ;;  %vm7340_vm15 = vcmp.gt.f32.partialorder %v7226_v16, 1000000.0  ;;  %vm7341_vm7 = vcmp.gt.f32.partialorder %v7246_v27, 1000000.0  ;;  %vm4707_vm4 = vmand %vm7343_vm13, %vm7342_vm5 }
 0x19a   : > { %7336 = vst [vmem:[#allocation22_spill] sm:$0xff] %v7335_v13  ;;  %v1397_v46 = vsel %vm7340_vm15, %v4297_v5, %v4326_v57  ;;  %v1398_v31 = vsel %vm7341_vm7, %v4377_v45, %v4381_v49  ;;  %v7344_v29 = vmov 0  ;;  %v1951_v58 = vmax.f32 %v4679_v23, %v4683_v63  ;;  %v7347_v5 = vld [vmem:[#allocation9_spill] sm:$0xff]  ;;  %v4738_v49 = vpop.f32.mrf.mxu1  ;;  %v7371_v13 = vld [vmem:[#allocation94_spill] sm:$0xff]  ;;  %v7375_v63 = vld [vmem:[#allocation8_spill] sm:$0xff] }
 0x19b   : > { %v7345_v29 = vsel %vm4707_vm4, 4294967295, %v7344_v29  ;;  %vm7348_vm7 = vcmp.lt.s32.totalorder %v3533_v62, %v7260_v9  ;;  %vm7349_vm10 = vcmp.ge.s32.totalorder %v3533_v62, %v7278_v14  ;;  %v7350_v16 = vmov 0  ;;  %v7353_v45 = vld [vmem:[#allocation45_spill] sm:$0xff]  ;;  %v7450_v23 = vld [vmem:[#allocation10_spill] sm:$0xff] }
 0x19c   : > { %7346 = vst [vmem:[#allocation116_spill] sm:$0xff] %v7345_v29  ;;  %vm4721_vm0 = vmand %vm7349_vm10, %vm7348_vm7  ;;  %v4727_v57 = vsel %vm4640_vm11, %v1399_v59, -3e+38  ;;  %v4730_v7 = vmul.f32 1000000.0, %v4222_v3  ;;  %v4734_v27 = vmul.f32 %v7353_v45, %v4222_v3  ;;  %vm7355_vm5 = vcmp.lt.s32.totalorder %v3529_v34, %v4549_v41  ;;  %v1722_v59 = vpop.permute.xlu0 %1721  ;;  %1952 = vmax.xlane.f32.xlu0 %v1951_v58  ;;  %v7367_v41 = vld [vmem:[#allocation76_spill] sm:$0xff] }
 0x19d   : > { %v7351_v16 = vsel %vm4721_vm0, 4294967295, %v7350_v16  ;;  %v4750_v3 = vsel %vm4671_vm3, %v1400_v8, -3e+38  ;;  %vm7356_vm11 = vcmp.ge.s32.totalorder %v3529_v34, %v7269_v10  ;;  %v7357_v12 = vmov 0  ;;  %v7368_v58 = vld [vmem:[#allocation93_spill] sm:$0xff] }
 0x19e   : > { %7352 = vst [vmem:[#allocation9_spill] sm:$0xff] %v7351_v16  ;;  %vm4758_vm14 = vmand %vm7356_vm11, %vm7355_vm5  ;;  %v1276_v38 = vmul.f32 1000000.0, %v4312_v35  ;;  %v1340_v43 = vmul.f32 %v7312_v25, %v4312_v35  ;;  %v4766_v61 = vmul.f32 1000000.0, %v7360_v54  ;;  %vm7361_vm15 = vcmp.lt.s32.totalorder %v3529_v34, %v7260_v9  ;;  %v7369_v9 = vld [vmem:[#allocation88_spill] sm:$0xff] }
 0x19f   : > { %v7358_v12 = vsel %vm4758_vm14, 4294967295, %v7357_v12  ;;  %vm7362_vm7 = vcmp.ge.s32.totalorder %v3529_v34, %v7278_v14  ;;  %v7363_v10 = vmov 0  ;;  %v4782_v35 = vsel %vm4707_vm4, %v1397_v46, -3e+38  ;;  %v7391_v16 = vld [vmem:[#allocation23_spill] sm:$0xff] }
 0x1a0   : > { %7359 = vst [vmem:[#allocation45_spill] sm:$0xff] %v7358_v12  ;;  %vm4774_vm11 = vmand %vm7362_vm7, %vm7361_vm15  ;;  %v4786_v8 = vmul.f32 %v7367_v41, %v7360_v54  ;;  %vm7370_vm13 = vcmp.gt.f32.partialorder %v7214_v6, 1000000.0  ;;  %vm7373_vm15 = vcmp.gt.f32.partialorder %v7236_v30, 1000000.0  ;;  %vm7376_vm3 = vcmp.lt.s32.totalorder %v3533_v62, %v4644_v24  ;;  %v7389_v54 = vld [vmem:[#allocation34_spill] sm:$0xff] }
 0x1a1   : > { %v7364_v10 = vsel %vm4774_vm11, 4294967295, %v7363_v10  ;;  %7366 = vst [vmem:[#allocation97_spill] sm:$0xff] %v4782_v35  ;;  %v1365_v14 = vsel %vm7370_vm13, %v7369_v9, %v7368_v58  ;;  %v1366_v44 = vsel %vm7373_vm15, %v7372_v40, %v7371_v13  ;;  %vm7377_vm4 = vcmp.ge.s32.totalorder %v3533_v62, %v7300_v50  ;;  %v4843_v9 = vpop.f32.mrf.mxu1  ;;  %v7397_v12 = vld [vmem:[#allocation63_spill] sm:$0xff] }
 0x1a2   : > { %7365 = vst [vmem:[#allocation48_spill] sm:$0xff] %v7364_v10  ;;  %vm4807_vm13 = vmand %vm7377_vm4, %vm7376_vm3  ;;  %v7378_v6 = vmov 0  ;;  %v1999_v30 = vmax.f32 %v4544_v47, %v4587_v20  ;;  %v4815_v40 = vsel %vm4721_vm0, %v1365_v14, -3e+38  ;;  %v4819_v13 = vsel %vm4774_vm11, %v1366_v44, -3e+38  ;;  %v4845_v14 = vpop.f32.mrf.mxu0 }
 0x1a3   : > { %v7379_v6 = vsel %vm4807_vm13, 4294967295, %v7378_v6  ;;  %7381 = vst [vmem:[#allocation93_spill] sm:$0xff] %v4815_v40  ;;  %7382 = vst [vmem:[#allocation88_spill] sm:$0xff] %v4819_v13  ;;  %vm7383_vm4 = vcmp.lt.s32.totalorder %v3533_v62, %v7296_v37  ;;  %vm7384_vm5 = vcmp.ge.s32.totalorder %v3533_v62, %v7303_v0  ;;  %v7385_v46 = vmov 0  ;;  %v7390_v10 = vld [vmem:[#allocation77_spill] sm:$0xff]  ;;  %v7402_v47 = vld [vmem:[#allocation24_spill] sm:$0xff] }
 0x1a4   : > { %7380 = vst [vmem:[#allocation76_spill] sm:$0xff] %v7379_v6  ;;  %vm4831_vm10 = vmand %vm7384_vm5, %vm7383_vm4  ;;  %v4837_v44 = vsel %vm4758_vm14, %v1398_v31, -3e+38  ;;  %v4840_v58 = vmul.f32 1000000.0, %v7389_v54  ;;  %v1954_v29 = vmax.f32 %v4815_v40, %v4819_v13  ;;  %vm7392_vm3 = vcmp.lt.s32.totalorder %v3529_v34, %v7296_v37  ;;  %v7398_v13 = vld [vmem:[#allocation51_spill] sm:$0xff]  ;;  %2000 = vmax.xlane.f32.xlu0 %v1999_v30  ;;  %v4981_v6 = vpop.permute.xlu0 %1727 }
 0x1a5   : > { %v7386_v46 = vsel %vm4831_vm10, 4294967295, %v7385_v46  ;;  %7388 = vst [vmem:[#allocation91_spill] sm:$0xff] %v4837_v44  ;;  %vm7393_vm7 = vcmp.ge.s32.totalorder %v3529_v34, %v7303_v0  ;;  %v7394_v31 = vmov 0  ;;  %v4867_v40 = vmul.f32 %v7398_v13, %v7389_v54  ;;  %v7401_v0 = vld [vmem:[#allocation52_spill] sm:$0xff]  ;;  %v7422_v30 = vld [vmem:[#allocation37_spill] sm:$0xff] }
 0x1a6   : > { %7387 = vst [vmem:[#allocation94_spill] sm:$0xff] %v7386_v46  ;;  %vm4859_vm14 = vmand %vm7393_vm7, %vm7392_vm3  ;;  %vm7399_vm4 = vcmp.gt.f32.partialorder %v7311_v22, 1000000.0  ;;  %vm7400_vm5 = vcmp.gt.f32.partialorder %v7312_v25, 1000000.0  ;;  %vm7403_vm15 = vcmp.lt.s32.totalorder %v3529_v34, %v4644_v24  ;;  %vm7404_vm0 = vcmp.ge.s32.totalorder %v3529_v34, %v7300_v50  ;;  %1955 = vmax.xlane.f32.xlu1 %v1954_v29  ;;  %v7423_v54 = vld [vmem:[#allocation64_spill] sm:$0xff] }
 0x1a7   : > { %v7395_v31 = vsel %vm4859_vm14, 4294967295, %v7394_v31  ;;  %v1403_v20 = vsel %vm7399_vm4, %v4612_v42, %v4616_v19  ;;  %v1404_v37 = vsel %vm7400_vm5, %v1276_v38, %v1340_v43  ;;  %vm4885_vm1 = vmand %vm7404_vm0, %vm7403_vm15  ;;  %v7405_v22 = vmov 0  ;;  %v7409_v42 = vld [vmem:[#allocation65_spill] sm:$0xff]  ;;  %v7412_v38 = vld [vmem:[#allocation67_spill] sm:$0xff] }
 0x1a8   : > { %7396 = vst [vmem:[#allocation74_spill] sm:$0xff] %v7395_v31  ;;  %v7406_v22 = vsel %vm4885_vm1, 4294967295, %v7405_v22  ;;  %v4891_v25 = vsel %vm4807_vm13, %v1403_v20, -3e+38  ;;  %vm7410_vm5 = vcmp.gt.f32.partialorder %v7287_v28, 1000000.0  ;;  %vm7414_vm11 = vcmp.lt.s32.totalorder %v3533_v62, %v1722_v59  ;;  %v4923_v28 = vpop.permute.xlu1 %1730 }
 0x1a9   : > { %7407 = vst [vmem:[#allocation8_spill] sm:$0xff] %v7406_v22  ;;  %7408 = vst [vmem:[#allocation34_spill] sm:$0xff] %v4891_v25  ;;  %v1401_v19 = vsel %vm7410_vm5, %v7409_v42, %v4504_v51  ;;  %vm7411_vm4 = vcmp.gt.f32.partialorder %v7310_v33, 1000000.0  ;;  %v4902_v50 = vmul.f32 1000000.0, %v7412_v38  ;;  %vm7415_vm5 = vcmp.ge.s32.totalorder %v3533_v62, %v7329_v36 }
 0x1aa   : > { %v1402_v24 = vsel %vm7411_vm4, %v4590_v15, %v4594_v32  ;;  %v7413_v43 = vld [vmem:[#allocation11_spill] sm:$0xff]  ;;  %vm4914_vm7 = vmand %vm7415_vm5, %vm7414_vm11  ;;  %v7416_v51 = vmov 0  ;;  %v4920_v32 = vmul.f32 %v7401_v0, %v7412_v38  ;;  %v1279_v33 = vmul.f32 1000000.0, %v4623_v4  ;;  %v7420_v15 = vld [vmem:[#allocation96_spill] sm:$0xff] }
 0x1ab   : > { %v7417_v51 = vsel %vm4914_vm7, 4294967295, %v7416_v51  ;;  %v7419_v20 = vld [vmem:[#allocation19_spill] sm:$0xff]  ;;  %vm7421_vm4 = vcmp.gt.f32.partialorder %v7261_v48, 1000000.0  ;;  %vm7424_vm11 = vcmp.gt.f32.partialorder %v7271_v1, 1000000.0  ;;  %vm7425_vm3 = vcmp.lt.s32.totalorder %v3529_v34, %v1722_v59 }
 0x1ac   : > { %7418 = vst [vmem:[#allocation77_spill] sm:$0xff] %v7417_v51  ;;  %v1367_v29 = vsel %vm7421_vm4, %v7420_v15, %v7419_v20  ;;  %v1368_v42 = vsel %vm7424_vm11, %v7423_v54, %v7422_v30  ;;  %vm7426_vm0 = vcmp.ge.s32.totalorder %v3529_v34, %v7329_v36  ;;  %v7427_v38 = vmov 0  ;;  %v4946_v20 = vpop.f32.mrf.mxu1  ;;  %v4948_v15 = vpop.f32.mrf.mxu0  ;;  %v7436_v30 = vld [vmem:[#allocation62_spill] sm:$0xff]  ;;  %v7470_v51 = vld [vmem:[#allocation75_spill] sm:$0xff] }
 0x1ad   : > { %vm4940_vm15 = vmand %vm7426_vm0, %vm7425_vm3  ;;  %v1343_v48 = vmul.f32 %v7374_v21, %v4623_v4  ;;  %v2002_v1 = vmax.f32 %v4782_v35, %v4837_v44  ;;  %v4954_v59 = vsel %vm4831_vm10, %v1367_v29, -3e+38  ;;  %v4958_v36 = vsel %vm4859_vm14, %v1368_v42, -3e+38  ;;  %v7438_v46 = vld [vmem:[#allocation50_spill] sm:$0xff] }
 0x1ae   : > { %v7428_v38 = vsel %vm4940_vm15, 4294967295, %v7427_v38  ;;  %7430 = vst [vmem:[#allocation63_spill] sm:$0xff] %v4954_v59  ;;  %7431 = vst [vmem:[#allocation51_spill] sm:$0xff] %v4958_v36  ;;  %vm7432_vm0 = vcmp.lt.s32.totalorder %v3533_v62, %v7330_v2  ;;  %vm7433_vm4 = vcmp.ge.s32.totalorder %v3533_v62, %v7347_v5  ;;  %v7434_v4 = vmov 0  ;;  %v7449_v35 = vld [vmem:[#allocation82_spill] sm:$0xff] }
 0x1af   : > { %7429 = vst [vmem:[#allocation23_spill] sm:$0xff] %v7428_v38  ;;  %vm4968_vm11 = vmand %vm7433_vm4, %vm7432_vm0  ;;  %v4976_v29 = vsel %vm4885_vm1, %v1404_v37, -3e+38  ;;  %v1278_v54 = vmul.f32 1000000.0, %v4519_v11  ;;  %v1342_v42 = vmul.f32 %v7390_v10, %v4519_v11  ;;  %v1957_v31 = vmax.f32 %v4954_v59, %v4958_v36  ;;  %2003 = vmax.xlane.f32.xlu1 %v2002_v1  ;;  %v7446_v36 = vld [vmem:[#allocation21_spill] sm:$0xff]  ;;  %v5051_v1 = vpop.f32.mrf.mxu1 }
 0x1b0   : > { %v7435_v4 = vsel %vm4968_vm11, 4294967295, %v7434_v4  ;;  %7437 = vst [vmem:[#allocation52_spill] sm:$0xff] %v4976_v29  ;;  %vm7439_vm4 = vcmp.lt.s32.totalorder %v3529_v34, %v7330_v2  ;;  %vm7440_vm5 = vcmp.ge.s32.totalorder %v3529_v34, %v7347_v5  ;;  %v7441_v37 = vmov 0  ;;  %v7444_v2 = vld [vmem:[#allocation41_spill] sm:$0xff]  ;;  %v7447_v59 = vld [vmem:[#allocation46_spill] sm:$0xff]  ;;  %v7467_v38 = vld [vmem:[#allocation68_spill] sm:$0xff] }
 0x1b1   : > { %vm4992_vm3 = vmand %vm7440_vm5, %vm7439_vm4  ;;  %v5000_v11 = vsel %vm4914_vm7, %v1401_v19, -3e+38  ;;  %v5003_v22 = vmul.f32 1000000.0, %v4529_v53  ;;  %vm7445_vm0 = vcmp.gt.f32.partialorder %v7297_v52, 1000000.0  ;;  %1958 = vmax.xlane.f32.xlu0 %v1957_v31  ;;  %vm7452_vm4 = vcmp.lt.s32.totalorder %v3533_v62, %v7354_v56 }
 0x1b2   : > { %v7442_v37 = vsel %vm4992_vm3, 4294967295, %v7441_v37  ;;  %v1369_v5 = vsel %vm7445_vm0, %v7444_v2, %v4539_v17  ;;  %vm7448_vm5 = vcmp.gt.f32.partialorder %v7301_v55, 1000000.0  ;;  %v5018_v19 = vsel %vm4940_vm15, %v1402_v24, -3e+38  ;;  %v7451_v55 = vld [vmem:[#allocation49_spill] sm:$0xff] }
 0x1b3   : > { %7443 = vst [vmem:[#allocation24_spill] sm:$0xff] %v7442_v37  ;;  %v1370_v44 = vsel %vm7448_vm5, %v7447_v59, %v7446_v36  ;;  %v5024_v52 = vsel %vm4968_vm11, %v1369_v5, -3e+38  ;;  %vm7453_vm1 = vcmp.ge.s32.totalorder %v3533_v62, %v7375_v63  ;;  %v7454_v31 = vmov 0  ;;  %v5053_v59 = vpop.f32.mrf.mxu0  ;;  %v7458_v2 = vld [vmem:[#allocation57_spill] sm:$0xff]  ;;  %v7459_v5 = vld [vmem:[#allocation26_spill] sm:$0xff] }
 0x1b4   : > { %v5028_v17 = vsel %vm4992_vm3, %v1370_v44, -3e+38  ;;  %vm5039_vm13 = vmand %vm7453_vm1, %vm7452_vm4  ;;  %v5045_v24 = vmul.f32 %v7451_v55, %v4529_v53  ;;  %vm7457_vm15 = vcmp.gt.f32.partialorder %v7374_v21, 1000000.0  ;;  %vm7460_vm5 = vcmp.lt.s32.totalorder %v3529_v34, %v7354_v56  ;;  %v7465_v21 = vld [vmem:[#allocation78_spill] sm:$0xff]  ;;  %v7494_v37 = vld [vmem:[#allocation83_spill] sm:$0xff] }
 0x1b5   : > { %v7455_v31 = vsel %vm5039_vm13, 4294967295, %v7454_v31  ;;  %v1407_v44 = vsel %vm7457_vm15, %v1279_v33, %v1343_v48  ;;  %v1960_v36 = vmax.f32 %v5024_v52, %v5028_v17  ;;  %vm7461_vm15 = vcmp.ge.s32.totalorder %v3529_v34, %v7375_v63  ;;  %v7466_v48 = vld [vmem:[#allocation44_spill] sm:$0xff] }
 0x1b6   : > { %7456 = vst [vmem:[#allocation65_spill] sm:$0xff] %v7455_v31  ;;  %vm5066_vm7 = vmand %vm7461_vm15, %vm7460_vm5  ;;  %v7462_v53 = vmov 0  ;;  %v2005_v33 = vmax.f32 %v4727_v57, %v4750_v3  ;;  %vm7468_vm1 = vcmp.gt.f32.partialorder %v7320_v39, 1000000.0  ;;  %vm7469_vm5 = vcmp.gt.f32.partialorder %v7353_v45, 1000000.0  ;;  %v5209_v31 = vpop.permute.xlu1 %1736 }
 0x1b7   : > { %v7463_v53 = vsel %vm5066_vm7, 4294967295, %v7462_v53  ;;  %v1371_v56 = vsel %vm7468_vm1, %v7467_v38, %v7466_v48  ;;  %v1372_v63 = vsel %vm7469_vm5, %v4730_v7, %v4734_v27  ;;  %vm7471_vm4 = vcmp.lt.s32.totalorder %v3533_v62, %v4923_v28  ;;  %1961 = vmax.xlane.f32.xlu1 %v1960_v36  ;;  %v7479_v38 = vld [vmem:[#allocation56_spill] sm:$0xff]  ;;  %v7480_v48 = vld [vmem:[#allocation13_spill] sm:$0xff] }
 0x1b8   : > { %7464 = vst [vmem:[#allocation67_spill] sm:$0xff] %v7463_v53  ;;  %vm7472_vm11 = vcmp.ge.s32.totalorder %v3533_v62, %v7391_v16  ;;  %v7473_v39 = vmov 0  ;;  %vm7476_vm5 = vcmp.gt.f32.partialorder %v7367_v41, 1000000.0  ;;  %vm7477_vm15 = vcmp.gt.f32.partialorder %v7390_v10, 1000000.0  ;;  %2006 = vmax.xlane.f32.xlu0 %v2005_v33 }
 0x1b9   : > { %vm5095_vm1 = vmand %vm7472_vm11, %vm7471_vm4  ;;  %v1405_v7 = vsel %vm7476_vm5, %v4766_v61, %v4786_v8  ;;  %v1406_v45 = vsel %vm7477_vm15, %v1278_v54, %v1342_v42  ;;  %v5109_v27 = vsel %vm5066_vm7, %v1372_v63, -3e+38  ;;  %vm7481_vm0 = vcmp.lt.s32.totalorder %v3533_v62, %v4981_v6  ;;  %v7486_v10 = vld [vmem:[#allocation69_spill] sm:$0xff]  ;;  %v5128_v42 = vpop.permute.xlu0 %1733 }
 0x1ba   : > { %v7474_v39 = vsel %vm5095_vm1, 4294967295, %v7473_v39  ;;  %7478 = vst [vmem:[#allocation19_spill] sm:$0xff] %v5109_v27  ;;  %vm7482_vm5 = vcmp.ge.s32.totalorder %v3533_v62, %v7402_v47  ;;  %v7483_v61 = vmov 0  ;;  %v1248_v41 = vmul.f32 1000000.0, %v7486_v10 }
 0x1bb   : > { %7475 = vst [vmem:[#allocation11_spill] sm:$0xff] %v7474_v39  ;;  %vm5120_vm15 = vmand %vm7482_vm5, %vm7481_vm0  ;;  %v1312_v8 = vmul.f32 %v7438_v46, %v7486_v10  ;;  %v1281_v54 = vmul.f32 1000000.0, %v4843_v9  ;;  %vm7487_vm11 = vcmp.gt.f32.partialorder %v7401_v0, 1000000.0  ;;  %vm7488_vm5 = vcmp.lt.s32.totalorder %v3529_v34, %v7397_v12  ;;  %v5148_v10 = vpop.f32.mrf.mxu1  ;;  %v5150_v0 = vpop.f32.mrf.mxu0 }
 0x1bc   : > { %v7484_v61 = vsel %vm5120_vm15, 4294967295, %v7483_v61  ;;  %v1374_v36 = vsel %vm7487_vm11, %v4902_v50, %v4920_v32  ;;  %vm7489_vm4 = vcmp.ge.s32.totalorder %v3529_v34, %v7413_v43  ;;  %v7490_v63 = vmov 0 }
 0x1bd   : > { %7485 = vst [vmem:[#allocation96_spill] sm:$0xff] %v7484_v61  ;;  %vm5142_vm3 = vmand %vm7489_vm4, %vm7488_vm5  ;;  %v1345_v33 = vmul.f32 %v7449_v35, %v4843_v9  ;;  %v2008_v50 = vmax.f32 %v5000_v11, %v5018_v19  ;;  %v5156_v32 = vsel %vm5039_vm13, %v1371_v56, -3e+38  ;;  %vm7493_vm11 = vcmp.gt.f32.partialorder %v7398_v13, 1000000.0  ;;  %v7509_v61 = vld [vmem:[#allocation54_spill] sm:$0xff] }
 0x1be   : > { %v7491_v63 = vsel %vm5142_vm3, 4294967295, %v7490_v63  ;;  %v1373_v53 = vsel %vm7493_vm11, %v4840_v58, %v4867_v40  ;;  %v5167_v9 = vsel %vm5095_vm1, %v1407_v44, -3e+38  ;;  %vm7495_vm0 = vcmp.lt.s32.totalorder %v3529_v34, %v4981_v6  ;;  %v7500_v44 = vld [vmem:[#allocation55_spill] sm:$0xff]  ;;  %v7506_v6 = vld [vmem:[#allocation72_spill] sm:$0xff] }
 0x1bf   : > { %7492 = vst [vmem:[#allocation37_spill] sm:$0xff] %v7491_v63  ;;  %vm7496_vm7 = vcmp.ge.s32.totalorder %v3529_v34, %v7402_v47  ;;  %v7497_v56 = vmov 0  ;;  %v1280_v40 = vmul.f32 1000000.0, %v4738_v49  ;;  %v1963_v13 = vmax.f32 %v5156_v32, %v5109_v27  ;;  %2009 = vmax.xlane.f32.xlu1 %v2008_v50  ;;  %v7510_v27 = vld [vmem:[#allocation12_spill] sm:$0xff]  ;;  %v806_v50 = vpop.f32.mrf.mxu0 }
 0x1c0   : > { %vm5175_vm13 = vmand %vm7496_vm7, %vm7495_vm0  ;;  %v5184_v58 = vsel %vm5142_vm3, %v1374_v36, -3e+38  ;;  %vm7501_vm4 = vcmp.lt.s32.totalorder %v3533_v62, %v7397_v12  ;;  %vm7502_vm7 = vcmp.ge.s32.totalorder %v3533_v62, %v7413_v43  ;;  %v7503_v47 = vmov 0 }
 0x1c1   : > { %v7498_v56 = vsel %vm5175_vm13, 4294967295, %v7497_v56  ;;  %vm5193_vm0 = vmand %vm7502_vm7, %vm7501_vm4  ;;  %v5201_v39 = vsel %vm5120_vm15, %v1405_v7, -3e+38  ;;  %v1344_v36 = vmul.f32 %v7470_v51, %v4738_v49  ;;  %v1250_v63 = vmul.f32 1000000.0, %v4845_v14  ;;  %1964 = vmax.xlane.f32.xlu0 %v1963_v13 }
 0x1c2   : > { %7499 = vst [vmem:[#allocation64_spill] sm:$0xff] %v7498_v56  ;;  %v7504_v47 = vsel %vm5193_vm0, 4294967295, %v7503_v47  ;;  %7507 = vst [vmem:[#allocation50_spill] sm:$0xff] %v5201_v39  ;;  %v1314_v12 = vmul.f32 %v7458_v2, %v4845_v14  ;;  %v1249_v43 = vmul.f32 1000000.0, %v4740_v26  ;;  %vm7511_vm1 = vcmp.lt.s32.totalorder %v3533_v62, %v7436_v30 }
 0x1c3   : > { %7505 = vst [vmem:[#allocation62_spill] sm:$0xff] %v7504_v47  ;;  %v5215_v7 = vsel %vm5193_vm0, %v1373_v53, -3e+38  ;;  %vm7508_vm7 = vcmp.gt.f32.partialorder %v7438_v46, 1000000.0  ;;  %vm7512_vm15 = vcmp.ge.s32.totalorder %v3533_v62, %v7450_v23  ;;  %v7513_v14 = vmov 0 }
 0x1c4   : > { %v1376_v49 = vsel %vm7508_vm7, %v1248_v41, %v1312_v8  ;;  %vm5228_vm4 = vmand %vm7512_vm15, %vm7511_vm1  ;;  %v5236_v46 = vsel %vm5175_vm13, %v1406_v45, -3e+38  ;;  %v1313_v53 = vmul.f32 %v7479_v38, %v4740_v26  ;;  %vm7517_vm7 = vcmp.gt.f32.partialorder %v7449_v35, 1000000.0  ;;  %v5242_v8 = vpop.f32.mrf.mxu1  ;;  %v7518_v47 = vld [vmem:[#allocation60_spill] sm:$0xff] }
 0x1c5   : > { %v7514_v14 = vsel %vm5228_vm4, 4294967295, %v7513_v14  ;;  %7516 = vst [vmem:[#allocation21_spill] sm:$0xff] %v5236_v46  ;;  %v1409_v41 = vsel %vm7517_vm7, %v1281_v54, %v1345_v33  ;;  %v1966_v13 = vmax.f32 %v5215_v7, %v5184_v58  ;;  %vm7519_vm15 = vcmp.lt.s32.totalorder %v3529_v34, %v7436_v30  ;;  %v7524_v26 = vld [vmem:[#allocation92_spill] sm:$0xff]  ;;  %v7526_v30 = vld [vmem:[#allocation81_spill] sm:$0xff] }
 0x1c6   : > { %7515 = vst [vmem:[#allocation41_spill] sm:$0xff] %v7514_v14  ;;  %vm7520_vm3 = vcmp.ge.s32.totalorder %v3529_v34, %v7450_v23  ;;  %v7521_v45 = vmov 0  ;;  %v1282_v35 = vmul.f32 1000000.0, %v4946_v20  ;;  %v2011_v54 = vmax.f32 %v4891_v25, %v4976_v29  ;;  %v7534_v29 = vld [vmem:[#allocation59_spill] sm:$0xff] }
 0x1c7   : > { %vm5253_vm5 = vmand %vm7520_vm3, %vm7519_vm15  ;;  %vm7525_vm1 = vcmp.gt.f32.partialorder %v7451_v55, 1000000.0  ;;  %vm7527_vm11 = vcmp.lt.s32.totalorder %v3533_v62, %v5128_v42  ;;  %vm7528_vm13 = vcmp.ge.s32.totalorder %v3533_v62, %v7459_v5  ;;  %v7529_v33 = vmov 0  ;;  %1967 = vmax.xlane.f32.xlu1 %v1966_v13  ;;  %v7535_v25 = vld [vmem:[#allocation15_spill] sm:$0xff] }
 0x1c8   : > { %v7522_v45 = vsel %vm5253_vm5, 4294967295, %v7521_v45  ;;  %v1375_v23 = vsel %vm7525_vm1, %v5003_v22, %v5045_v24  ;;  %vm5279_vm0 = vmand %vm7528_vm13, %vm7527_vm11  ;;  %v1346_v22 = vmul.f32 %v7494_v37, %v4946_v20  ;;  %v5286_v55 = vmul.f32 1000000.0, %v5051_v1  ;;  %2012 = vmax.xlane.f32.xlu0 %v2011_v54 }
 0x1c9   : > { %7523 = vst [vmem:[#allocation46_spill] sm:$0xff] %v7522_v45  ;;  %v7530_v33 = vsel %vm5279_vm0, 4294967295, %v7529_v33  ;;  %v5290_v24 = vsel %vm5253_vm5, %v1376_v49, -3e+38  ;;  %vm7533_vm1 = vcmp.gt.f32.partialorder %v7458_v2, 1000000.0  ;;  %vm7536_vm3 = vcmp.lt.s32.totalorder %v3529_v34, %v4923_v28 }
 0x1ca   : > { %7531 = vst [vmem:[#allocation82_spill] sm:$0xff] %v7530_v33  ;;  %7532 = vst [vmem:[#allocation10_spill] sm:$0xff] %v5290_v24  ;;  %v1378_v56 = vsel %vm7533_vm1, %v1250_v63, %v1314_v12  ;;  %vm7537_vm15 = vcmp.ge.s32.totalorder %v3529_v34, %v7391_v16  ;;  %v7538_v20 = vmov 0  ;;  %v7541_v2 = vld [vmem:[#allocation80_spill] sm:$0xff]  ;;  %v1252_v12 = vmul.f32 1000000.0, %v5053_v59 }
 0x1cb   : > { %vm5305_vm14 = vmand %vm7537_vm15, %vm7536_vm3  ;;  %v5311_v63 = vmul.f32 %v7541_v2, %v5051_v1  ;;  %v1316_v49 = vmul.f32 %v7500_v44, %v5053_v59  ;;  %vm7542_vm1 = vcmp.gt.f32.partialorder %v7470_v51, 1000000.0  ;;  %v7543_v16 = vld [vmem:[#allocation25_spill] sm:$0xff]  ;;  %vm7544_vm15 = vcmp.lt.s32.totalorder %v3529_v34, %v7465_v21  ;;  %v886_v59 = vpop.f32.mrf.mxu1  ;;  %v7551_v45 = vld [vmem:[#allocation87_spill] sm:$0xff] }
 0x1cc   : > { %v7539_v20 = vsel %vm5305_vm14, 4294967295, %v7538_v20  ;;  %v1408_v28 = vsel %vm7542_vm1, %v1280_v40, %v1344_v36  ;;  %vm7545_vm7 = vcmp.ge.s32.totalorder %v3529_v34, %v7480_v48  ;;  %v7546_v1 = vmov 0  ;;  %v808_v40 = vpop.f32.mrf.mxu0  ;;  %v7562_v33 = vld [vmem:[#allocation61_spill] sm:$0xff] }
 0x1cd   : > { %7540 = vst [vmem:[#allocation49_spill] sm:$0xff] %v7539_v20  ;;  %vm5327_vm13 = vmand %vm7545_vm7, %vm7544_vm15  ;;  %v1251_v51 = vmul.f32 1000000.0, %v4948_v15  ;;  %v2014_v36 = vmax.f32 %v5201_v39, %v5236_v46  ;;  %v5338_v13 = vsel %vm5228_vm4, %v1375_v23, -3e+38  ;;  %vm7552_vm5 = vcmp.lt.s32.totalorder %v3533_v62, %v7465_v21 }
 0x1ce   : > { %v7547_v1 = vsel %vm5327_vm13, 4294967295, %v7546_v1  ;;  %7549 = vst [vmem:[#allocation26_spill] sm:$0xff] %v5338_v13  ;;  %vm7550_vm1 = vcmp.gt.f32.partialorder %v7479_v38, 1000000.0  ;;  %vm7553_vm11 = vcmp.ge.s32.totalorder %v3533_v62, %v7480_v48  ;;  %v7554_v46 = vmov 0  ;;  %v810_v20 = vpop.f32.mrf.mxu0 }
 0x1cf   : > { %7548 = vst [vmem:[#allocation57_spill] sm:$0xff] %v7547_v1  ;;  %v1377_v54 = vsel %vm7550_vm1, %v1249_v43, %v1313_v53  ;;  %vm5351_vm3 = vmand %vm7553_vm11, %vm7552_vm5  ;;  %v5357_v23 = vsel %vm5279_vm0, %v1409_v41, -3e+38  ;;  %v1315_v38 = vmul.f32 %v7509_v61, %v4948_v15  ;;  %v5361_v43 = vpop.permute.xlu0 %1739  ;;  %v1969_v53 = vmax.f32 %v5338_v13, %v5290_v24  ;;  %2015 = vmax.xlane.f32.xlu1 %v2014_v36  ;;  %v7564_v1 = vld [vmem:[#allocation86_spill] sm:$0xff] }
 0x1d0   : > { %v7555_v46 = vsel %vm5351_vm3, 4294967295, %v7554_v46  ;;  %v5367_v21 = vsel %vm5327_vm13, %v1378_v56, -3e+38  ;;  %vm7558_vm11 = vcmp.lt.s32.totalorder %v3529_v34, %v5128_v42  ;;  %vm7559_vm1 = vcmp.ge.s32.totalorder %v3529_v34, %v7459_v5  ;;  %v7565_v5 = vld [vmem:[#allocation28_spill] sm:$0xff] }
 0x1d1   : > { %7556 = vst [vmem:[#allocation78_spill] sm:$0xff] %v7555_v46  ;;  %7557 = vst [vmem:[#allocation44_spill] sm:$0xff] %v5367_v21  ;;  %v7560_v15 = vmov 0  ;;  %v1254_v48 = vmul.f32 1000000.0, %v806_v50  ;;  %v1318_v41 = vmul.f32 %v7518_v47, %v806_v50  ;;  %v1348_v50 = vmul.f32 %v7526_v30, %v5148_v10  ;;  %1970 = vmax.xlane.f32.xlu0 %v1969_v53  ;;  %v888_v53 = vpop.f32.mrf.mxu1 }
 0x1d2   : > { %vm5377_vm7 = vmand %vm7559_vm1, %vm7558_vm11  ;;  %v5385_v56 = vsel %vm5305_vm14, %v1408_v28, -3e+38  ;;  %vm7563_vm5 = vcmp.gt.f32.partialorder %v7494_v37, 1000000.0  ;;  %v1284_v14 = vmul.f32 1000000.0, %v5148_v10  ;;  %vm7572_vm11 = vcmp.ge.s32.totalorder %v3529_v34, %v7510_v27 }
 0x1d3   : > { %v7561_v15 = vsel %vm5377_vm7, 4294967295, %v7560_v15  ;;  %v1410_v42 = vsel %vm7563_vm5, %v1282_v35, %v1346_v22  ;;  %v5397_v36 = vsel %vm5351_vm3, %v1377_v54, -3e+38  ;;  %vm7567_vm1 = vcmp.gt.f32.partialorder %v7500_v44, 1000000.0  ;;  %v7568_v37 = vld [vmem:[#allocation58_spill] sm:$0xff] }
 0x1d4   : > { %7566 = vst [vmem:[#allocation68_spill] sm:$0xff] %v5397_v36  ;;  %v1380_v28 = vsel %vm7567_vm1, %v1252_v12, %v1316_v49  ;;  %v7569_v35 = vld [vmem:[#allocation14_spill] sm:$0xff]  ;;  %v1253_v10 = vmul.f32 1000000.0, %v5150_v0  ;;  %v1317_v54 = vmul.f32 %v7534_v29, %v5150_v0  ;;  %v1972_v44 = vmax.f32 %v5397_v36, %v5367_v21 }
 0x1d5   : > { %v7570_v22 = vld [vmem:[#allocation90_spill] sm:$0xff]  ;;  %vm7571_vm5 = vcmp.lt.s32.totalorder %v3529_v34, %v7506_v6  ;;  %v7573_v12 = vmov 0  ;;  %v1285_v0 = vmul.f32 1000000.0, %v5242_v8  ;;  %v2017_v49 = vmax.f32 %v5167_v9, %v5385_v56 }
 0x1d6   : > { %vm5421_vm0 = vmand %vm7572_vm11, %vm7571_vm5  ;;  %v5430_v46 = vsel %vm5377_vm7, %v1410_v42, -3e+38  ;;  %vm7575_vm1 = vcmp.gt.f32.partialorder %v7509_v61, 1000000.0  ;;  %v1286_v36 = vmul.f32 1000000.0, %v886_v59  ;;  %v1350_v24 = vmul.f32 %v7551_v45, %v886_v59  ;;  %1973 = vmax.xlane.f32.xlu1 %v1972_v44 }
 0x1d7   : > { %v7574_v12 = vsel %vm5421_vm0, 4294967295, %v7573_v12  ;;  %v1379_v21 = vsel %vm7575_vm1, %v1251_v51, %v1315_v38  ;;  %v5437_v13 = vsel %vm5421_vm0, %v1380_v28, -3e+38  ;;  %vm7576_vm11 = vcmp.gt.f32.partialorder %v7518_v47, 1000000.0  ;;  %2018 = vmax.xlane.f32.xlu0 %v2017_v49 }
 0x1d8   : > { %v1382_v39 = vsel %vm7576_vm11, %v1254_v48, %v1318_v41  ;;  %vm7577_vm5 = vcmp.lt.s32.totalorder %v3533_v62, %v7506_v6  ;;  %vm7578_vm15 = vcmp.ge.s32.totalorder %v3533_v62, %v7510_v27  ;;  %v7579_v61 = vmov 0  ;;  %v890_v48 = vpop.f32.mrf.mxu1 }
 0x1d9   : > { %vm5447_vm7 = vmand %vm7578_vm15, %vm7577_vm5  ;;  %v1349_v51 = vmul.f32 %v7564_v1, %v5242_v8  ;;  %v1256_v59 = vmul.f32 1000000.0, %v810_v20  ;;  %v1320_v38 = vmul.f32 %v7562_v33, %v810_v20  ;;  %vm7581_vm1 = vcmp.gt.f32.partialorder %v7526_v30, 1000000.0 }
 0x1da   : > { %v7580_v61 = vsel %vm5447_vm7, 4294967295, %v7579_v61  ;;  %v1412_v47 = vsel %vm7581_vm1, %v1284_v14, %v1348_v50  ;;  %vm7582_vm11 = vcmp.lt.s32.totalorder %v3529_v34, %v7524_v26  ;;  %vm7583_vm0 = vcmp.ge.s32.totalorder %v3529_v34, %v7535_v25  ;;  %v7602_v50 = vld [vmem:[#allocation89_spill] sm:$0xff] }
 0x1db   : > { %vm5462_vm15 = vmand %vm7583_vm0, %vm7582_vm11  ;;  %v7584_v27 = vmov 0  ;;  %v1255_v6 = vmul.f32 1000000.0, %v808_v40  ;;  %v2020_v8 = vmax.f32 %v5357_v23, %v5430_v46  ;;  %v5470_v20 = vsel %vm5447_vm7, %v1379_v21, -3e+38 }
 0x1dc   : > { %v7585_v27 = vsel %vm5462_vm15, 4294967295, %v7584_v27  ;;  %vm7586_vm5 = vcmp.gt.f32.partialorder %v7534_v29, 1000000.0  ;;  %vm7587_vm1 = vcmp.lt.s32.totalorder %v3529_v34, %v5209_v31  ;;  %vm7588_vm0 = vcmp.ge.s32.totalorder %v3529_v34, %v7543_v16 }
 0x1dd   : > { %v1381_v14 = vsel %vm7586_vm5, %v1253_v10, %v1317_v54  ;;  %vm5480_vm11 = vmand %vm7588_vm0, %vm7587_vm1  ;;  %v7589_v30 = vmov 0  ;;  %v1319_v41 = vmul.f32 %v7568_v37, %v808_v40  ;;  %v1975_v42 = vmax.f32 %v5470_v20, %v5437_v13  ;;  %2021 = vmax.xlane.f32.xlu1 %v2020_v8  ;;  %v7612_v54 = vld [vmem:[#allocation85_spill] sm:$0xff] }
 0x1de   : > { %v7590_v30 = vsel %vm5480_vm11, 4294967295, %v7589_v30  ;;  %vm7591_vm7 = vcmp.gt.f32.partialorder %v7541_v2, 1000000.0  ;;  %v5493_v21 = vsel %vm5462_vm15, %v1382_v39, -3e+38  ;;  %vm7592_vm1 = vcmp.lt.s32.totalorder %v3533_v62, %v7524_v26  ;;  %v1743_v26 = vpop.permute.xlu1 %1742 }
 0x1df   : > { %v1411_v29 = vsel %vm7591_vm7, %v5286_v55, %v5311_v63  ;;  %vm7593_vm0 = vcmp.ge.s32.totalorder %v3533_v62, %v7535_v25  ;;  %v7594_v40 = vmov 0  ;;  %v5511_v39 = vsel %vm5480_vm11, %v1412_v47, -3e+38  ;;  %1976 = vmax.xlane.f32.xlu0 %v1975_v42  ;;  %v5630_v42 = vld [vmem:[#allocation2] sm:$0xff] }
 0x1e0   : > { %vm5503_vm14 = vmand %vm7593_vm0, %vm7592_vm1  ;;  %vm7596_vm5 = vcmp.gt.f32.partialorder %v7551_v45, 1000000.0  ;;  %vm7597_vm15 = vcmp.lt.s32.totalorder %v3533_v62, %v5209_v31  ;;  %vm7598_vm1 = vcmp.ge.s32.totalorder %v3533_v62, %v7543_v16  ;;  %v7599_v25 = vmov 0 }
 0x1e1   : > { %v7595_v40 = vsel %vm5503_vm14, 4294967295, %v7594_v40  ;;  %v1414_v55 = vsel %vm7596_vm5, %v1286_v36, %v1350_v24  ;;  %vm5521_vm0 = vmand %vm7598_vm1, %vm7597_vm15  ;;  %vm7601_vm7 = vcmp.gt.f32.partialorder %v7562_v33, 1000000.0  ;;  %v1288_v63 = vmul.f32 1000000.0, %v890_v48 }
 0x1e2   : > { %v7600_v25 = vsel %vm5521_vm0, 4294967295, %v7599_v25  ;;  %v1384_v2 = vsel %vm7601_vm7, %v1256_v59, %v1320_v38  ;;  %v1352_v28 = vmul.f32 %v7602_v50, %v890_v48  ;;  %v5530_v45 = vsel %vm5503_vm14, %v1381_v14, -3e+38 }
 0x1e3   : > { %vm7603_vm5 = vcmp.lt.s32.totalorder %v3529_v34, %v5361_v43  ;;  %vm7604_vm15 = vcmp.ge.s32.totalorder %v3529_v34, %v7565_v5  ;;  %v7605_v31 = vmov 0  ;;  %v1287_v33 = vmul.f32 1000000.0, %v888_v53 }
 0x1e4   : > { %vm5538_vm1 = vmand %vm7604_vm15, %vm7603_vm5  ;;  %v5544_v24 = vsel %vm5521_vm0, %v1411_v29, -3e+38  ;;  %v1978_v16 = vmax.f32 %v5530_v45, %v5493_v21  ;;  %vm7607_vm7 = vcmp.gt.f32.partialorder %v7564_v1, 1000000.0  ;;  %vm7608_vm11 = vcmp.lt.s32.totalorder %v3529_v34, %v7570_v22 }
 0x1e5   : > { %v7606_v31 = vsel %vm5538_vm1, 4294967295, %v7605_v31  ;;  %v1413_v36 = vsel %vm7607_vm7, %v1285_v0, %v1349_v51  ;;  %vm7609_vm5 = vcmp.ge.s32.totalorder %v3529_v34, %v7569_v35  ;;  %v1351_v44 = vmul.f32 %v7612_v54, %v888_v53  ;;  %v7621_v0 = vld [vmem:[#allocation27_spill] sm:$0xff] }
 0x1e6   : > { %vm5556_vm15 = vmand %vm7609_vm5, %vm7608_vm11  ;;  %v2023_v49 = vmax.f32 %v5544_v24, %v5511_v39  ;;  %v5565_v59 = vsel %vm5538_vm1, %v1414_v55, -3e+38  ;;  %vm7613_vm7 = vcmp.gt.f32.partialorder %v7568_v37, 1000000.0  ;;  %vm1582_vm0 = vcmp.ge.s32.totalorder %v3533_v62, %v7569_v35  ;;  %1979 = vmax.xlane.f32.xlu1 %v1978_v16  ;;  %v5635_v55 = vpop.xlane.xlu0 %1937  ;;  %v6472_v53 = vld [vmem:[#allocation2 + $0xf8] sm:$0xff] }
 0x1e7   : > { %v1383_v1 = vsel %vm7613_vm7, %v1255_v6, %v1319_v41  ;;  %vm1807_vm11 = vcmp.lt.s32.totalorder %v3529_v34, %v1743_v26  ;;  %vm7614_vm5 = vcmp.lt.s32.totalorder %v3533_v62, %v5361_v43  ;;  %vm7615_vm14 = vcmp.ge.s32.totalorder %v3533_v62, %v7565_v5 }
 0x1e8   : > { %vm5578_vm13 = vmand %vm7615_vm14, %vm7614_vm5  ;;  %vm1224_vm1 = vcmp.gt.f32.partialorder %v7602_v50, 1000000.0  ;;  %v5585_v37 = vsel %vm5556_vm15, %v1384_v2, -3e+38  ;;  %vm1223_vm7 = vcmp.gt.f32.partialorder %v7612_v54, 1000000.0  ;;  %vm7618_vm3 = vcmp.lt.s32.totalorder %v3533_v62, %v7570_v22  ;;  %2024 = vmax.xlane.f32.xlu0 %v2023_v49 }
 0x1e9   : > { %vm5591_vm4 = vmand %vm1582_vm0, %vm7618_vm3  ;;  %v1416_v5 = vsel %vm1224_vm1, %v1288_v63, %v1352_v28  ;;  %v5597_v35 = vsel %vm5578_vm13, %v1413_v36, -3e+38  ;;  %vm1615_vm14 = vcmp.ge.s32.totalorder %v3529_v34, %v7621_v0  ;;  %vm1806_vm5 = vcmp.lt.s32.totalorder %v3533_v62, %v1743_v26  ;;  %v7626_v2 = vld [vmem:[#allocation40_spill] sm:$0xff]  ;;  %v7627_v63 = vld [vmem:[#allocation33_spill] sm:$0xff] }
 0x1ea   : > { %v2026_v51 = vmax.f32 %v5597_v35, %v5565_v59  ;;  %v5606_v22 = vsel %vm5591_vm4, %v1383_v1, -3e+38  ;;  %vm5608_vm3 = vmand %vm1615_vm14, %vm1807_vm11  ;;  %v7622_v38 = vmov 0  ;;  %v1415_v6 = vsel %vm1223_vm7, %v1287_v33, %v1351_v44  ;;  %v5658_v36 = vld [vmem:[#allocation2 + $0x88] sm:$0xff]  ;;  %v5660_v54 = vld [vmem:[#allocation2 + $0x80] sm:$0xff] }
 0x1eb   : > { %v7623_v38 = vsel %vm5608_vm3, 4294967295, %v7622_v38  ;;  %v1981_v47 = vmax.f32 %v5606_v22, %v5585_v37  ;;  %vm1614_vm0 = vcmp.ge.s32.totalorder %v3533_v62, %v7621_v0  ;;  %v5618_v48 = vsel %vm5608_vm3, %v1416_v5, -3e+38  ;;  %7631 = vst [vmem:[#allocation75_spill] sm:$0xff] %v5658_v36  ;;  %v7633_v1 = vld [vmem:[#allocation101_spill] sm:$0xff]  ;;  %v7634_v5 = vld [vmem:[#allocation106_spill] sm:$0xff] }
 0x1ec   : > { %2027 = vmax.xlane.f32.xlu1 %v2026_v51  ;;  %vm5620_vm1 = vmand %vm1614_vm0, %vm1806_vm5  ;;  %v7624_v8 = vmov 0  ;;  %v5633_v29 = vcvt.s32.f32 %v3533_v62  ;;  %v5638_v26 = vcvt.s32.f32 %v3529_v34  ;;  %vm2034_vm7 = vcmp.ge.f32.partialorder %v7626_v2, %v5635_v55  ;;  %v7635_v0 = vld [vmem:[#allocation107_spill] sm:$0xff]  ;;  %v5695_v50 = vld [vmem:[#allocation2 + $0x10] sm:$0xff] }
 0x1ed   : > { %v7625_v8 = vsel %vm5620_vm1, 4294967295, %v7624_v8  ;;  %1982 = vmax.xlane.f32.xlu0 %v1981_v47  ;;  %v5626_v14 = vsel %vm5620_vm1, %v1415_v6, -3e+38  ;;  %vm2035_vm14 = vcmp.ge.f32.partialorder %v7627_v63, %v5635_v55  ;;  %vm6971_vm5 = vcmp.gt.f32.partialorder %v5635_v55, %v5630_v42  ;;  %vm2098_vm0 = vmand %vm3597_vm8, %vm2034_vm7  ;;  %v7636_v47 = vld [vmem:[#allocation102_spill] sm:$0xff]  ;;  %7641 = vst [vmem:[#allocation13_spill] sm:$0xff] %v5695_v50  ;;  %v7648_v6 = vld [vmem:[#allocation100_spill] sm:$0xff] }
 0x1ee   : > { %v2029_v41 = vmax.f32 %v5626_v14, %v5618_v48  ;;  %v2386_v34 = vsel %vm6971_vm5, %v5635_v55, %v5630_v42  ;;  %vm2099_vm11 = vmand %vm3555_vm6, %vm2035_vm14  ;;  %v2162_v28 = vsel %vm2098_vm0, %v5633_v29, 1.0737418e+09  ;;  %vm7630_vm3 = vcmask 7168   ;;  %v7653_v2 = vld [vmem:[#allocation79_spill] sm:$0xff] }
 0x1ef   : > { %2419 = vst.msk [vmem:[#allocation2] sm:$0xff] %vm7630_vm3, %v2386_v34  ;;  %v2163_v33 = vsel %vm2099_vm11, %v5638_v26, 1.0737418e+09  ;;  %vm7638_vm5 = vcmask 7168   ;;  %vm7663_vm1 = vcmask 7168  }
 0x1f0   : > { %v2226_v16 = vmin.f32 %v2162_v28, %v2163_v33  ;;  %v7654_v28 = vld [vmem:[#allocation30_spill] sm:$0xff] }
 0x1f1   : > { %2030 = vmax.xlane.f32.xlu0 %v2029_v41  ;;  %v7676_v33 = vld [vmem:[#allocation42_spill] sm:$0xff] }
 0x1f2   : > { %2227 = vmin.xlane.f32.xlu1 %v2226_v16  ;;  %v5709_v16 = vld [vmem:[#allocation2 + $0x8] sm:$0xff] }
 0x1f3   : > { %7646 = vst [vmem:[#allocation69_spill] sm:$0xff] %v5709_v16 }
 0x1f5   : > { %v5662_v44 = vpop.xlane.xlu0 %1988 }
 0x1f6   : > { %7632 = vst [vmem:[#allocation56_spill] sm:$0xff] %v5662_v44  ;;  %vm6972_vm6 = vcmp.gt.f32.partialorder %v5662_v44, %v5658_v36  ;;  %vm2069_vm14 = vcmp.ge.f32.partialorder %v7636_v47, %v5662_v44  ;;  %v7659_v47 = vld [vmem:[#allocation111_spill] sm:$0xff] }
 0x1f7   : > { %v2403_v51 = vsel %vm6972_vm6, %v5662_v44, %v5658_v36  ;;  %vm7640_vm6 = vmmov %vm7638_vm5 }
 0x1f8   : > { %v5664_v49 = vpop.xlane.xlu1 %1985  ;;  %2436 = vst.msk [vmem:[#allocation2 + $0x88] sm:$0xff] %vm7638_vm5, %v2403_v51  ;;  %vm7649_vm5 = vnez %v7648_v6  ;;  %v7661_v6 = vld [vmem:[#allocation109_spill] sm:$0xff] }
 0x1f9   : > { %vm2066_vm3 = vcmp.ge.f32.partialorder %v7634_v5, %v5664_v49  ;;  %vm2067_vm11 = vcmp.ge.f32.partialorder %v7635_v0, %v5664_v49  ;;  %vm6973_vm7 = vcmp.gt.f32.partialorder %v5664_v49, %v5660_v54  ;;  %v7647_v5 = vld [vmem:[#allocation112_spill] sm:$0xff] }
 0x1fa   : > { %vm2130_vm0 = vmand %vm3999_vm9, %vm2066_vm3  ;;  %v2402_v41 = vsel %vm6973_vm7, %v5664_v49, %v5660_v54  ;;  %vm7642_vm9 = vcmp.ge.f32.partialorder %v7633_v1, %v5662_v44  ;;  %v7668_v44 = vld [vmem:[#allocation73_spill] sm:$0xff] }
 0x1fb   : > { %vm2131_vm8 = vmand %vm4019_vm12, %vm2067_vm11  ;;  %v2194_v63 = vsel %vm2130_vm0, %v5633_v29, 1.0737418e+09  ;;  %2435 = vst.msk [vmem:[#allocation2 + $0x80] sm:$0xff] %vm7640_vm6, %v2402_v41  ;;  %v7652_v41 = vld [vmem:[#allocation110_spill] sm:$0xff]  ;;  %v7677_v1 = vld [vmem:[#allocation29_spill] sm:$0xff] }
 0x1fc   : > { %v2195_v62 = vsel %vm2131_vm8, %v5638_v26, 1.0737418e+09  ;;  %vm5705_vm3 = vmand %vm3956_vm2, %vm7642_vm9 }
 0x1fd   : > { %v2274_v51 = vmin.f32 %v2194_v63, %v2195_v62  ;;  %vm5720_vm8 = vmand %vm7649_vm5, %vm2069_vm14  ;;  %vm7660_vm5 = vnez %v7659_v47 }
 0x1ff   : > { %v5697_v34 = vpop.xlane.xlu1 %1940  ;;  %2275 = vmin.xlane.f32.xlu1 %v2274_v51 }
 0x200   : > { %vm2036_vm12 = vcmp.ge.f32.partialorder %v7647_v5, %v5697_v34  ;;  %v7655_v5 = vld [vmem:[#allocation105_spill] sm:$0xff]  ;;  %vm6993_vm2 = vcmp.gt.f32.partialorder %v5697_v34, %v5709_v16 }
 0x201   : > { %v5713_v0 = vpop.xlane.xlu0 %1943  ;;  %vm7656_vm0 = vnez %v7655_v5  ;;  %v5759_v5 = vld [vmem:[#allocation2 + $0x90] sm:$0xff] }
 0x202   : > { %vm2038_vm6 = vcmp.ge.f32.partialorder %v7653_v2, %v5713_v0  ;;  %vm2039_vm11 = vcmp.ge.f32.partialorder %v7654_v28, %v5713_v0  ;;  %vm5732_vm9 = vmand %vm7656_vm0, %vm2036_vm12  ;;  %vm2356_vm14 = vcmp.gt.f32.partialorder %v5713_v0, %v5695_v50  ;;  %vm7662_vm12 = vnez %v7661_v6  ;;  %v7665_v6 = vld [vmem:[#allocation108_spill] sm:$0xff] }
 0x203   : > { %vm2102_vm7 = vmand %vm7660_vm5, %vm2038_vm6  ;;  %v2388_v62 = vsel %vm2356_vm14, %v5713_v0, %v5695_v50  ;;  %v2164_v51 = vsel %vm5732_vm9, %v5633_v29, 1.0737418e+09  ;;  %v2387_v28 = vsel %vm6993_vm2, %v5697_v34, %v5709_v16  ;;  %vm7664_vm6 = vcmp.ge.f32.partialorder %v7652_v41, %v5697_v34  ;;  %v7669_v16 = vld [vmem:[#allocation38_spill] sm:$0xff]  ;;  %v5777_v41 = vld [vmem:[#allocation2 + $0x18] sm:$0xff] }
 0x204   : > { %vm2103_vm0 = vmand %vm7662_vm12, %vm2039_vm11  ;;  %v2166_v2 = vsel %vm2102_vm7, %v5633_v29, 1.0737418e+09  ;;  %2421 = vst.msk [vmem:[#allocation2 + $0x10] sm:$0xff] %vm7663_vm1, %v2388_v62  ;;  %vm7666_vm7 = vnez %v7665_v6  ;;  %v7671_v6 = vld [vmem:[#allocation16_spill] sm:$0xff]  ;;  %v7884_v0 = vld [vmem:[#allocation75_spill] sm:$0xff] }
 0x205   : > { %v2167_v47 = vsel %vm2103_vm0, %v5638_v26, 1.0737418e+09  ;;  %vm2101_vm11 = vmand %vm7666_vm7, %vm7664_vm6  ;;  %7670 = vst [vmem:[#allocation83_spill] sm:$0xff] %v5777_v41  ;;  %vm7672_vm0 = vnez %v7671_v6  ;;  %v7678_v6 = vld [vmem:[#allocation17_spill] sm:$0xff] }
 0x206   : > { %vm7667_vm5 = vmmov %vm7663_vm1  ;;  %v2232_v62 = vmin.f32 %v2166_v2, %v2167_v47  ;;  %v2165_v36 = vsel %vm2101_vm11, %v5638_v26, 1.0737418e+09  ;;  %v2196_v2 = vsel %vm5705_vm3, %v5633_v29, 1.0737418e+09 }
 0x207   : > { %2420 = vst.msk [vmem:[#allocation2 + $0x8] sm:$0xff] %vm7667_vm5, %v2387_v28  ;;  %v2229_v50 = vmin.f32 %v2164_v51, %v2165_v36  ;;  %v7674_v51 = vld [vmem:[#allocation5_spill] sm:$0xff] }
 0x208   : > { %2233 = vmin.xlane.f32.xlu1 %v2232_v62  ;;  %vm7675_vm7 = vnez %v7674_v51  ;;  %v5812_v51 = vld [vmem:[#allocation2 + $0x98] sm:$0xff] }
 0x209   : > { %v5768_v63 = vpop.xlane.xlu1 %1991  ;;  %2230 = vmin.xlane.f32.xlu0 %v2229_v50  ;;  %7680 = vst [vmem:[#allocation72_spill] sm:$0xff] %v5812_v51 }
 0x20a   : > { %vm2070_vm1 = vcmp.ge.f32.partialorder %v7668_v44, %v5768_v63  ;;  %vm2071_vm9 = vcmp.ge.f32.partialorder %v7669_v16, %v5768_v63  ;;  %vm6983_vm12 = vcmp.gt.f32.partialorder %v5768_v63, %v5759_v5  ;;  %v2197_v44 = vsel %vm5720_vm8, %v5638_v26, 1.0737418e+09 }
 0x20b   : > { %vm2134_vm6 = vmand %vm7672_vm0, %vm2070_vm1  ;;  %v2404_v36 = vsel %vm6983_vm12, %v5768_v63, %v5759_v5  ;;  %v2277_v50 = vmin.f32 %v2196_v2, %v2197_v44  ;;  %vm7679_vm0 = vnez %v7678_v6  ;;  %v5821_v44 = vld [vmem:[#allocation2 + $0x20] sm:$0xff]  ;;  %v7687_v6 = vld [vmem:[#allocation43_spill] sm:$0xff] }
 0x20c   : > { %vm2135_vm11 = vmand %vm7675_vm7, %vm2071_vm9  ;;  %v2198_v28 = vsel %vm2134_vm6, %v5633_v29, 1.0737418e+09  ;;  %2437 = vst.msk [vmem:[#allocation2 + $0x90] sm:$0xff] %vm7667_vm5, %v2404_v36 }
 0x20d   : > { %v2199_v47 = vsel %vm2135_vm11, %v5638_v26, 1.0737418e+09  ;;  %vm7683_vm11 = vmmov %vm7667_vm5  ;;  %2278 = vmin.xlane.f32.xlu0 %v2277_v50  ;;  %7685 = vst [vmem:[#allocation12_spill] sm:$0xff] %v5821_v44 }
 0x20e   : > { %v2280_v62 = vmin.f32 %v2198_v28, %v2199_v47  ;;  %v7686_v47 = vld [vmem:[#allocation4_spill] sm:$0xff] }
 0x20f   : > { %v5792_v16 = vpop.xlane.xlu0 %1946 }
 0x210   : > { %7673 = vst [vmem:[#allocation55_spill] sm:$0xff] %v5792_v16  ;;  %vm2040_vm3 = vcmp.ge.f32.partialorder %v7676_v33, %v5792_v16  ;;  %vm2041_vm8 = vcmp.ge.f32.partialorder %v7677_v1, %v5792_v16  ;;  %vm6981_vm1 = vcmp.gt.f32.partialorder %v5792_v16, %v5777_v41  ;;  %v7681_v33 = vld [vmem:[#allocation84_spill] sm:$0xff]  ;;  %2281 = vmin.xlane.f32.xlu1 %v2280_v62  ;;  %v7701_v62 = vld [vmem:[#allocation66_spill] sm:$0xff] }
 0x211   : > { %vm2104_vm9 = vmand %vm7679_vm0, %vm2040_vm3  ;;  %v2389_v36 = vsel %vm6981_vm1, %v5792_v16, %v5777_v41  ;;  %vm7682_vm6 = vnez %v7681_v33  ;;  %v7689_v41 = vld [vmem:[#allocation18_spill] sm:$0xff]  ;;  %v7695_v16 = vld [vmem:[#allocation35_spill] sm:$0xff] }
 0x212   : > { %vm2105_vm7 = vmand %vm7682_vm6, %vm2041_vm8  ;;  %v2168_v1 = vsel %vm2104_vm9, %v5633_v29, 1.0737418e+09  ;;  %2422 = vst.msk [vmem:[#allocation2 + $0x18] sm:$0xff] %vm7683_vm11, %v2389_v36  ;;  %vm7690_vm0 = vnez %v7689_v41  ;;  %vm7696_vm11 = vnez %v7695_v16 }
 0x213   : > { %v2169_v2 = vsel %vm2105_vm7, %v5638_v26, 1.0737418e+09 }
 0x214   : > { %v2235_v36 = vmin.f32 %v2168_v1, %v2169_v2  ;;  %v7698_v1 = vld [vmem:[#allocation95_spill] sm:$0xff] }
 0x215   : > { %v5818_v28 = vpop.xlane.xlu0 %1994 }
 0x216   : > { %7684 = vst [vmem:[#allocation54_spill] sm:$0xff] %v5818_v28  ;;  %vm2072_vm5 = vcmp.ge.f32.partialorder %v7686_v47, %v5818_v28  ;;  %vm2073_vm3 = vcmp.ge.f32.partialorder %v7687_v6, %v5818_v28  ;;  %vm6982_vm8 = vcmp.gt.f32.partialorder %v5818_v28, %v5812_v51  ;;  %v7693_v47 = vld [vmem:[#allocation70_spill] sm:$0xff]  ;;  %v7694_v6 = vld [vmem:[#allocation113_spill] sm:$0xff]  ;;  %2236 = vmin.xlane.f32.xlu0 %v2235_v36 }
 0x217   : > { %vm5833_vm9 = vmand %vm7690_vm0, %vm2072_vm5  ;;  %v2405_v50 = vsel %vm6982_vm8, %v5818_v28, %v5812_v51  ;;  %vm7697_vm0 = vcmask 7168   ;;  %vm7699_vm8 = vnez %v7698_v1  ;;  %v5871_v51 = vld [vmem:[#allocation2 + $0x28] sm:$0xff]  ;;  %v7744_v28 = vld [vmem:[#allocation63_spill] sm:$0xff] }
 0x218   : > { %vm2137_vm1 = vmand %vm7696_vm11, %vm2073_vm3  ;;  %v2200_v41 = vsel %vm5833_vm9, %v5633_v29, 1.0737418e+09  ;;  %2438 = vst.msk [vmem:[#allocation2 + $0x98] sm:$0xff] %vm7697_vm0, %v2405_v50  ;;  %vm7702_vm3 = vnez %v7701_v62 }
 0x219   : > { %v2201_v2 = vsel %vm2137_vm1, %v5638_v26, 1.0737418e+09  ;;  %vm7703_vm11 = vmmov %vm7697_vm0  ;;  %7705 = vst [vmem:[#allocation59_spill] sm:$0xff] %v5871_v51 }
 0x21a   : > { %v5829_v33 = vpop.xlane.xlu1 %1949  ;;  %v2283_v1 = vmin.f32 %v2200_v41, %v2201_v2  ;;  %v7711_v2 = vld [vmem:[#allocation20_spill] sm:$0xff] }
 0x21b   : > { %7688 = vst [vmem:[#allocation60_spill] sm:$0xff] %v5829_v33  ;;  %vm2042_vm6 = vcmp.ge.f32.partialorder %v7693_v47, %v5829_v33  ;;  %vm2043_vm7 = vcmp.ge.f32.partialorder %v7694_v6, %v5829_v33  ;;  %vm6987_vm5 = vcmp.gt.f32.partialorder %v5829_v33, %v5821_v44  ;;  %v5862_v47 = vld [vmem:[#allocation2 + $0xa0] sm:$0xff] }
 0x21c   : > { %vm2106_vm12 = vmand %vm7699_vm8, %vm2042_vm6  ;;  %v2390_v16 = vsel %vm6987_vm5, %v5829_v33, %v5821_v44  ;;  %7700 = vst [vmem:[#allocation92_spill] sm:$0xff] %v5862_v47  ;;  %2284 = vmin.xlane.f32.xlu0 %v2283_v1  ;;  %v7714_v1 = vld [vmem:[#allocation47_spill] sm:$0xff] }
 0x21d   : > { %vm2107_vm9 = vmand %vm7702_vm3, %vm2043_vm7  ;;  %v2170_v6 = vsel %vm2106_vm12, %v5633_v29, 1.0737418e+09  ;;  %2423 = vst.msk [vmem:[#allocation2 + $0x20] sm:$0xff] %vm7703_vm11, %v2390_v16  ;;  %v7707_v16 = vld [vmem:[#allocation39_spill] sm:$0xff] }
 0x21e   : > { %v2171_v36 = vsel %vm2107_vm9, %v5638_v26, 1.0737418e+09  ;;  %vm7708_vm12 = vnez %v7707_v16  ;;  %vm7712_vm9 = vnez %v7711_v2  ;;  %v5906_v16 = vld [vmem:[#allocation2 + $0xa8] sm:$0xff]  ;;  %v5911_v2 = vld [vmem:[#allocation2 + $0x30] sm:$0xff] }
 0x21f   : > { %v5868_v50 = vpop.xlane.xlu1 %1997  ;;  %v2238_v44 = vmin.f32 %v2170_v6, %v2171_v36  ;;  %7716 = vst [vmem:[#allocation80_spill] sm:$0xff] %v5906_v16  ;;  %7719 = vst [vmem:[#allocation25_spill] sm:$0xff] %v5911_v2 }
 0x220   : > { %7704 = vst [vmem:[#allocation81_spill] sm:$0xff] %v5868_v50  ;;  %vm2074_vm1 = vcmp.ge.f32.partialorder %v4560_v18, %v5868_v50  ;;  %vm2075_vm8 = vcmp.ge.f32.partialorder %v4565_v60, %v5868_v50  ;;  %vm6986_vm6 = vcmp.gt.f32.partialorder %v5868_v50, %v5862_v47  ;;  %v7709_v18 = vld [vmem:[#allocation53_spill] sm:$0xff]  ;;  %v7710_v60 = vld [vmem:[#allocation115_spill] sm:$0xff] }
 0x221   : > { %vm2138_vm7 = vmand %vm7708_vm12, %vm2074_vm1  ;;  %v2406_v41 = vsel %vm6986_vm6, %v5868_v50, %v5862_v47  ;;  %2239 = vmin.xlane.f32.xlu1 %v2238_v44  ;;  %vm7713_vm1 = vcmask 7168   ;;  %vm7715_vm6 = vnez %v7714_v1  ;;  %v7722_v50 = vld [vmem:[#allocation32_spill] sm:$0xff] }
 0x222   : > { %vm2139_vm11 = vmand %vm7712_vm9, %vm2075_vm8  ;;  %v2202_v6 = vsel %vm2138_vm7, %v5633_v29, 1.0737418e+09  ;;  %2439 = vst.msk [vmem:[#allocation2 + $0xa0] sm:$0xff] %vm7713_vm1, %v2406_v41 }
 0x223   : > { %v2203_v36 = vsel %vm2139_vm11, %v5638_v26, 1.0737418e+09  ;;  %vm7720_vm9 = vmmov %vm7713_vm1 }
 0x225   : > { %v5879_v62 = vpop.xlane.xlu0 %1952 }
 0x226   : > { %7706 = vst [vmem:[#allocation15_spill] sm:$0xff] %v5879_v62  ;;  %vm2044_vm0 = vcmp.ge.f32.partialorder %v7709_v18, %v5879_v62  ;;  %vm2045_vm3 = vcmp.ge.f32.partialorder %v7710_v60, %v5879_v62  ;;  %vm6992_vm12 = vcmp.gt.f32.partialorder %v5879_v62, %v5871_v51  ;;  %v2286_v18 = vmin.f32 %v2202_v6, %v2203_v36  ;;  %v7717_v60 = vld [vmem:[#allocation71_spill] sm:$0xff] }
 0x227   : > { %vm2108_vm5 = vmand %vm7715_vm6, %vm2044_vm0  ;;  %v2391_v44 = vsel %vm6992_vm12, %v5879_v62, %v5871_v51  ;;  %vm7718_vm8 = vnez %v7717_v60  ;;  %v7723_v51 = vld [vmem:[#allocation6_spill] sm:$0xff]  ;;  %v7725_v60 = vld [vmem:[#allocation93_spill] sm:$0xff] }
 0x228   : > { %vm2109_vm7 = vmand %vm7718_vm8, %vm2045_vm3  ;;  %v2172_v41 = vsel %vm2108_vm5, %v5633_v29, 1.0737418e+09  ;;  %2424 = vst.msk [vmem:[#allocation2 + $0x28] sm:$0xff] %vm7720_vm9, %v2391_v44  ;;  %2287 = vmin.xlane.f32.xlu1 %v2286_v18  ;;  %v7726_v44 = vld [vmem:[#allocation88_spill] sm:$0xff]  ;;  %v7727_v62 = vld [vmem:[#allocation99_spill] sm:$0xff] }
 0x229   : > { %v2173_v47 = vsel %vm2109_vm7, %v5638_v26, 1.0737418e+09  ;;  %vm7728_vm1 = vnez %v7727_v62  ;;  %v7731_v18 = vld [vmem:[#allocation9_spill] sm:$0xff] }
 0x22a   : > { %v2241_v36 = vmin.f32 %v2172_v41, %v2173_v47  ;;  %vm7732_vm9 = vnez %v7731_v18  ;;  %v5973_v41 = vld [vmem:[#allocation2 + $0x38] sm:$0xff] }
 0x22c   : > { %2242 = vmin.xlane.f32.xlu0 %v2241_v36  ;;  %v5963_v36 = vld [vmem:[#allocation2 + $0xb0] sm:$0xff] }
 0x22d   : > { %v5914_v1 = vpop.xlane.xlu0 %2000  ;;  %7739 = vst [vmem:[#allocation86_spill] sm:$0xff] %v5963_v36 }
 0x22e   : > { %7721 = vst [vmem:[#allocation87_spill] sm:$0xff] %v5914_v1  ;;  %vm2076_vm6 = vcmp.ge.f32.partialorder %v7722_v50, %v5914_v1  ;;  %vm2077_vm0 = vcmp.ge.f32.partialorder %v7723_v51, %v5914_v1  ;;  %vm7003_vm5 = vcmp.gt.f32.partialorder %v5914_v1, %v5906_v16  ;;  %v7743_v50 = vld [vmem:[#allocation91_spill] sm:$0xff] }
 0x22f   : > { %v5921_v6 = vpop.xlane.xlu1 %1955  ;;  %vm5931_vm8 = vmand %vm7728_vm1, %vm2076_vm6  ;;  %v2407_v47 = vsel %vm7003_vm5, %v5914_v1, %v5906_v16  ;;  %vm7735_vm6 = vcmask 7168   ;;  %v7745_v51 = vld [vmem:[#allocation51_spill] sm:$0xff] }
 0x230   : > { %7724 = vst [vmem:[#allocation61_spill] sm:$0xff] %v5921_v6  ;;  %vm2046_vm3 = vcmp.ge.f32.partialorder %v7725_v60, %v5921_v6  ;;  %vm2047_vm11 = vcmp.ge.f32.partialorder %v7726_v44, %v5921_v6  ;;  %vm2360_vm7 = vcmp.gt.f32.partialorder %v5921_v6, %v5911_v2  ;;  %2440 = vst.msk [vmem:[#allocation2 + $0xa8] sm:$0xff] %vm7735_vm6, %v2407_v47  ;;  %v7736_v60 = vld [vmem:[#allocation48_spill] sm:$0xff]  ;;  %v2204_v18 = vsel %vm5931_vm8, %v5633_v29, 1.0737418e+09  ;;  %v7740_v47 = vld [vmem:[#allocation7_spill] sm:$0xff] }
 0x231   : > { %vm5944_vm12 = vmand %vm7732_vm9, %vm2046_vm3  ;;  %v2392_v62 = vsel %vm2360_vm7, %v5921_v6, %v5911_v2  ;;  %vm7737_vm1 = vnez %v7736_v60  ;;  %v7742_v60 = vld [vmem:[#allocation97_spill] sm:$0xff] }
 0x232   : > { %vm2111_vm2 = vmand %vm7737_vm1, %vm2047_vm11  ;;  %v2174_v44 = vsel %vm5944_vm12, %v5633_v29, 1.0737418e+09  ;;  %vm7741_vm11 = vnez %v7740_v47  ;;  %v7746_v47 = vld [vmem:[#allocation116_spill] sm:$0xff] }
 0x233   : > { %vm7738_vm3 = vmmov %vm7735_vm6  ;;  %v2175_v2 = vsel %vm2111_vm2, %v5638_v26, 1.0737418e+09 }
 0x234   : > { %2425 = vst.msk [vmem:[#allocation2 + $0x30] sm:$0xff] %vm7738_vm3, %v2392_v62  ;;  %vm2141_vm9 = vmand %vm7741_vm11, %vm2077_vm0  ;;  %v2244_v6 = vmin.f32 %v2174_v44, %v2175_v2  ;;  %vm7747_vm0 = vnez %v7746_v47  ;;  %v7750_v2 = vld [vmem:[#allocation45_spill] sm:$0xff] }
 0x235   : > { %v2205_v33 = vsel %vm2141_vm9, %v5638_v26, 1.0737418e+09  ;;  %vm7751_vm11 = vnez %v7750_v2  ;;  %v6023_v2 = vld [vmem:[#allocation2 + $0xb8] sm:$0xff] }
 0x236   : > { %2245 = vmin.xlane.f32.xlu1 %v2244_v6 }
 0x238   : > { %v5965_v16 = vpop.xlane.xlu1 %2003 }
 0x239   : > { %vm2078_vm12 = vcmp.ge.f32.partialorder %v7742_v60, %v5965_v16  ;;  %vm2079_vm8 = vcmp.ge.f32.partialorder %v7743_v50, %v5965_v16  ;;  %v2289_v60 = vmin.f32 %v2204_v18, %v2205_v33  ;;  %vm7002_vm3 = vcmp.gt.f32.partialorder %v5965_v16, %v5963_v36  ;;  %v6004_v50 = vld [vmem:[#allocation2 + $0x40] sm:$0xff] }
 0x23a   : > { %v5979_v62 = vpop.xlane.xlu0 %1958  ;;  %vm5988_vm1 = vmand %vm7747_vm0, %vm2078_vm12  ;;  %v2408_v44 = vsel %vm7002_vm3, %v5965_v16, %v5963_v36  ;;  %vm7755_vm0 = vcmask 7168   ;;  %vm7759_vm3 = vnez %v7435_v4 }
 0x23b   : > { %vm2048_vm2 = vcmp.ge.f32.partialorder %v7744_v28, %v5979_v62  ;;  %vm2049_vm6 = vcmp.ge.f32.partialorder %v7745_v51, %v5979_v62  ;;  %vm2143_vm9 = vmand %vm7751_vm11, %vm2079_vm8  ;;  %v2206_v28 = vsel %vm5988_vm1, %v5633_v29, 1.0737418e+09  ;;  %vm7001_vm12 = vcmp.gt.f32.partialorder %v5979_v62, %v5973_v41  ;;  %2290 = vmin.xlane.f32.xlu0 %v2289_v60  ;;  %2441 = vst.msk [vmem:[#allocation2 + $0xb0] sm:$0xff] %vm7755_vm0, %v2408_v44  ;;  %v7756_v44 = vld [vmem:[#allocation74_spill] sm:$0xff]  ;;  %v7762_v51 = vld [vmem:[#allocation24_spill] sm:$0xff] }
 0x23c   : > { %v2207_v6 = vsel %vm2143_vm9, %v5638_v26, 1.0737418e+09  ;;  %vm6013_vm8 = vmand %vm4831_vm10, %vm2048_vm2  ;;  %v2393_v47 = vsel %vm7001_vm12, %v5979_v62, %v5973_v41  ;;  %vm7757_vm2 = vnez %v7756_v44 }
 0x23d   : > { %v2292_v60 = vmin.f32 %v2206_v28, %v2207_v6  ;;  %vm2113_vm11 = vmand %vm7757_vm2, %vm2049_vm6  ;;  %v2176_v18 = vsel %vm6013_vm8, %v5633_v29, 1.0737418e+09  ;;  %vm7763_vm8 = vnez %v7762_v51  ;;  %v6063_v6 = vld [vmem:[#allocation2 + $0xc0] sm:$0xff] }
 0x23e   : > { %vm7758_vm9 = vmmov %vm7755_vm0  ;;  %7764 = vst [vmem:[#allocation28_spill] sm:$0xff] %v6063_v6 }
 0x23f   : > { %2426 = vst.msk [vmem:[#allocation2 + $0x38] sm:$0xff] %vm7758_vm9, %v2393_v47  ;;  %2293 = vmin.xlane.f32.xlu1 %v2292_v60  ;;  %v7765_v60 = vld [vmem:[#allocation114_spill] sm:$0xff] }
 0x240   : > { %v6008_v33 = vpop.xlane.xlu1 %1961 }
 0x241   : > { %v6025_v36 = vpop.xlane.xlu0 %2006  ;;  %vm2050_vm1 = vcmp.ge.f32.partialorder %v5024_v52, %v6008_v33  ;;  %vm2051_vm10 = vcmp.ge.f32.partialorder %v5028_v17, %v6008_v33  ;;  %v2177_v17 = vsel %vm2113_vm11, %v5638_v26, 1.0737418e+09  ;;  %vm7005_vm6 = vcmp.gt.f32.partialorder %v6008_v33, %v6004_v50  ;;  %v6082_v52 = vld [vmem:[#allocation2 + $0x48] sm:$0xff] }
 0x242   : > { %vm2080_vm0 = vcmp.ge.f32.partialorder %v4727_v57, %v6025_v36  ;;  %vm2081_vm12 = vcmp.ge.f32.partialorder %v4750_v3, %v6025_v36  ;;  %vm6046_vm5 = vmand %vm7759_vm3, %vm2050_vm1  ;;  %v2247_v28 = vmin.f32 %v2176_v18, %v2177_v17  ;;  %v2394_v4 = vsel %vm7005_vm6, %v6008_v33, %v6004_v50  ;;  %7770 = vst [vmem:[#allocation58_spill] sm:$0xff] %v6082_v52 }
 0x243   : > { %vm2115_vm2 = vmand %vm7763_vm8, %vm2051_vm10  ;;  %v2178_v57 = vsel %vm6046_vm5, %v5633_v29, 1.0737418e+09  ;;  %vm7004_vm3 = vcmp.gt.f32.partialorder %v6025_v36, %v6023_v2  ;;  %vm7766_vm1 = vnez %v7765_v60 }
 0x244   : > { %v2179_v47 = vsel %vm2115_vm2, %v5638_v26, 1.0737418e+09  ;;  %vm6072_vm10 = vmand %vm7766_vm1, %vm2080_vm0  ;;  %v2409_v18 = vsel %vm7004_vm3, %v6025_v36, %v6023_v2  ;;  %2248 = vmin.xlane.f32.xlu0 %v2247_v28  ;;  %v7779_v28 = vld [vmem:[#allocation23_spill] sm:$0xff] }
 0x245   : > { %vm7769_vm5 = vmmov %vm7758_vm9  ;;  %v2250_v51 = vmin.f32 %v2178_v57, %v2179_v47  ;;  %v2208_v60 = vsel %vm6072_vm10, %v5633_v29, 1.0737418e+09  ;;  %vm7780_vm10 = vnez %v7779_v28 }
 0x246   : > { %2427 = vst.msk [vmem:[#allocation2 + $0x40] sm:$0xff] %vm7769_vm5, %v2394_v4  ;;  %v7771_v4 = vld [vmem:[#allocation22_spill] sm:$0xff]  ;;  %vm7773_vm2 = vmmov %vm7769_vm5 }
 0x247   : > { %vm7772_vm0 = vnez %v7771_v4  ;;  %2442 = vst.msk [vmem:[#allocation2 + $0xb8] sm:$0xff] %vm7773_vm2, %v2409_v18  ;;  %2251 = vmin.xlane.f32.xlu1 %v2250_v51  ;;  %v6122_v18 = vld [vmem:[#allocation2 + $0x50] sm:$0xff] }
 0x248   : > { %v6067_v1 = vpop.xlane.xlu1 %2009  ;;  %vm2145_vm8 = vmand %vm7772_vm0, %vm2081_vm12  ;;  %7781 = vst [vmem:[#allocation14_spill] sm:$0xff] %v6122_v18 }
 0x249   : > { %vm2082_vm11 = vcmp.ge.f32.partialorder %v5000_v11, %v6067_v1  ;;  %vm2083_vm9 = vcmp.ge.f32.partialorder %v5018_v19, %v6067_v1  ;;  %v7774_v11 = vld [vmem:[#allocation19_spill] sm:$0xff]  ;;  %v7775_v19 = vld [vmem:[#allocation77_spill] sm:$0xff]  ;;  %v2209_v3 = vsel %vm2145_vm8, %v5638_v26, 1.0737418e+09  ;;  %vm7009_vm12 = vcmp.gt.f32.partialorder %v6067_v1, %v6063_v6 }
 0x24a   : > { %v6088_v17 = vpop.xlane.xlu0 %1964  ;;  %vm7776_vm3 = vnez %v7775_v19  ;;  %vm2147_vm0 = vmand %vm7780_vm10, %vm2083_vm9  ;;  %v2295_v47 = vmin.f32 %v2208_v60, %v2209_v3  ;;  %v2410_v44 = vsel %vm7009_vm12, %v6067_v1, %v6063_v6  ;;  %v7783_v19 = vld [vmem:[#allocation65_spill] sm:$0xff]  ;;  %v7793_v6 = vld [vmem:[#allocation34_spill] sm:$0xff] }
 0x24b   : > { %vm2052_vm1 = vcmp.ge.f32.partialorder %v5156_v32, %v6088_v17  ;;  %vm2053_vm5 = vcmp.ge.f32.partialorder %v7774_v11, %v6088_v17  ;;  %vm6105_vm6 = vmand %vm7776_vm3, %vm2082_vm11  ;;  %vm7008_vm3 = vcmp.gt.f32.partialorder %v6088_v17, %v6082_v52  ;;  %v2211_v4 = vsel %vm2147_vm0, %v5638_v26, 1.0737418e+09  ;;  %v6141_v3 = vld [vmem:[#allocation2 + $0xc8] sm:$0xff] }
 0x24c   : > { %v2210_v32 = vsel %vm6105_vm6, %v5633_v29, 1.0737418e+09  ;;  %vm7784_vm11 = vnez %v7783_v19  ;;  %vm7787_vm6 = vmmov %vm7773_vm2  ;;  %v2395_v60 = vsel %vm7008_vm3, %v6088_v17, %v6082_v52  ;;  %7788 = vst [vmem:[#allocation89_spill] sm:$0xff] %v6141_v3  ;;  %2296 = vmin.xlane.f32.xlu0 %v2295_v47  ;;  %v7799_v47 = vld [vmem:[#allocation37_spill] sm:$0xff] }
 0x24d   : > { %vm6131_vm9 = vmand %vm7784_vm11, %vm2052_vm1  ;;  %2443 = vst.msk [vmem:[#allocation2 + $0xc0] sm:$0xff] %vm7787_vm6, %v2410_v44  ;;  %v2298_v19 = vmin.f32 %v2210_v32, %v2211_v4  ;;  %v7790_v44 = vld [vmem:[#allocation67_spill] sm:$0xff] }
 0x24e   : > { %vm7791_vm1 = vnez %v7790_v44  ;;  %v2180_v52 = vsel %vm6131_vm9, %v5633_v29, 1.0737418e+09  ;;  %vm7792_vm0 = vmmov %vm7787_vm6  ;;  %vm7800_vm9 = vnez %v7799_v47  ;;  %v7809_v47 = vld [vmem:[#allocation50_spill] sm:$0xff] }
 0x24f   : > { %vm2117_vm10 = vmand %vm7791_vm1, %vm2053_vm5  ;;  %2428 = vst.msk [vmem:[#allocation2 + $0x48] sm:$0xff] %vm7792_vm0, %v2395_v60  ;;  %2299 = vmin.xlane.f32.xlu1 %v2298_v19  ;;  %v6181_v60 = vld [vmem:[#allocation2 + $0xd0] sm:$0xff] }
 0x250   : > { %v6126_v51 = vpop.xlane.xlu1 %1967  ;;  %v2181_v11 = vsel %vm2117_vm10, %v5638_v26, 1.0737418e+09  ;;  %7801 = vst [vmem:[#allocation27_spill] sm:$0xff] %v6181_v60 }
 0x251   : > { %7782 = vst [vmem:[#allocation90_spill] sm:$0xff] %v6126_v51  ;;  %v6143_v28 = vpop.xlane.xlu0 %2012  ;;  %vm2054_vm8 = vcmp.ge.f32.partialorder %v5215_v7, %v6126_v51  ;;  %vm2055_vm2 = vcmp.ge.f32.partialorder %v5184_v58, %v6126_v51  ;;  %v7794_v7 = vld [vmem:[#allocation52_spill] sm:$0xff]  ;;  %v7795_v58 = vld [vmem:[#allocation62_spill] sm:$0xff]  ;;  %vm7014_vm5 = vcmp.gt.f32.partialorder %v6126_v51, %v6122_v18  ;;  %v2253_v4 = vmin.f32 %v2180_v52, %v2181_v11  ;;  %v6200_v11 = vld [vmem:[#allocation2 + $0x58] sm:$0xff] }
 0x252   : > { %7789 = vst [vmem:[#allocation85_spill] sm:$0xff] %v6143_v28  ;;  %vm2084_vm11 = vcmp.ge.f32.partialorder %v7793_v6, %v6143_v28  ;;  %vm2085_vm6 = vcmp.ge.f32.partialorder %v7794_v7, %v6143_v28  ;;  %vm7796_vm3 = vnez %v7795_v58  ;;  %vm2119_vm1 = vmand %vm7800_vm9, %vm2055_vm2  ;;  %v2396_v57 = vsel %vm7014_vm5, %v6126_v51, %v6122_v18  ;;  %v7803_v58 = vld [vmem:[#allocation76_spill] sm:$0xff]  ;;  %v7810_v18 = vld [vmem:[#allocation21_spill] sm:$0xff] }
 0x253   : > { %vm6164_vm12 = vmand %vm7796_vm3, %vm2054_vm8  ;;  %vm7013_vm3 = vcmp.gt.f32.partialorder %v6143_v28, %v6141_v3  ;;  %v2183_v44 = vsel %vm2119_vm1, %v5638_v26, 1.0737418e+09  ;;  %vm7804_vm8 = vnez %v7803_v58  ;;  %7808 = vst [vmem:[#allocation33_spill] sm:$0xff] %v6200_v11  ;;  %2254 = vmin.xlane.f32.xlu0 %v2253_v4 }
 0x254   : > { %v2182_v6 = vsel %vm6164_vm12, %v5633_v29, 1.0737418e+09  ;;  %vm6190_vm2 = vmand %vm7804_vm8, %vm2084_vm11  ;;  %v2411_v52 = vsel %vm7013_vm3, %v6143_v28, %v6141_v3 }
 0x255   : > { %vm7807_vm12 = vmmov %vm7792_vm0  ;;  %v2256_v51 = vmin.f32 %v2182_v6, %v2183_v44  ;;  %v2212_v3 = vsel %vm6190_vm2, %v5633_v29, 1.0737418e+09  ;;  %v7816_v6 = vld [vmem:[#allocation96_spill] sm:$0xff] }
 0x256   : > { %2429 = vst.msk [vmem:[#allocation2 + $0x50] sm:$0xff] %vm7807_vm12, %v2396_v57  ;;  %v7811_v57 = vld [vmem:[#allocation8_spill] sm:$0xff]  ;;  %vm7813_vm1 = vmmov %vm7807_vm12  ;;  %vm7817_vm3 = vnez %v7816_v6 }
 0x257   : > { %vm7812_vm11 = vnez %v7811_v57  ;;  %2444 = vst.msk [vmem:[#allocation2 + $0xc8] sm:$0xff] %vm7813_vm1, %v2411_v52  ;;  %2257 = vmin.xlane.f32.xlu1 %v2256_v51  ;;  %v7820_v44 = vld [vmem:[#allocation64_spill] sm:$0xff] }
 0x258   : > { %v6185_v19 = vpop.xlane.xlu1 %2015  ;;  %vm2149_vm9 = vmand %vm7812_vm11, %vm2085_vm6  ;;  %vm7821_vm2 = vnez %v7820_v44  ;;  %v7822_v44 = vld [vmem:[#allocation41_spill] sm:$0xff] }
 0x259   : > { %7802 = vst [vmem:[#allocation40_spill] sm:$0xff] %v6185_v19  ;;  %vm2086_vm10 = vcmp.ge.f32.partialorder %v7809_v47, %v6185_v19  ;;  %vm2087_vm0 = vcmp.ge.f32.partialorder %v7810_v18, %v6185_v19  ;;  %v7814_v47 = vld [vmem:[#allocation26_spill] sm:$0xff]  ;;  %v2213_v7 = vsel %vm2149_vm9, %v5638_v26, 1.0737418e+09  ;;  %vm7020_vm6 = vcmp.gt.f32.partialorder %v6185_v19, %v6181_v60 }
 0x25a   : > { %v6206_v58 = vpop.xlane.xlu0 %1970  ;;  %v7815_v18 = vld [vmem:[#allocation10_spill] sm:$0xff]  ;;  %vm6223_vm5 = vmand %vm7817_vm3, %vm2086_vm10  ;;  %v2301_v52 = vmin.f32 %v2212_v3, %v2213_v7  ;;  %v2412_v57 = vsel %vm7020_vm6, %v6185_v19, %v6181_v60  ;;  %vm7823_vm10 = vnez %v7822_v44  ;;  %v6259_v7 = vld [vmem:[#allocation2 + $0xd8] sm:$0xff] }
 0x25b   : > { %vm2056_vm8 = vcmp.ge.f32.partialorder %v7814_v47, %v6206_v58  ;;  %vm2057_vm12 = vcmp.ge.f32.partialorder %v7815_v18, %v6206_v58  ;;  %vm2151_vm11 = vmand %vm7821_vm2, %vm2087_vm0  ;;  %v2214_v32 = vsel %vm6223_vm5, %v5633_v29, 1.0737418e+09  ;;  %v6240_v47 = vld [vmem:[#allocation2 + $0x60] sm:$0xff]  ;;  %vm7019_vm3 = vcmp.gt.f32.partialorder %v6206_v58, %v6200_v11 }
 0x25c   : > { %v2215_v6 = vsel %vm2151_vm11, %v5638_v26, 1.0737418e+09  ;;  %vm6249_vm0 = vmand %vm7823_vm10, %vm2056_vm8  ;;  %v2397_v3 = vsel %vm7019_vm3, %v6206_v58, %v6200_v11  ;;  %v7827_v19 = vld [vmem:[#allocation68_spill] sm:$0xff]  ;;  %2302 = vmin.xlane.f32.xlu0 %v2301_v52  ;;  %v7836_v52 = vld [vmem:[#allocation57_spill] sm:$0xff] }
 0x25d   : > { %vm7826_vm5 = vmmov %vm7813_vm1  ;;  %v7828_v44 = vld [vmem:[#allocation44_spill] sm:$0xff]  ;;  %v2304_v28 = vmin.f32 %v2214_v32, %v2215_v6  ;;  %v2184_v11 = vsel %vm6249_vm0, %v5633_v29, 1.0737418e+09  ;;  %vm7837_vm0 = vnez %v7836_v52  ;;  %v6318_v32 = vld [vmem:[#allocation2 + $0x68] sm:$0xff] }
 0x25e   : > { %2445 = vst.msk [vmem:[#allocation2 + $0xd0] sm:$0xff] %vm7826_vm5, %v2412_v57  ;;  %v7829_v57 = vld [vmem:[#allocation46_spill] sm:$0xff]  ;;  %vm7831_vm11 = vmmov %vm7826_vm5 }
 0x25f   : > { %v6244_v51 = vpop.xlane.xlu1 %1973  ;;  %vm7830_vm8 = vnez %v7829_v57  ;;  %2430 = vst.msk [vmem:[#allocation2 + $0x58] sm:$0xff] %vm7831_vm11, %v2397_v3  ;;  %2305 = vmin.xlane.f32.xlu1 %v2304_v28  ;;  %v6299_v3 = vld [vmem:[#allocation2 + $0xe0] sm:$0xff]  ;;  %v7838_v57 = vld [vmem:[#allocation11_spill] sm:$0xff] }
 0x260   : > { %v6261_v60 = vpop.xlane.xlu0 %2018  ;;  %vm2058_vm9 = vcmp.ge.f32.partialorder %v7827_v19, %v6244_v51  ;;  %vm2059_vm1 = vcmp.ge.f32.partialorder %v7828_v44, %v6244_v51  ;;  %vm2121_vm2 = vmand %vm7830_vm8, %vm2057_vm12  ;;  %v7832_v19 = vld [vmem:[#allocation78_spill] sm:$0xff]  ;;  %vm7022_vm12 = vcmp.gt.f32.partialorder %v6244_v51, %v6240_v47 }
 0x261   : > { %vm2088_vm10 = vcmp.ge.f32.partialorder %v5167_v9, %v6261_v60  ;;  %vm2089_vm5 = vcmp.ge.f32.partialorder %v5385_v56, %v6261_v60  ;;  %vm7833_vm3 = vnez %v7832_v19  ;;  %v2185_v18 = vsel %vm2121_vm2, %v5638_v26, 1.0737418e+09  ;;  %vm2123_vm8 = vmand %vm7837_vm0, %vm2059_vm1 }
 0x262   : > { %vm6282_vm6 = vmand %vm7833_vm3, %vm2058_vm9  ;;  %v2259_v6 = vmin.f32 %v2184_v11, %v2185_v18  ;;  %v2398_v4 = vsel %vm7022_vm12, %v6244_v51, %v6240_v47  ;;  %vm7021_vm3 = vcmp.gt.f32.partialorder %v6261_v60, %v6259_v7  ;;  %v2187_v44 = vsel %vm2123_vm8, %v5638_v26, 1.0737418e+09 }
 0x263   : > { %v2186_v9 = vsel %vm6282_vm6, %v5633_v29, 1.0737418e+09  ;;  %vm7839_vm9 = vnez %v7838_v57  ;;  %vm7842_vm6 = vmmov %vm7831_vm11  ;;  %v2413_v11 = vsel %vm7021_vm3, %v6261_v60, %v6259_v7 }
 0x264   : > { %vm6308_vm1 = vmand %vm7839_vm9, %vm2088_vm10  ;;  %2431 = vst.msk [vmem:[#allocation2 + $0x60] sm:$0xff] %vm7842_vm6, %v2398_v4  ;;  %v2262_v52 = vmin.f32 %v2186_v9, %v2187_v44  ;;  %2260 = vmin.xlane.f32.xlu0 %v2259_v6  ;;  %v7843_v4 = vld [vmem:[#allocation49_spill] sm:$0xff]  ;;  %v6358_v44 = vld [vmem:[#allocation2 + $0x70] sm:$0xff] }
 0x265   : > { %vm7844_vm10 = vnez %v7843_v4  ;;  %v2216_v57 = vsel %vm6308_vm1, %v5633_v29, 1.0737418e+09  ;;  %vm7845_vm8 = vmmov %vm7842_vm6  ;;  %vm7850_vm1 = vnez %v7561_v15  ;;  %v6377_v4 = vld [vmem:[#allocation2 + $0xe8] sm:$0xff] }
 0x266   : > { %v6303_v28 = vpop.xlane.xlu1 %2021  ;;  %vm2153_vm0 = vmand %vm7844_vm10, %vm2089_vm5  ;;  %2446 = vst.msk [vmem:[#allocation2 + $0xd8] sm:$0xff] %vm7845_vm8, %v2413_v11  ;;  %2263 = vmin.xlane.f32.xlu1 %v2262_v52 }
 0x267   : > { %vm2090_vm2 = vcmp.ge.f32.partialorder %v5357_v23, %v6303_v28  ;;  %vm2091_vm11 = vcmp.ge.f32.partialorder %v5430_v46, %v6303_v28  ;;  %v7846_v46 = vld [vmem:[#allocation82_spill] sm:$0xff]  ;;  %v2217_v56 = vsel %vm2153_vm0, %v5638_v26, 1.0737418e+09  ;;  %vm7024_vm5 = vcmp.gt.f32.partialorder %v6303_v28, %v6299_v3 }
 0x268   : > { %v6324_v18 = vpop.xlane.xlu0 %1976  ;;  %vm7847_vm3 = vnez %v7846_v46  ;;  %vm2155_vm10 = vmand %vm7850_vm1, %vm2091_vm11  ;;  %v2307_v9 = vmin.f32 %v2216_v57, %v2217_v56  ;;  %v2414_v6 = vsel %vm7024_vm5, %v6303_v28, %v6299_v3 }
 0x269   : > { %vm2060_vm9 = vcmp.ge.f32.partialorder %v5470_v20, %v6324_v18  ;;  %vm2061_vm6 = vcmp.ge.f32.partialorder %v5437_v13, %v6324_v18  ;;  %vm6341_vm12 = vmand %vm7847_vm3, %vm2090_vm2  ;;  %vm7023_vm3 = vcmp.gt.f32.partialorder %v6324_v18, %v6318_v32  ;;  %v2219_v15 = vsel %vm2155_vm10, %v5638_v26, 1.0737418e+09 }
 0x26a   : > { %v2218_v20 = vsel %vm6341_vm12, %v5633_v29, 1.0737418e+09  ;;  %vm7851_vm2 = vnez %v7580_v61  ;;  %vm7854_vm12 = vmmov %vm7845_vm8  ;;  %v2399_v52 = vsel %vm7023_vm3, %v6324_v18, %v6318_v32  ;;  %2308 = vmin.xlane.f32.xlu0 %v2307_v9  ;;  %vm7857_vm3 = vnez %v7595_v40  ;;  %v6436_v9 = vld [vmem:[#allocation2 + $0x78] sm:$0xff] }
 0x26b   : > { %vm6367_vm11 = vmand %vm7851_vm2, %vm2060_vm9  ;;  %2447 = vst.msk [vmem:[#allocation2 + $0xe0] sm:$0xff] %vm7854_vm12, %v2414_v6  ;;  %v2310_v61 = vmin.f32 %v2218_v20, %v2219_v15  ;;  %vm7855_vm9 = vnez %v7574_v12 }
 0x26c   : > { %vm2125_vm1 = vmand %vm7855_vm9, %vm2061_vm6  ;;  %v2188_v46 = vsel %vm6367_vm11, %v5633_v29, 1.0737418e+09  ;;  %vm7860_vm11 = vnez %v7585_v27 }
 0x26d   : > { %vm7856_vm10 = vmmov %vm7854_vm12  ;;  %v2189_v13 = vsel %vm2125_vm1, %v5638_v26, 1.0737418e+09  ;;  %2311 = vmin.xlane.f32.xlu1 %v2310_v61 }
 0x26e   : > { %2432 = vst.msk [vmem:[#allocation2 + $0x68] sm:$0xff] %vm7856_vm10, %v2399_v52 }
 0x26f   : > { %v6362_v19 = vpop.xlane.xlu1 %1979 }
 0x270   : > { %vm2062_vm0 = vcmp.ge.f32.partialorder %v5530_v45, %v6362_v19  ;;  %vm2063_vm8 = vcmp.ge.f32.partialorder %v5493_v21, %v6362_v19  ;;  %vm2368_vm6 = vcmp.gt.f32.partialorder %v6362_v19, %v6358_v44  ;;  %v2265_v45 = vmin.f32 %v2188_v46, %v2189_v13 }
 0x271   : > { %v6379_v57 = vpop.xlane.xlu0 %2024  ;;  %vm6400_vm5 = vmand %vm7857_vm3, %vm2062_vm0  ;;  %v2400_v40 = vsel %vm2368_vm6, %v6362_v19, %v6358_v44  ;;  %vm7861_vm0 = vnez %v7600_v25 }
 0x272   : > { %vm2092_vm2 = vcmp.ge.f32.partialorder %v5544_v24, %v6379_v57  ;;  %vm2093_vm12 = vcmp.ge.f32.partialorder %v5511_v39, %v6379_v57  ;;  %vm2127_vm9 = vmand %vm7860_vm11, %vm2063_vm8  ;;  %v2190_v12 = vsel %vm6400_vm5, %v5633_v29, 1.0737418e+09  ;;  %v6417_v24 = vld [vmem:[#allocation2 + $0xf0] sm:$0xff]  ;;  %vm7025_vm3 = vcmp.gt.f32.partialorder %v6379_v57, %v6377_v4  ;;  %2266 = vmin.xlane.f32.xlu0 %v2265_v45 }
 0x273   : > { %v2191_v27 = vsel %vm2127_vm9, %v5638_v26, 1.0737418e+09  ;;  %vm6426_vm8 = vmand %vm7861_vm0, %vm2092_vm2  ;;  %v2415_v20 = vsel %vm7025_vm3, %v6379_v57, %v6377_v4  ;;  %vm7865_vm2 = vnez %v7590_v30  ;;  %v2453_v45 = vld [vmem:[#allocation3 + $0x10] sm:$0xff] }
 0x274   : > { %vm7864_vm5 = vmmov %vm7856_vm10  ;;  %v2268_v6 = vmin.f32 %v2190_v12, %v2191_v27  ;;  %v2220_v15 = vsel %vm6426_vm8, %v5633_v29, 1.0737418e+09  ;;  %v2467_v12 = vld [vmem:[#allocation3 + $0x80] sm:$0xff]  ;;  %v7904_v27 = vld [vmem:[#allocation59_spill] sm:$0xff] }
 0x275   : > { %v6421_v23 = vpop.xlane.xlu1 %2027  ;;  %2433 = vst.msk [vmem:[#allocation2 + $0x70] sm:$0xff] %vm7864_vm5, %v2400_v40  ;;  %vm2157_vm11 = vmand %vm7865_vm2, %vm2093_vm12  ;;  %vm7867_vm2 = vnez %v7606_v31 }
 0x276   : > { %vm2094_vm1 = vcmp.ge.f32.partialorder %v5597_v35, %v6421_v23  ;;  %vm2095_vm10 = vcmp.ge.f32.partialorder %v5565_v59, %v6421_v23  ;;  %v6442_v25 = vpop.xlane.xlu0 %1982  ;;  %vm7866_vm9 = vmmov %vm7864_vm5  ;;  %v2221_v39 = vsel %vm2157_vm11, %v5638_v26, 1.0737418e+09  ;;  %vm2384_vm12 = vcmp.gt.f32.partialorder %v6421_v23, %v6417_v24  ;;  %2269 = vmin.xlane.f32.xlu1 %v2268_v6 }
 0x277   : > { %2448 = vst.msk [vmem:[#allocation2 + $0xe8] sm:$0xff] %vm7866_vm9, %v2415_v20  ;;  %vm2064_vm0 = vcmp.ge.f32.partialorder %v5606_v22, %v6442_v25  ;;  %vm2065_vm5 = vcmp.ge.f32.partialorder %v5585_v37, %v6442_v25  ;;  %vm2158_vm3 = vmand %vm5578_vm13, %vm2094_vm1  ;;  %v2313_v59 = vmin.f32 %v2220_v15, %v2221_v39  ;;  %v2416_v35 = vsel %vm2384_vm12, %v6421_v23, %v6417_v24 }
 0x278   : > { %vm2159_vm8 = vmand %vm7867_vm2, %vm2095_vm10  ;;  %v2222_v30 = vsel %vm2158_vm3, %v5633_v29, 1.0737418e+09  ;;  %vm2369_vm13 = vcmp.gt.f32.partialorder %v6442_v25, %v6436_v9  ;;  %vm7870_vm2 = vnez %v7625_v8  ;;  %v2451_v8 = vld [vmem:[#allocation3] sm:$0xff] }
 0x279   : > { %v2223_v22 = vsel %vm2159_vm8, %v5638_v26, 1.0737418e+09  ;;  %vm2128_vm1 = vmand %vm5591_vm4, %vm2064_vm0  ;;  %v2401_v31 = vsel %vm2369_vm13, %v6442_v25, %v6436_v9  ;;  %2314 = vmin.xlane.f32.xlu0 %v2313_v59 }
 0x27a   : > { %vm7868_vm10 = vmmov %vm7866_vm9  ;;  %v6483_v11 = vpop.xlane.xlu0 %2030  ;;  %v2316_v52 = vmin.f32 %v2222_v30, %v2223_v22  ;;  %v2192_v43 = vsel %vm2128_vm1, %v5633_v29, 1.0737418e+09  ;;  %v7883_v30 = vld [vmem:[#allocation56_spill] sm:$0xff]  ;;  %v7887_v22 = vld [vmem:[#allocation55_spill] sm:$0xff] }
 0x27b   : > { %2449 = vst.msk [vmem:[#allocation2 + $0xf0] sm:$0xff] %vm7868_vm10, %v2416_v35  ;;  %vm2129_vm3 = vmand %vm5556_vm15, %vm2065_vm5  ;;  %vm2096_vm11 = vcmp.ge.f32.partialorder %v5626_v14, %v6483_v11  ;;  %vm2385_vm0 = vcmp.gt.f32.partialorder %v6483_v11, %v6472_v53  ;;  %vm7871_vm5 = vnez %v7623_v38  ;;  %v2228_v21 = vpop.xlane.xlu1 %2227  ;;  %vm7873_vm10 = vcmp.gt.f32.partialorder %v5635_v55, %v5630_v42  ;;  %v7879_v42 = vld [vmem:[#allocation69_spill] sm:$0xff] }
 0x27c   : > { %vm7869_vm4 = vmmov %vm7866_vm9  ;;  %vm2097_vm9 = vcmp.ge.f32.partialorder %v5618_v48, %v6483_v11  ;;  %v2193_v61 = vsel %vm2129_vm3, %v5638_v26, 1.0737418e+09  ;;  %2317 = vmin.xlane.f32.xlu1 %v2316_v52  ;;  %v2417_v10 = vsel %vm2385_vm0, %v6483_v11, %v6472_v53  ;;  %v2483_v13 = vsel %vm7873_vm10, %v2228_v21, %v2451_v8  ;;  %v2471_v21 = vld [vmem:[#allocation3 + $0xa0] sm:$0xff] }
 0x27d   : > { %2434 = vst.msk [vmem:[#allocation2 + $0x78] sm:$0xff] %vm7869_vm4, %v2401_v31  ;;  %v2271_v37 = vmin.f32 %v2192_v43, %v2193_v61  ;;  %vm2160_vm15 = vmand %vm7870_vm2, %vm2096_vm11  ;;  %vm7880_vm2 = vcmp.gt.f32.partialorder %v5697_v34, %v7879_v42  ;;  %v2454_v34 = vld [vmem:[#allocation3 + $0x18] sm:$0xff]  ;;  %v2455_v61 = vld [vmem:[#allocation3 + $0x20] sm:$0xff] }
 0x27e   : > { %vm2161_vm8 = vmand %vm7871_vm5, %vm2097_vm9  ;;  %v2224_v48 = vsel %vm2160_vm15, %v5633_v29, 1.0737418e+09  ;;  %vm7882_vm5 = vcmp.gt.f32.partialorder %v5768_v63, %v5759_v5  ;;  %v7888_v31 = vld [vmem:[#allocation83_spill] sm:$0xff]  ;;  %v2472_v42 = vld [vmem:[#allocation3 + $0xa8] sm:$0xff] }
 0x27f   : > { %vm7872_vm1 = vmmov %vm7869_vm4  ;;  %2272 = vmin.xlane.f32.xlu0 %v2271_v37  ;;  %v2225_v14 = vsel %vm2161_vm8, %v5638_v26, 1.0737418e+09  ;;  %vm7875_vm4 = vcmp.gt.f32.partialorder %v5664_v49, %v5660_v54  ;;  %v2452_v26 = vld [vmem:[#allocation3 + $0x8] sm:$0xff]  ;;  %v2469_v54 = vld [vmem:[#allocation3 + $0x90] sm:$0xff]  ;;  %vm7889_vm10 = vcmp.gt.f32.partialorder %v7887_v22, %v7888_v31 }
 0x280   : > { %2450 = vst.msk [vmem:[#allocation2 + $0xf8] sm:$0xff] %vm7872_vm1, %v2417_v10  ;;  %v2319_v46 = vmin.f32 %v2224_v48, %v2225_v14  ;;  %vm7874_vm3 = vmmov %vm7872_vm1  ;;  %v2468_v49 = vld [vmem:[#allocation3 + $0x88] sm:$0xff]  ;;  %v2470_v43 = vld [vmem:[#allocation3 + $0x98] sm:$0xff] }
 0x281   : > { %2515 = vst.msk [vmem:[#allocation3] sm:$0xff] %vm7874_vm3, %v2483_v13  ;;  %vm7876_vm11 = vmmov %vm7872_vm1  ;;  %v7891_v37 = vld [vmem:[#allocation54_spill] sm:$0xff]  ;;  %v7892_v10 = vld [vmem:[#allocation72_spill] sm:$0xff] }
 0x282   : > { %vm7878_vm9 = vmmov %vm7872_vm1  ;;  %v7894_v14 = vld [vmem:[#allocation60_spill] sm:$0xff]  ;;  %v7913_v22 = vld [vmem:[#allocation86_spill] sm:$0xff] }
 0x283   : > { %2320 = vmin.xlane.f32.xlu0 %v2319_v46  ;;  %vm7881_vm15 = vmmov %vm7872_vm1  ;;  %v7895_v46 = vld [vmem:[#allocation12_spill] sm:$0xff] }
 0x284   : > { %vm7886_vm8 = vmmov %vm7872_vm1 }
 0x285   : > { %vm7890_vm3 = vmmov %vm7872_vm1 }
 0x288   : > { %v2276_v38 = vpop.xlane.xlu1 %2275 }
 0x289   : > { %v2499_v29 = vsel %vm7875_vm4, %v2276_v38, %v2467_v12  ;;  %vm7893_vm4 = vcmp.gt.f32.partialorder %v7891_v37, %v7892_v10  ;;  %v2456_v12 = vld [vmem:[#allocation3 + $0x28] sm:$0xff] }
 0x28a   : > { %2531 = vst.msk [vmem:[#allocation3 + $0x80] sm:$0xff] %vm7876_vm11, %v2499_v29  ;;  %vm7896_vm11 = vcmp.gt.f32.partialorder %v7894_v14, %v7895_v46  ;;  %v7899_v38 = vld [vmem:[#allocation81_spill] sm:$0xff]  ;;  %v7900_v29 = vld [vmem:[#allocation92_spill] sm:$0xff] }
 0x291   : > { %v2234_v40 = vpop.xlane.xlu1 %2233 }
 0x292   : > { %v2485_v56 = vsel %vm2356_vm14, %v2234_v40, %v2453_v45  ;;  %v2231_v20 = vpop.xlane.xlu0 %2230  ;;  %vm7885_vm14 = vcmp.gt.f32.partialorder %v7883_v30, %v7884_v0  ;;  %v7903_v40 = vld [vmem:[#allocation15_spill] sm:$0xff]  ;;  %v7910_v0 = vld [vmem:[#allocation80_spill] sm:$0xff] }
 0x293   : > { %2517 = vst.msk [vmem:[#allocation3 + $0x10] sm:$0xff] %vm7878_vm9, %v2485_v56  ;;  %v2484_v55 = vsel %vm7880_vm2, %v2231_v20, %v2452_v26  ;;  %vm7897_vm9 = vmmov %vm7872_vm1  ;;  %v2457_v20 = vld [vmem:[#allocation3 + $0x30] sm:$0xff]  ;;  %v7909_v30 = vld [vmem:[#allocation87_spill] sm:$0xff] }
 0x294   : > { %2516 = vst.msk [vmem:[#allocation3 + $0x8] sm:$0xff] %vm7881_vm15, %v2484_v55  ;;  %vm7898_vm2 = vmmov %vm7872_vm1  ;;  %vm7901_vm15 = vcmp.gt.f32.partialorder %v7899_v38, %v7900_v29 }
 0x296   : > { %v2279_v15 = vpop.xlane.xlu0 %2278 }
 0x297   : > { %v2500_v59 = vsel %vm7885_vm14, %v2279_v15, %v2468_v49  ;;  %vm7905_vm14 = vcmp.gt.f32.partialorder %v7903_v40, %v7904_v27  ;;  %v7939_v49 = vld [vmem:[#allocation33_spill] sm:$0xff] }
 0x298   : > { %2532 = vst.msk [vmem:[#allocation3 + $0x88] sm:$0xff] %vm7872_vm1, %v2500_v59 }
 0x299   : > { %v2282_v6 = vpop.xlane.xlu1 %2281 }
 0x29a   : > { %v2501_v39 = vsel %vm7882_vm5, %v2282_v6, %v2469_v54  ;;  %vm7902_vm5 = vmmov %vm7872_vm1 }
 0x29b   : > { %2533 = vst.msk [vmem:[#allocation3 + $0x90] sm:$0xff] %vm7886_vm8, %v2501_v39  ;;  %vm7906_vm8 = vmmov %vm7872_vm1  ;;  %v2473_v39 = vld [vmem:[#allocation3 + $0xb0] sm:$0xff] }
 0x29f   : > { %v2237_v35 = vpop.xlane.xlu0 %2236 }
 0x2a0   : > { %v2486_v52 = vsel %vm7889_vm10, %v2237_v35, %v2454_v34  ;;  %vm7911_vm10 = vcmp.gt.f32.partialorder %v7909_v30, %v7910_v0  ;;  %v2458_v35 = vld [vmem:[#allocation3 + $0x38] sm:$0xff]  ;;  %v2479_v0 = vld [vmem:[#allocation3 + $0xe0] sm:$0xff] }
 0x2a1   : > { %2518 = vst.msk [vmem:[#allocation3 + $0x18] sm:$0xff] %vm7890_vm3, %v2486_v52  ;;  %vm7912_vm3 = vmmov %vm7872_vm1  ;;  %v2459_v52 = vld [vmem:[#allocation3 + $0x40] sm:$0xff] }
 0x2a5   : > { %v2285_v5 = vpop.xlane.xlu0 %2284 }
 0x2a6   : > { %v2502_v48 = vsel %vm7893_vm4, %v2285_v5, %v2470_v43  ;;  %vm7914_vm4 = vcmp.gt.f32.partialorder %v5965_v16, %v7913_v22  ;;  %v2475_v16 = vld [vmem:[#allocation3 + $0xc0] sm:$0xff] }
 0x2a7   : > { %2534 = vst.msk [vmem:[#allocation3 + $0x98] sm:$0xff] %vm7897_vm9, %v2502_v48  ;;  %vm7917_vm9 = vmmov %vm7872_vm1 }
 0x2aa   : > { %v2240_v63 = vpop.xlane.xlu1 %2239 }
 0x2ab   : > { %v2487_v8 = vsel %vm7896_vm11, %v2240_v63, %v2455_v61  ;;  %vm7915_vm11 = vmmov %vm7872_vm1  ;;  %v2474_v63 = vld [vmem:[#allocation3 + $0xb8] sm:$0xff] }
 0x2ac   : > { %2519 = vst.msk [vmem:[#allocation3 + $0x20] sm:$0xff] %vm7898_vm2, %v2487_v8  ;;  %vm7918_vm2 = vcmp.gt.f32.partialorder %v6008_v33, %v6004_v50  ;;  %v2461_v50 = vld [vmem:[#allocation3 + $0x50] sm:$0xff] }
 0x2ad   : > { %v7924_v8 = vld [vmem:[#allocation58_spill] sm:$0xff] }
 0x2b1   : > { %v2288_v13 = vpop.xlane.xlu1 %2287 }
 0x2b2   : > { %v2503_v45 = vsel %vm7901_vm15, %v2288_v13, %v2471_v21  ;;  %vm7919_vm15 = vmmov %vm7872_vm1 }
 0x2b3   : > { %2535 = vst.msk [vmem:[#allocation3 + $0xa0] sm:$0xff] %vm7902_vm5, %v2503_v45  ;;  %vm7920_vm5 = vcmp.gt.f32.partialorder %v6025_v36, %v6023_v2  ;;  %v2476_v36 = vld [vmem:[#allocation3 + $0xc8] sm:$0xff]  ;;  %v7927_v2 = vld [vmem:[#allocation90_spill] sm:$0xff] }
 0x2b4   : > { %v7931_v45 = vld [vmem:[#allocation85_spill] sm:$0xff] }
 0x2b5   : > { %v2243_v26 = vpop.xlane.xlu0 %2242 }
 0x2b6   : > { %v2488_v56 = vsel %vm7905_vm14, %v2243_v26, %v2456_v12  ;;  %vm7921_vm14 = vmmov %vm7872_vm1  ;;  %v7928_v12 = vld [vmem:[#allocation14_spill] sm:$0xff]  ;;  %v7932_v26 = vld [vmem:[#allocation89_spill] sm:$0xff] }
 0x2b7   : > { %2520 = vst.msk [vmem:[#allocation3 + $0x28] sm:$0xff] %vm7906_vm8, %v2488_v56  ;;  %v7935_v56 = vld [vmem:[#allocation40_spill] sm:$0xff] }
 0x2bf   : > { %v2246_v55 = vpop.xlane.xlu1 %2245 }
 0x2c0   : > { %v2489_v6 = vsel %vm2360_vm7, %v2246_v55, %v2457_v20  ;;  %vm7916_vm7 = vcmp.gt.f32.partialorder %v5979_v62, %v5973_v41  ;;  %v2460_v41 = vld [vmem:[#allocation3 + $0x48] sm:$0xff]  ;;  %v7922_v62 = vld [vmem:[#allocation28_spill] sm:$0xff]  ;;  %v7936_v20 = vld [vmem:[#allocation27_spill] sm:$0xff] }
 0x2c1   : > { %2521 = vst.msk [vmem:[#allocation3 + $0x30] sm:$0xff] %vm7872_vm1, %v2489_v6  ;;  %vm7923_vm8 = vcmp.gt.f32.partialorder %v6067_v1, %v7922_v62  ;;  %v2477_v1 = vld [vmem:[#allocation3 + $0xd0] sm:$0xff]  ;;  %v2463_v55 = vld [vmem:[#allocation3 + $0x60] sm:$0xff] }
 0x2c4   : > { %v2291_v15 = vpop.xlane.xlu0 %2290 }
 0x2c5   : > { %v2504_v59 = vsel %vm7911_vm10, %v2291_v15, %v2472_v42  ;;  %vm7925_vm10 = vcmp.gt.f32.partialorder %v6088_v17, %v7924_v8  ;;  %v2462_v17 = vld [vmem:[#allocation3 + $0x58] sm:$0xff] }
 0x2c6   : > { %2536 = vst.msk [vmem:[#allocation3 + $0xa8] sm:$0xff] %vm7912_vm3, %v2504_v59  ;;  %vm7926_vm3 = vmmov %vm7872_vm1 }
 0x2c8   : > { %v2294_v34 = vpop.xlane.xlu1 %2293 }
 0x2c9   : > { %v2505_v31 = vsel %vm7914_vm4, %v2294_v34, %v2473_v39  ;;  %vm7929_vm4 = vcmp.gt.f32.partialorder %v7927_v2, %v7928_v12  ;;  %v2478_v39 = vld [vmem:[#allocation3 + $0xd8] sm:$0xff] }
 0x2ca   : > { %2537 = vst.msk [vmem:[#allocation3 + $0xb0] sm:$0xff] %vm7915_vm11, %v2505_v31  ;;  %vm7930_vm11 = vmmov %vm7872_vm1 }
 0x2cd   : > { %v2249_v43 = vpop.xlane.xlu0 %2248 }
 0x2ce   : > { %v2490_v61 = vsel %vm7916_vm7, %v2249_v43, %v2458_v35  ;;  %vm7933_vm7 = vcmp.gt.f32.partialorder %v7931_v45, %v7932_v26 }
 0x2cf   : > { %2522 = vst.msk [vmem:[#allocation3 + $0x38] sm:$0xff] %vm7917_vm9, %v2490_v61  ;;  %vm7934_vm9 = vmmov %vm7872_vm1 }
 0x2d0   : > { %v2252_v5 = vpop.xlane.xlu1 %2251 }
 0x2d1   : > { %v2491_v37 = vsel %vm7918_vm2, %v2252_v5, %v2459_v52  ;;  %vm7937_vm2 = vcmp.gt.f32.partialorder %v7935_v56, %v7936_v20  ;;  %v2482_v5 = vld [vmem:[#allocation3 + $0xf8] sm:$0xff] }
 0x2d2   : > { %2523 = vst.msk [vmem:[#allocation3 + $0x40] sm:$0xff] %vm7919_vm15, %v2491_v37  ;;  %vm7938_vm15 = vmmov %vm7872_vm1 }
 0x2d5   : > { %v2297_v10 = vpop.xlane.xlu0 %2296 }
 0x2d6   : > { %v2506_v48 = vsel %vm7920_vm5, %v2297_v10, %v2474_v63  ;;  %vm7940_vm5 = vcmp.gt.f32.partialorder %v6206_v58, %v7939_v49  ;;  %v2464_v58 = vld [vmem:[#allocation3 + $0x68] sm:$0xff] }
 0x2d7   : > { %2538 = vst.msk [vmem:[#allocation3 + $0xb8] sm:$0xff] %vm7921_vm14, %v2506_v48  ;;  %vm7941_vm14 = vmmov %vm7872_vm1 }
 0x2d8   : > { %v2300_v14 = vpop.xlane.xlu1 %2299 }
 0x2d9   : > { %v2507_v46 = vsel %vm7923_vm8, %v2300_v14, %v2475_v16  ;;  %vm7942_vm8 = vcmp.gt.f32.partialorder %v6244_v51, %v6240_v47  ;;  %v2465_v47 = vld [vmem:[#allocation3 + $0x70] sm:$0xff] }
 0x2da   : > { %2539 = vst.msk [vmem:[#allocation3 + $0xc0] sm:$0xff] %vm7872_vm1, %v2507_v46 }
 0x2dc   : > { %v2255_v33 = vpop.xlane.xlu0 %2254 }
 0x2dd   : > { %v2492_v21 = vsel %vm7925_vm10, %v2255_v33, %v2460_v41  ;;  %vm7943_vm10 = vcmp.gt.f32.partialorder %v6261_v60, %v6259_v7  ;;  %v2480_v60 = vld [vmem:[#allocation3 + $0xe8] sm:$0xff] }
 0x2de   : > { %2524 = vst.msk [vmem:[#allocation3 + $0x48] sm:$0xff] %vm7926_vm3, %v2492_v21  ;;  %vm7944_vm3 = vmmov %vm7872_vm1 }
 0x2e0   : > { %v2258_v13 = vpop.xlane.xlu1 %2257 }
 0x2e1   : > { %v2493_v38 = vsel %vm7929_vm4, %v2258_v13, %v2461_v50  ;;  %vm7945_vm4 = vcmp.gt.f32.partialorder %v6303_v28, %v6299_v3  ;;  %v2481_v3 = vld [vmem:[#allocation3 + $0xf0] sm:$0xff] }
 0x2e2   : > { %2525 = vst.msk [vmem:[#allocation3 + $0x50] sm:$0xff] %vm7930_vm11, %v2493_v38  ;;  %vm7946_vm11 = vmmov %vm7872_vm1 }
 0x2e5   : > { %v2303_v29 = vpop.xlane.xlu0 %2302 }
 0x2e6   : > { %v2508_v40 = vsel %vm7933_vm7, %v2303_v29, %v2476_v36  ;;  %vm7947_vm7 = vcmp.gt.f32.partialorder %v6324_v18, %v6318_v32  ;;  %v2466_v32 = vld [vmem:[#allocation3 + $0x78] sm:$0xff] }
 0x2e7   : > { %2540 = vst.msk [vmem:[#allocation3 + $0xc8] sm:$0xff] %vm7934_vm9, %v2508_v40  ;;  %vm7948_vm9 = vmmov %vm7872_vm1 }
 0x2e8   : > { %v2306_v27 = vpop.xlane.xlu1 %2305 }
 0x2e9   : > { %v2509_v42 = vsel %vm7937_vm2, %v2306_v27, %v2477_v1  ;;  %vm7949_vm2 = vmmov %vm7872_vm1 }
 0x2ea   : > { %2541 = vst.msk [vmem:[#allocation3 + $0xd0] sm:$0xff] %vm7938_vm15, %v2509_v42  ;;  %vm7950_vm15 = vcmp.gt.f32.partialorder %v6379_v57, %v6377_v4 }
 0x2ed   : > { %v2261_v54 = vpop.xlane.xlu0 %2260 }
 0x2ee   : > { %v2494_v6 = vsel %vm7940_vm5, %v2261_v54, %v2462_v17  ;;  %vm7951_vm5 = vmmov %vm7872_vm1 }
 0x2ef   : > { %v2264_v15 = vpop.xlane.xlu1 %2263  ;;  %2526 = vst.msk [vmem:[#allocation3 + $0x58] sm:$0xff] %vm7941_vm14, %v2494_v6  ;;  %vm7952_vm14 = vmmov %vm7872_vm1 }
 0x2f0   : > { %v2495_v30 = vsel %vm7942_vm8, %v2264_v15, %v2463_v55  ;;  %vm7954_vm8 = vmmov %vm7872_vm1 }
 0x2f1   : > { %2527 = vst.msk [vmem:[#allocation3 + $0x60] sm:$0xff] %vm7872_vm1, %v2495_v30 }
 0x2f3   : > { %v2309_v59 = vpop.xlane.xlu0 %2308 }
 0x2f4   : > { %v2510_v34 = vsel %vm7943_vm10, %v2309_v59, %v2478_v39 }
 0x2f5   : > { %2542 = vst.msk [vmem:[#allocation3 + $0xd8] sm:$0xff] %vm7944_vm3, %v2510_v34 }
 0x2f6   : > { %v2312_v35 = vpop.xlane.xlu1 %2311 }
 0x2f7   : > { %v2511_v22 = vsel %vm7945_vm4, %v2312_v35, %v2479_v0 }
 0x2f8   : > { %2543 = vst.msk [vmem:[#allocation3 + $0xe0] sm:$0xff] %vm7946_vm11, %v2511_v22 }
 0x2fb   : > { %v2267_v51 = vpop.xlane.xlu0 %2266 }
 0x2fc   : > { %v2496_v31 = vsel %vm7947_vm7, %v2267_v51, %v2464_v58 }
 0x2fd   : > { %2528 = vst.msk [vmem:[#allocation3 + $0x68] sm:$0xff] %vm7948_vm9, %v2496_v31 }
 0x2ff   : > { %v2270_v52 = vpop.xlane.xlu1 %2269 }
 0x300   : > { %v2497_v7 = vsel %vm2368_vm6, %v2270_v52, %v2465_v47  ;;  %vm7953_vm6 = vmmov %vm7872_vm1 }
 0x301   : > { %2529 = vst.msk [vmem:[#allocation3 + $0x70] sm:$0xff] %vm7949_vm2, %v2497_v7 }
 0x302   : > { %v2315_v28 = vpop.xlane.xlu0 %2314 }
 0x303   : > { %v2512_v43 = vsel %vm7950_vm15, %v2315_v28, %v2480_v60 }
 0x304   : > { %2544 = vst.msk [vmem:[#allocation3 + $0xe8] sm:$0xff] %vm7951_vm5, %v2512_v43 }
 0x305   : > { %v2318_v61 = vpop.xlane.xlu1 %2317 }
 0x306   : > { %v2513_v18 = vsel %vm2384_vm12, %v2318_v61, %v2481_v3 }
 0x307   : > { %2545 = vst.msk [vmem:[#allocation3 + $0xf0] sm:$0xff] %vm7952_vm14, %v2513_v18 }
 0x308   : > { %v2273_v44 = vpop.xlane.xlu0 %2272 }
 0x309   : > { %v2498_v19 = vsel %vm2369_vm13, %v2273_v44, %v2466_v32 }
 0x30a   : > { %2530 = vst.msk [vmem:[#allocation3 + $0x78] sm:$0xff] %vm7953_vm6, %v2498_v19  ;;  %2550 = sbr.rel (%p2824_p9) target bundleno = 820 (0x334), region = 52 }
 0x30c   : > { %v2321_v4 = vpop.xlane.xlu0 %2320 }
 0x30d   : > { %v2514_v57 = vsel %vm2385_vm0, %v2321_v4, %v2482_v5 }
 0x30e   : > { %2546 = vst.msk [vmem:[#allocation3 + $0xf8] sm:$0xff] %vm7954_vm8, %v2514_v57 }
 0x30f   : > { %v2551_v24 = vld [vmem:[#allocation3] sm:$0xff]  ;;  %v2552_v23 = vld [vmem:[#allocation3 + $0x8] sm:$0xff]  ;;  %v2553_v63 = vld [vmem:[#allocation3 + $0x10] sm:$0xff]  ;;  %vm7955_vm12 = vcmask 7168  }
 0x310   : > { %v2891_v37 = vtrunc.f32 %v2551_v24  ;;  %v2893_v16 = vtrunc.f32 %v2552_v23  ;;  %v2895_v9 = vtrunc.f32 %v2553_v63  ;;  %v2554_v25 = vld [vmem:[#allocation3 + $0x18] sm:$0xff]  ;;  %v2555_v10 = vld [vmem:[#allocation3 + $0x20] sm:$0xff]  ;;  %v2556_v48 = vld [vmem:[#allocation3 + $0x28] sm:$0xff] }
 0x311   : > { %v2897_v14 = vtrunc.f32 %v2554_v25  ;;  %v2899_v41 = vtrunc.f32 %v2555_v10  ;;  %v2901_v62 = vtrunc.f32 %v2556_v48  ;;  %v2557_v46 = vld [vmem:[#allocation3 + $0x30] sm:$0xff]  ;;  %v2558_v53 = vld [vmem:[#allocation3 + $0x38] sm:$0xff]  ;;  %v2559_v11 = vld [vmem:[#allocation3 + $0x40] sm:$0xff] }
 0x312   : > { %v2892_v50 = vcvt.f32.s32 %v2891_v37  ;;  %v2894_v33 = vcvt.f32.s32 %v2893_v16  ;;  %v2896_v8 = vcvt.f32.s32 %v2895_v9  ;;  %v2903_v21 = vtrunc.f32 %v2557_v46  ;;  %v2560_v13 = vld [vmem:[#allocation3 + $0x48] sm:$0xff]  ;;  %v2561_v36 = vld [vmem:[#allocation3 + $0x50] sm:$0xff]  ;;  %v2562_v2 = vld [vmem:[#allocation3 + $0x58] sm:$0xff] }
 0x313   : > { %v2898_v12 = vcvt.f32.s32 %v2897_v14  ;;  %v2900_v38 = vcvt.f32.s32 %v2899_v41  ;;  %v2902_v1 = vcvt.f32.s32 %v2901_v62  ;;  %v2905_v29 = vtrunc.f32 %v2558_v53  ;;  %v2563_v45 = vld [vmem:[#allocation3 + $0x60] sm:$0xff]  ;;  %v2564_v26 = vld [vmem:[#allocation3 + $0x68] sm:$0xff]  ;;  %v2565_v40 = vld [vmem:[#allocation3 + $0x70] sm:$0xff] }
 0x314   : > { %2615 = vst.msk [vmem:[%s3172_s12] sm:$0xff] %vm7955_vm12, %v2892_v50  ;;  %vm7956_vm13 = vmmov %vm7955_vm12  ;;  %v2904_v27 = vcvt.f32.s32 %v2903_v21  ;;  %v2907_v17 = vtrunc.f32 %v2559_v11  ;;  %v2909_v56 = vtrunc.f32 %v2560_v13  ;;  %v2911_v20 = vtrunc.f32 %v2561_v36  ;;  %v2566_v42 = vld [vmem:[#allocation3 + $0x78] sm:$0xff]  ;;  %v2567_v15 = vld [vmem:[#allocation3 + $0x80] sm:$0xff] }
 0x315   : > { %2616 = vst.msk [vmem:[%s3172_s12 + $0x8] sm:$0xff] %vm7956_vm13, %v2894_v33  ;;  %vm7957_vm0 = vmmov %vm7955_vm12  ;;  %v2906_v55 = vcvt.f32.s32 %v2905_v29  ;;  %v2913_v54 = vtrunc.f32 %v2562_v2  ;;  %v2915_v49 = vtrunc.f32 %v2563_v45  ;;  %v2917_v6 = vtrunc.f32 %v2564_v26  ;;  %v2568_v39 = vld [vmem:[#allocation3 + $0x88] sm:$0xff]  ;;  %v2569_v30 = vld [vmem:[#allocation3 + $0x90] sm:$0xff] }
 0x316   : > { %2617 = vst.msk [vmem:[%s3172_s12 + $0x10] sm:$0xff] %vm7957_vm0, %v2896_v8  ;;  %vm7958_vm1 = vmmov %vm7957_vm0  ;;  %v2908_v0 = vcvt.f32.s32 %v2907_v17  ;;  %v2910_v59 = vcvt.f32.s32 %v2909_v56  ;;  %v2912_v34 = vcvt.f32.s32 %v2911_v20  ;;  %v2919_v35 = vtrunc.f32 %v2565_v40  ;;  %v2570_v58 = vld [vmem:[#allocation3 + $0x98] sm:$0xff]  ;;  %v2571_v22 = vld [vmem:[#allocation3 + $0xa0] sm:$0xff] }
 0x317   : > { %2618 = vst.msk [vmem:[%s3172_s12 + $0x18] sm:$0xff] %vm7958_vm1, %v2898_v12  ;;  %vm7959_vm10 = vmmov %vm7957_vm0  ;;  %v2572_v47 = vld [vmem:[#allocation3 + $0xa8] sm:$0xff]  ;;  %v2914_v51 = vcvt.f32.s32 %v2913_v54  ;;  %v2916_v31 = vcvt.f32.s32 %v2915_v49  ;;  %v2918_v52 = vcvt.f32.s32 %v2917_v6  ;;  %v2921_v60 = vtrunc.f32 %v2566_v42  ;;  %v2573_v7 = vld [vmem:[#allocation3 + $0xb0] sm:$0xff] }
 0x318   : > { %2619 = vst.msk [vmem:[%s3172_s12 + $0x20] sm:$0xff] %vm7959_vm10, %v2900_v38  ;;  %vm7960_vm3 = vmmov %vm7957_vm0  ;;  %v2920_v3 = vcvt.f32.s32 %v2919_v35  ;;  %v2923_v28 = vtrunc.f32 %v2567_v15  ;;  %v2925_v43 = vtrunc.f32 %v2568_v39  ;;  %v2927_v61 = vtrunc.f32 %v2569_v30  ;;  %v2574_v32 = vld [vmem:[#allocation3 + $0xb8] sm:$0xff]  ;;  %v2575_v4 = vld [vmem:[#allocation3 + $0xc0] sm:$0xff] }
 0x319   : > { %2620 = vst.msk [vmem:[%s3172_s12 + $0x28] sm:$0xff] %vm7960_vm3, %v2902_v1  ;;  %vm7961_vm4 = vmmov %vm7957_vm0  ;;  %v2922_v18 = vcvt.f32.s32 %v2921_v60  ;;  %v2929_v44 = vtrunc.f32 %v2570_v58  ;;  %v2931_v19 = vtrunc.f32 %v2571_v22  ;;  %v2933_v5 = vtrunc.f32 %v2572_v47  ;;  %v2576_v57 = vld [vmem:[#allocation3 + $0xc8] sm:$0xff]  ;;  %v2577_v24 = vld [vmem:[#allocation3 + $0xd0] sm:$0xff] }
 0x31a   : > { %2621 = vst.msk [vmem:[%s3172_s12 + $0x30] sm:$0xff] %vm7961_vm4, %v2904_v27  ;;  %vm7962_vm11 = vmmov %vm7957_vm0  ;;  %v2924_v23 = vcvt.f32.s32 %v2923_v28  ;;  %v2926_v63 = vcvt.f32.s32 %v2925_v43  ;;  %v2928_v37 = vcvt.f32.s32 %v2927_v61  ;;  %v2935_v16 = vtrunc.f32 %v2573_v7  ;;  %v2578_v9 = vld [vmem:[#allocation3 + $0xd8] sm:$0xff]  ;;  %v2579_v25 = vld [vmem:[#allocation3 + $0xe0] sm:$0xff] }
 0x31b   : > { %2622 = vst.msk [vmem:[%s3172_s12 + $0x38] sm:$0xff] %vm7962_vm11, %v2906_v55  ;;  %vm7963_vm7 = vmmov %vm7957_vm0  ;;  %v2580_v10 = vld [vmem:[#allocation3 + $0xe8] sm:$0xff]  ;;  %v2930_v48 = vcvt.f32.s32 %v2929_v44  ;;  %v2932_v14 = vcvt.f32.s32 %v2931_v19  ;;  %v2934_v41 = vcvt.f32.s32 %v2933_v5  ;;  %v2937_v62 = vtrunc.f32 %v2574_v32  ;;  %v2581_v46 = vld [vmem:[#allocation3 + $0xf0] sm:$0xff] }
 0x31c   : > { %2623 = vst.msk [vmem:[%s3172_s12 + $0x40] sm:$0xff] %vm7963_vm7, %v2908_v0  ;;  %vm7964_vm9 = vmmov %vm7957_vm0  ;;  %v2936_v53 = vcvt.f32.s32 %v2935_v16  ;;  %v2939_v11 = vtrunc.f32 %v2575_v4  ;;  %v2941_v50 = vtrunc.f32 %v2576_v57  ;;  %v2943_v33 = vtrunc.f32 %v2577_v24  ;;  %v2582_v8 = vld [vmem:[#allocation3 + $0xf8] sm:$0xff] }
 0x31d   : > { %2624 = vst.msk [vmem:[%s3172_s12 + $0x48] sm:$0xff] %vm7964_vm9, %v2910_v59  ;;  %vm7965_vm2 = vmmov %vm7957_vm0  ;;  %v2938_v21 = vcvt.f32.s32 %v2937_v62  ;;  %v2945_v13 = vtrunc.f32 %v2578_v9  ;;  %v2947_v36 = vtrunc.f32 %v2579_v25  ;;  %v2949_v2 = vtrunc.f32 %v2580_v10 }
 0x31e   : > { %2625 = vst.msk [vmem:[%s3172_s12 + $0x50] sm:$0xff] %vm7965_vm2, %v2912_v34  ;;  %vm7966_vm15 = vmmov %vm7957_vm0  ;;  %v2940_v12 = vcvt.f32.s32 %v2939_v11  ;;  %v2942_v38 = vcvt.f32.s32 %v2941_v50  ;;  %v2944_v1 = vcvt.f32.s32 %v2943_v33  ;;  %v2951_v29 = vtrunc.f32 %v2581_v46 }
 0x31f   : > { %2626 = vst.msk [vmem:[%s3172_s12 + $0x58] sm:$0xff] %vm7966_vm15, %v2914_v51  ;;  %vm7967_vm5 = vmmov %vm7957_vm0  ;;  %v2946_v45 = vcvt.f32.s32 %v2945_v13  ;;  %v2948_v26 = vcvt.f32.s32 %v2947_v36  ;;  %v2950_v40 = vcvt.f32.s32 %v2949_v2  ;;  %v2953_v27 = vtrunc.f32 %v2582_v8 }
 0x320   : > { %2627 = vst.msk [vmem:[%s3172_s12 + $0x60] sm:$0xff] %vm7967_vm5, %v2916_v31  ;;  %vm7968_vm14 = vmmov %vm7957_vm0  ;;  %v2952_v17 = vcvt.f32.s32 %v2951_v29 }
 0x321   : > { %2628 = vst.msk [vmem:[%s3172_s12 + $0x68] sm:$0xff] %vm7968_vm14, %v2918_v52  ;;  %vm7969_vm6 = vmmov %vm7957_vm0  ;;  %v2954_v56 = vcvt.f32.s32 %v2953_v27 }
 0x322   : > { %2629 = vst.msk [vmem:[%s3172_s12 + $0x70] sm:$0xff] %vm7969_vm6, %v2920_v3  ;;  %vm7970_vm8 = vmmov %vm7957_vm0 }
 0x323   : > { %2630 = vst.msk [vmem:[%s3172_s12 + $0x78] sm:$0xff] %vm7970_vm8, %v2922_v18  ;;  %vm7971_vm12 = vmmov %vm7957_vm0 }
 0x324   : > { %2631 = vst.msk [vmem:[%s3172_s12 + $0x80] sm:$0xff] %vm7971_vm12, %v2924_v23  ;;  %vm7972_vm13 = vmmov %vm7957_vm0 }
 0x325   : > { %2632 = vst.msk [vmem:[%s3172_s12 + $0x88] sm:$0xff] %vm7972_vm13, %v2926_v63  ;;  %vm7973_vm1 = vmmov %vm7957_vm0 }
 0x326   : > { %2633 = vst.msk [vmem:[%s3172_s12 + $0x90] sm:$0xff] %vm7957_vm0, %v2928_v37  ;;  %vm7974_vm10 = vmmov %vm7957_vm0 }
 0x327   : > { %2634 = vst.msk [vmem:[%s3172_s12 + $0x98] sm:$0xff] %vm7973_vm1, %v2930_v48  ;;  %vm7975_vm3 = vmmov %vm7957_vm0 }
 0x328   : > { %2635 = vst.msk [vmem:[%s3172_s12 + $0xa0] sm:$0xff] %vm7974_vm10, %v2932_v14  ;;  %vm7976_vm4 = vmmov %vm7957_vm0 }
 0x329   : > { %2636 = vst.msk [vmem:[%s3172_s12 + $0xa8] sm:$0xff] %vm7975_vm3, %v2934_v41  ;;  %vm7977_vm11 = vmmov %vm7957_vm0 }
 0x32a   : > { %2637 = vst.msk [vmem:[%s3172_s12 + $0xb0] sm:$0xff] %vm7976_vm4, %v2936_v53  ;;  %vm7978_vm7 = vmmov %vm7957_vm0 }
 0x32b   : > { %2638 = vst.msk [vmem:[%s3172_s12 + $0xb8] sm:$0xff] %vm7977_vm11, %v2938_v21  ;;  %vm7979_vm9 = vmmov %vm7957_vm0 }
 0x32c   : > { %2639 = vst.msk [vmem:[%s3172_s12 + $0xc0] sm:$0xff] %vm7978_vm7, %v2940_v12  ;;  %vm7980_vm2 = vmmov %vm7957_vm0 }
 0x32d   : > { %2640 = vst.msk [vmem:[%s3172_s12 + $0xc8] sm:$0xff] %vm7979_vm9, %v2942_v38  ;;  %vm7981_vm15 = vmmov %vm7957_vm0 }
 0x32e   : > { %2641 = vst.msk [vmem:[%s3172_s12 + $0xd0] sm:$0xff] %vm7980_vm2, %v2944_v1  ;;  %vm7982_vm5 = vmmov %vm7957_vm0 }
 0x32f   : > { %2642 = vst.msk [vmem:[%s3172_s12 + $0xd8] sm:$0xff] %vm7981_vm15, %v2946_v45  ;;  %vm7983_vm14 = vmmov %vm7957_vm0 }
 0x330   : > { %2643 = vst.msk [vmem:[%s3172_s12 + $0xe0] sm:$0xff] %vm7982_vm5, %v2948_v26  ;;  %vm7984_vm6 = vmmov %vm7957_vm0 }
 0x331   : > { %2644 = vst.msk [vmem:[%s3172_s12 + $0xe8] sm:$0xff] %vm7983_vm14, %v2950_v40  ;;  %vm7985_vm8 = vmmov %vm7957_vm0 }
 0x332   : > { %2645 = vst.msk [vmem:[%s3172_s12 + $0xf0] sm:$0xff] %vm7984_vm6, %v2952_v17 }
 0x333   : > { %2646 = vst.msk [vmem:[%s3172_s12 + $0xf8] sm:$0xff] %vm7985_vm8, %v2954_v56 }
 0x334 PF: > { %s16_s25 = sadd.s32 1, %s3070_s25   ;;  %s7986_s21 = smov %s3062_s23 }
 0x335   : > { %p13_p10 = scmp.ge.s32.totalorder %s16_s25, 11   ;;  %s7987_s22 = smov %s3066_s24 }
 0x336   : > { %s7988_s23 = smov %s7991_s26  ;;  %s7989_s24 = smov %s7995_s27 }
 0x337   :  { %15 = sbr.rel (!%p13_p10) target bundleno = 3 (0x3), region = 97 }

</bundles_post_ra>
